<compile_context>
chip_gen: v7x
topology: tpu7x:2x2x1
jax: 0.10.0
libtpu: 0.0.40
codegen_flags: <defaults>
</compile_context>

<pallas_src>
import jax
import jax.numpy as jnp
import numpy as np
from jax.experimental import pallas as pl
from jax.experimental.pallas import tpu as pltpu

_BN_EPS = 1e-5
_LANES = 128  # TPU lane width: channel dims are padded to a multiple of this.


def _round_up(n, m):
    return ((n + m - 1) // m) * m


def _double_conv_kernel(x_ref, w1_ref, b1_ref, w2_ref, b2_ref, o_ref,
                        xpad_ref, hpad_ref, col1_ref, col2_ref):
    # x_ref:   (1, H, W, Cip)      bf16 input tile (channels lane-padded)
    # w1_ref:  (9*Cip, Cmp)        bf16, BN1 scale already folded in
    # b1_ref:  (1, Cmp)            f32 folded BN1 bias
    # w2_ref:  (9*Cmp, Cop)        bf16, BN2 scale already folded in
    # b2_ref:  (1, Cop)            f32 folded BN2 bias
    # o_ref:   (1, H, W, Cop)      f32 output tile
    # xpad_ref:(H+2, W+2, Cip) f32 zero-bordered input  ('SAME' halo in VMEM)
    # hpad_ref:(H+2, W+2, Cmp) f32 zero-bordered stage-1 activations
    # col*_ref: im2col scratch buffers (bf16) feeding one MXU matmul per stage
    H = o_ref.shape[1]
    W = o_ref.shape[2]
    Cip = x_ref.shape[3]
    Cmp = hpad_ref.shape[2]
    Cop = o_ref.shape[3]
    HW = H * W

    # Zero the halo buffers every step (cheap; keeps the 1-px zero border and is
    # safe under megacore splitting of the parallel batch axis).
    xpad_ref[...] = jnp.zeros_like(xpad_ref)
    hpad_ref[...] = jnp.zeros_like(hpad_ref)
    xpad_ref[1:H + 1, 1:W + 1, :] = x_ref[0].astype(jnp.float32)

    # ---- stage 1: conv3x3 (BN1 folded) + bias + ReLU --------------------
    # im2col: one (HW, 9*Cip) @ (9*Cip, Cmp) matmul instead of 9 small ones.
    for tap in range(9):
        dy, dx = tap // 3, tap % 3
        col1_ref[:, tap * Cip:(tap + 1) * Cip] = (
            xpad_ref[dy:dy + H, dx:dx + W, :]
            .reshape(HW, Cip).astype(jnp.bfloat16))
    h = jnp.dot(col1_ref[...], w1_ref[...],
                preferred_element_type=jnp.float32)      # (HW, Cmp) f32
    h = jnp.maximum(h + b1_ref[...], 0.0)                # folded BN bias + ReLU
    hpad_ref[1:H + 1, 1:W + 1, :] = h.reshape(H, W, Cmp)

    # ---- stage 2: conv3x3 (BN2 folded) + bias + ReLU --------------------
    for tap in range(9):
        dy, dx = tap // 3, tap % 3
        col2_ref[:, tap * Cmp:(tap + 1) * Cmp] = (
            hpad_ref[dy:dy + H, dx:dx + W, :]
            .reshape(HW, Cmp).astype(jnp.bfloat16))
    y = jnp.dot(col2_ref[...], w2_ref[...],
                preferred_element_type=jnp.float32)      # (HW, Cop) f32
    y = jnp.maximum(y + b2_ref[...], 0.0)
    o_ref[0] = y.reshape(H, W, Cop).astype(o_ref.dtype)  # lane-dense store


def _fold_and_pack(w_hwio, bn, cin_pad, cout_pad, eps=_BN_EPS):
    """Fold BN scale into the conv weights; pad channels to lane width; bf16."""
    gamma, beta, mean, var = bn
    scale = gamma / jnp.sqrt(var + eps)
    bias = beta - mean * scale
    w = w_hwio * scale[None, None, None, :]               # BN scale folded in
    kh, kw, cin, cout = w.shape
    w = jnp.pad(w, ((0, 0), (0, 0), (0, cin_pad - cin), (0, cout_pad - cout)))
    w = w.reshape(kh * kw * cin_pad, cout_pad).astype(jnp.bfloat16)
    b = jnp.pad(bias, (0, cout_pad - cout)).reshape(1, cout_pad)
    return w, b.astype(jnp.float32)


def double_conv(x_nchw, params):
    """DoubleConv forward. Input/output are NCHW f32 (PyTorch convention)."""
    (w1, bn1), (w2, bn2) = params
    N, Cin, H, W = x_nchw.shape
    Cmid = w1.shape[-1]
    Cout = w2.shape[-1]
    Cip, Cmp, Cop = (_round_up(c, _LANES) for c in (Cin, Cmid, Cout))

    w1p, b1p = _fold_and_pack(w1, bn1, Cip, Cmp)
    w2p, b2p = _fold_and_pack(w2, bn2, Cmp, Cop)

    # NCHW -> NHWC (channels on the lane axis), bf16, channel-pad to 128 lanes.
    x = jnp.transpose(x_nchw, (0, 2, 3, 1)).astype(jnp.bfloat16)
    x = jnp.pad(x, ((0, 0), (0, 0), (0, 0), (0, Cip - Cin)))

    out = pl.pallas_call(
        _double_conv_kernel,
        out_shape=jax.ShapeDtypeStruct((N, H, W, Cop), jnp.float32),
        grid_spec=pltpu.PrefetchScalarGridSpec(
            num_scalar_prefetch=0,
            grid=(N,),
            in_specs=[
                pl.BlockSpec((1, H, W, Cip), lambda n: (n, 0, 0, 0)),
                pl.BlockSpec((9 * Cip, Cmp), lambda n: (0, 0)),
                pl.BlockSpec((1, Cmp), lambda n: (0, 0)),
                pl.BlockSpec((9 * Cmp, Cop), lambda n: (0, 0)),
                pl.BlockSpec((1, Cop), lambda n: (0, 0)),
            ],
            out_specs=pl.BlockSpec((1, H, W, Cop), lambda n: (n, 0, 0, 0)),
            scratch_shapes=[
                pltpu.VMEM((H + 2, W + 2, Cip), jnp.float32),   # padded input
                pltpu.VMEM((H + 2, W + 2, Cmp), jnp.float32),   # padded stage-1 act
                pltpu.VMEM((H * W, 9 * Cip), jnp.bfloat16),     # im2col, stage 1
                pltpu.VMEM((H * W, 9 * Cmp), jnp.bfloat16),     # im2col, stage 2
            ],
        ),
        compiler_params=pltpu.CompilerParams(
            dimension_semantics=("parallel",),
            vmem_limit_bytes=32 * 1024 * 1024,
        ),
    )(x, w1p, b1p, w2p, b2p)

    # Drop channel padding, back to NCHW.
    return jnp.transpose(out[..., :Cout], (0, 3, 1, 2))


def init_double_conv_params(key, in_channels, out_channels, mid_channels=None):
    if not mid_channels:
        mid_channels = out_channels
    ks = jax.random.split(key, 10)

    def conv_w(k, cin, cout):
        fan_in = cin * 9
        w_oihw = jax.random.normal(k, (cout, cin, 3, 3), jnp.float32) * (2.0 / fan_in) ** 0.5
        return jnp.transpose(w_oihw, (2, 3, 1, 0))          # OIHW -> HWIO

    def bn(kg, kb, km, kv, c):
        gamma = 1.0 + 0.1 * jax.random.normal(kg, (c,), jnp.float32)
        beta = 0.1 * jax.random.normal(kb, (c,), jnp.float32)
        mean = 0.1 * jax.random.normal(km, (c,), jnp.float32)
        var = jnp.abs(jax.random.normal(kv, (c,), jnp.float32)) + 0.5
        return (gamma, beta, mean, var)

    w1 = conv_w(ks[0], in_channels, mid_channels)
    bn1 = bn(ks[1], ks[2], ks[3], ks[4], mid_channels)
    w2 = conv_w(ks[5], mid_channels, out_channels)
    bn2 = bn(ks[6], ks[7], ks[8], ks[9], out_channels)
    return ((w1, bn1), (w2, bn2))


def _reference_double_conv(x_nchw, params, eps=_BN_EPS):
    """Pure-JAX reference (lax.conv, eval-mode BN). Emulates the kernel's bf16
    MXU operands so the comparison isolates logic errors from dtype rounding."""
    dn = ("NHWC", "HWIO", "NHWC")
    bf = lambda a: a.astype(jnp.bfloat16).astype(jnp.float32)
    x = jnp.transpose(x_nchw, (0, 2, 3, 1))
    for w, (gamma, beta, mean, var) in params:
        scale = gamma / jnp.sqrt(var + eps)
        bias = beta - mean * scale
        wf = bf(w * scale[None, None, None, :])
        x = jax.lax.conv_general_dilated(
            bf(x), wf, (1, 1), "SAME", dimension_numbers=dn,
            precision=jax.lax.Precision.HIGHEST)
        x = jnp.maximum(x + bias, 0.0)
    return jnp.transpose(x, (0, 3, 1, 2))


if __name__ == "__main__":
    key = jax.random.PRNGKey(0)
    k_x, k_p = jax.random.split(key)

    N, C_in, H, W = 2, 4, 16, 16
    C_out = 8  # mid_channels defaults to out_channels

    x = jax.random.normal(k_x, (N, C_in, H, W), jnp.float32)
    params = init_double_conv_params(k_p, C_in, C_out)

    y = jax.block_until_ready(double_conv(x, params))
    assert y.shape == (N, C_out, H, W), y.shape

    y_ref = jax.block_until_ready(_reference_double_conv(x, params))
    np.testing.assert_allclose(np.asarray(y, np.float32),
                               np.asarray(y_ref, np.float32),
                               rtol=2e-2, atol=2e-2)
    print("KERNEL_OK")
</pallas_src>

<mosaic_0001>
module attributes {stable_mosaic.version = 11 : i64} {
  func.func @_double_conv_kernel(%arg0: i32, %arg1: memref<1x16x16x128xbf16, #tpu.memory_space<vmem>>, %arg2: memref<1152x128xbf16, #tpu.memory_space<vmem>>, %arg3: memref<1x128xf32, #tpu.memory_space<vmem>>, %arg4: memref<1152x128xbf16, #tpu.memory_space<vmem>>, %arg5: memref<1x128xf32, #tpu.memory_space<vmem>>, %arg6: memref<1x16x16x128xf32, #tpu.memory_space<vmem>>, %arg7: memref<18x18x128xf32, #tpu.memory_space<vmem>>, %arg8: memref<18x18x128xf32, #tpu.memory_space<vmem>>, %arg9: memref<256x1152xbf16, #tpu.memory_space<vmem>>, %arg10: memref<256x1152xbf16, #tpu.memory_space<vmem>>) attributes {dimension_semantics = [#tpu.dimension_semantics<parallel>], iteration_bounds = array<i64: 2>, scalar_prefetch = 0 : i64, scratch_operands = 4 : i64, tpu.core_type = #tpu.core_type<tc>, window_params = [{transform_indices = @transform_0, window_bounds = array<i64: 1, 16, 16, 128>}, {pipeline_mode = #tpu.pipeline_mode<synchronous>, transform_indices = @transform_1, window_bounds = array<i64: 1152, 128>}, {pipeline_mode = #tpu.pipeline_mode<synchronous>, transform_indices = @transform_2, window_bounds = array<i64: 1, 128>}, {pipeline_mode = #tpu.pipeline_mode<synchronous>, transform_indices = @transform_3, window_bounds = array<i64: 1152, 128>}, {pipeline_mode = #tpu.pipeline_mode<synchronous>, transform_indices = @transform_4, window_bounds = array<i64: 1, 128>}, {transform_indices = @transform_5, window_bounds = array<i64: 1, 16, 16, 128>}]} {
    %cst = arith.constant 0.000000e+00 : f32
    %0 = vector.broadcast %cst : f32 to vector<18x18x128xf32>
    %c0 = arith.constant 0 : index
    %c0_0 = arith.constant 0 : index
    %c0_1 = arith.constant 0 : index
    %1 = vector.load %arg7[%c0, %c0_0, %c0_1] : memref<18x18x128xf32, #tpu.memory_space<vmem>>, vector<18x18x128xf32>
    tpu.vector_store %arg7[%c0, %c0_0, %c0_1], %0 {strides = array<i32>} : memref<18x18x128xf32, #tpu.memory_space<vmem>>, vector<18x18x128xf32>,
    %cst_2 = arith.constant 0.000000e+00 : f32
    %2 = vector.broadcast %cst_2 : f32 to vector<18x18x128xf32>
    %c0_3 = arith.constant 0 : index
    %c0_4 = arith.constant 0 : index
    %c0_5 = arith.constant 0 : index
    %3 = vector.load %arg8[%c0_3, %c0_4, %c0_5] : memref<18x18x128xf32, #tpu.memory_space<vmem>>, vector<18x18x128xf32>
    tpu.vector_store %arg8[%c0_3, %c0_4, %c0_5], %2 {strides = array<i32>} : memref<18x18x128xf32, #tpu.memory_space<vmem>>, vector<18x18x128xf32>,
    %c0_6 = arith.constant 0 : index
    %c0_7 = arith.constant 0 : index
    %c0_8 = arith.constant 0 : index
    %c0_9 = arith.constant 0 : index
    %4 = vector.load %arg1[%c0_6, %c0_7, %c0_8, %c0_9] : memref<1x16x16x128xbf16, #tpu.memory_space<vmem>>, vector<1x16x16x128xbf16>
    %5 = vector.shape_cast %4 : vector<1x16x16x128xbf16> to vector<16x16x128xbf16>
    %6 = arith.extf %5 : vector<16x16x128xbf16> to vector<16x16x128xf32>
    %c1 = arith.constant 1 : index
    %c1_10 = arith.constant 1 : index
    %c0_11 = arith.constant 0 : index
    %7 = vector.load %arg7[%c1, %c1_10, %c0_11] : memref<18x18x128xf32, #tpu.memory_space<vmem>>, vector<16x16x128xf32>
    tpu.vector_store %arg7[%c1, %c1_10, %c0_11], %6 {strides = array<i32>} : memref<18x18x128xf32, #tpu.memory_space<vmem>>, vector<16x16x128xf32>,
    %c0_12 = arith.constant 0 : index
    %c0_13 = arith.constant 0 : index
    %c0_14 = arith.constant 0 : index
    %8 = vector.load %arg7[%c0_12, %c0_13, %c0_14] : memref<18x18x128xf32, #tpu.memory_space<vmem>>, vector<16x16x128xf32>
    %9 = vector.shape_cast %8 : vector<16x16x128xf32> to vector<256x128xf32>
    %10 = arith.truncf %9 : vector<256x128xf32> to vector<256x128xbf16>
    %c0_15 = arith.constant 0 : index
    %c0_16 = arith.constant 0 : index
    %11 = vector.load %arg9[%c0_15, %c0_16] : memref<256x1152xbf16, #tpu.memory_space<vmem>>, vector<256x128xbf16>
    tpu.vector_store %arg9[%c0_15, %c0_16], %10 {strides = array<i32>} : memref<256x1152xbf16, #tpu.memory_space<vmem>>, vector<256x128xbf16>,
    %c0_17 = arith.constant 0 : index
    %c1_18 = arith.constant 1 : index
    %c0_19 = arith.constant 0 : index
    %12 = vector.load %arg7[%c0_17, %c1_18, %c0_19] : memref<18x18x128xf32, #tpu.memory_space<vmem>>, vector<16x16x128xf32>
    %13 = vector.shape_cast %12 : vector<16x16x128xf32> to vector<256x128xf32>
    %14 = arith.truncf %13 : vector<256x128xf32> to vector<256x128xbf16>
    %c0_20 = arith.constant 0 : index
    %c128 = arith.constant 128 : index
    %15 = vector.load %arg9[%c0_20, %c128] : memref<256x1152xbf16, #tpu.memory_space<vmem>>, vector<256x128xbf16>
    tpu.vector_store %arg9[%c0_20, %c128], %14 {strides = array<i32>} : memref<256x1152xbf16, #tpu.memory_space<vmem>>, vector<256x128xbf16>,
    %c0_21 = arith.constant 0 : index
    %c2 = arith.constant 2 : index
    %c0_22 = arith.constant 0 : index
    %16 = vector.load %arg7[%c0_21, %c2, %c0_22] : memref<18x18x128xf32, #tpu.memory_space<vmem>>, vector<16x16x128xf32>
    %17 = vector.shape_cast %16 : vector<16x16x128xf32> to vector<256x128xf32>
    %18 = arith.truncf %17 : vector<256x128xf32> to vector<256x128xbf16>
    %c0_23 = arith.constant 0 : index
    %c256 = arith.constant 256 : index
    %19 = vector.load %arg9[%c0_23, %c256] : memref<256x1152xbf16, #tpu.memory_space<vmem>>, vector<256x128xbf16>
    tpu.vector_store %arg9[%c0_23, %c256], %18 {strides = array<i32>} : memref<256x1152xbf16, #tpu.memory_space<vmem>>, vector<256x128xbf16>,
    %c1_24 = arith.constant 1 : index
    %c0_25 = arith.constant 0 : index
    %c0_26 = arith.constant 0 : index
    %20 = vector.load %arg7[%c1_24, %c0_25, %c0_26] : memref<18x18x128xf32, #tpu.memory_space<vmem>>, vector<16x16x128xf32>
    %21 = vector.shape_cast %20 : vector<16x16x128xf32> to vector<256x128xf32>
    %22 = arith.truncf %21 : vector<256x128xf32> to vector<256x128xbf16>
    %c0_27 = arith.constant 0 : index
    %c384 = arith.constant 384 : index
    %23 = vector.load %arg9[%c0_27, %c384] : memref<256x1152xbf16, #tpu.memory_space<vmem>>, vector<256x128xbf16>
    tpu.vector_store %arg9[%c0_27, %c384], %22 {strides = array<i32>} : memref<256x1152xbf16, #tpu.memory_space<vmem>>, vector<256x128xbf16>,
    %c1_28 = arith.constant 1 : index
    %c1_29 = arith.constant 1 : index
    %c0_30 = arith.constant 0 : index
    %24 = vector.load %arg7[%c1_28, %c1_29, %c0_30] : memref<18x18x128xf32, #tpu.memory_space<vmem>>, vector<16x16x128xf32>
    %25 = vector.shape_cast %24 : vector<16x16x128xf32> to vector<256x128xf32>
    %26 = arith.truncf %25 : vector<256x128xf32> to vector<256x128xbf16>
    %c0_31 = arith.constant 0 : index
    %c512 = arith.constant 512 : index
    %27 = vector.load %arg9[%c0_31, %c512] : memref<256x1152xbf16, #tpu.memory_space<vmem>>, vector<256x128xbf16>
    tpu.vector_store %arg9[%c0_31, %c512], %26 {strides = array<i32>} : memref<256x1152xbf16, #tpu.memory_space<vmem>>, vector<256x128xbf16>,
    %c1_32 = arith.constant 1 : index
    %c2_33 = arith.constant 2 : index
    %c0_34 = arith.constant 0 : index
    %28 = vector.load %arg7[%c1_32, %c2_33, %c0_34] : memref<18x18x128xf32, #tpu.memory_space<vmem>>, vector<16x16x128xf32>
    %29 = vector.shape_cast %28 : vector<16x16x128xf32> to vector<256x128xf32>
    %30 = arith.truncf %29 : vector<256x128xf32> to vector<256x128xbf16>
    %c0_35 = arith.constant 0 : index
    %c640 = arith.constant 640 : index
    %31 = vector.load %arg9[%c0_35, %c640] : memref<256x1152xbf16, #tpu.memory_space<vmem>>, vector<256x128xbf16>
    tpu.vector_store %arg9[%c0_35, %c640], %30 {strides = array<i32>} : memref<256x1152xbf16, #tpu.memory_space<vmem>>, vector<256x128xbf16>,
    %c2_36 = arith.constant 2 : index
    %c0_37 = arith.constant 0 : index
    %c0_38 = arith.constant 0 : index
    %32 = vector.load %arg7[%c2_36, %c0_37, %c0_38] : memref<18x18x128xf32, #tpu.memory_space<vmem>>, vector<16x16x128xf32>
    %33 = vector.shape_cast %32 : vector<16x16x128xf32> to vector<256x128xf32>
    %34 = arith.truncf %33 : vector<256x128xf32> to vector<256x128xbf16>
    %c0_39 = arith.constant 0 : index
    %c768 = arith.constant 768 : index
    %35 = vector.load %arg9[%c0_39, %c768] : memref<256x1152xbf16, #tpu.memory_space<vmem>>, vector<256x128xbf16>
    tpu.vector_store %arg9[%c0_39, %c768], %34 {strides = array<i32>} : memref<256x1152xbf16, #tpu.memory_space<vmem>>, vector<256x128xbf16>,
    %c2_40 = arith.constant 2 : index
    %c1_41 = arith.constant 1 : index
    %c0_42 = arith.constant 0 : index
    %36 = vector.load %arg7[%c2_40, %c1_41, %c0_42] : memref<18x18x128xf32, #tpu.memory_space<vmem>>, vector<16x16x128xf32>
    %37 = vector.shape_cast %36 : vector<16x16x128xf32> to vector<256x128xf32>
    %38 = arith.truncf %37 : vector<256x128xf32> to vector<256x128xbf16>
    %c0_43 = arith.constant 0 : index
    %c896 = arith.constant 896 : index
    %39 = vector.load %arg9[%c0_43, %c896] : memref<256x1152xbf16, #tpu.memory_space<vmem>>, vector<256x128xbf16>
    tpu.vector_store %arg9[%c0_43, %c896], %38 {strides = array<i32>} : memref<256x1152xbf16, #tpu.memory_space<vmem>>, vector<256x128xbf16>,
    %c2_44 = arith.constant 2 : index
    %c2_45 = arith.constant 2 : index
    %c0_46 = arith.constant 0 : index
    %40 = vector.load %arg7[%c2_44, %c2_45, %c0_46] : memref<18x18x128xf32, #tpu.memory_space<vmem>>, vector<16x16x128xf32>
    %41 = vector.shape_cast %40 : vector<16x16x128xf32> to vector<256x128xf32>
    %42 = arith.truncf %41 : vector<256x128xf32> to vector<256x128xbf16>
    %c0_47 = arith.constant 0 : index
    %c1024 = arith.constant 1024 : index
    %43 = vector.load %arg9[%c0_47, %c1024] : memref<256x1152xbf16, #tpu.memory_space<vmem>>, vector<256x128xbf16>
    tpu.vector_store %arg9[%c0_47, %c1024], %42 {strides = array<i32>} : memref<256x1152xbf16, #tpu.memory_space<vmem>>, vector<256x128xbf16>,
    %c0_48 = arith.constant 0 : index
    %c0_49 = arith.constant 0 : index
    %44 = vector.load %arg9[%c0_48, %c0_49] : memref<256x1152xbf16, #tpu.memory_space<vmem>>, vector<256x1152xbf16>
    %c0_50 = arith.constant 0 : index
    %c0_51 = arith.constant 0 : index
    %45 = vector.load %arg2[%c0_50, %c0_51] : memref<1152x128xbf16, #tpu.memory_space<vmem>>, vector<1152x128xbf16>
    %cst_52 = arith.constant dense<0.000000e+00> : vector<256x128xf32>
    %46 = tpu.matmul %44, %45, %cst_52 {dimension_numbers = #tpu.dot_dimension_numbers<[1], [0], [0], [1], [0, 0, 1, 1], [], []>} : vector<256x1152xbf16>, vector<1152x128xbf16>, vector<256x128xf32> -> vector<256x128xf32>
    %c0_53 = arith.constant 0 : index
    %c0_54 = arith.constant 0 : index
    %47 = vector.load %arg3[%c0_53, %c0_54] : memref<1x128xf32, #tpu.memory_space<vmem>>, vector<1x128xf32>
    %48 = vector.broadcast %47 : vector<1x128xf32> to vector<256x128xf32>
    %49 = arith.addf %46, %48 : vector<256x128xf32>
    %cst_55 = arith.constant 0.000000e+00 : f32
    %50 = vector.broadcast %cst_55 : f32 to vector<256x128xf32>
    %51 = arith.maximumf %49, %50 : vector<256x128xf32>
    %52 = vector.shape_cast %51 : vector<256x128xf32> to vector<16x16x128xf32>
    %c1_56 = arith.constant 1 : index
    %c1_57 = arith.constant 1 : index
    %c0_58 = arith.constant 0 : index
    %53 = vector.load %arg8[%c1_56, %c1_57, %c0_58] : memref<18x18x128xf32, #tpu.memory_space<vmem>>, vector<16x16x128xf32>
    tpu.vector_store %arg8[%c1_56, %c1_57, %c0_58], %52 {strides = array<i32>} : memref<18x18x128xf32, #tpu.memory_space<vmem>>, vector<16x16x128xf32>,
    %c0_59 = arith.constant 0 : index
    %c0_60 = arith.constant 0 : index
    %c0_61 = arith.constant 0 : index
    %54 = vector.load %arg8[%c0_59, %c0_60, %c0_61] : memref<18x18x128xf32, #tpu.memory_space<vmem>>, vector<16x16x128xf32>
    %55 = vector.shape_cast %54 : vector<16x16x128xf32> to vector<256x128xf32>
    %56 = arith.truncf %55 : vector<256x128xf32> to vector<256x128xbf16>
    %c0_62 = arith.constant 0 : index
    %c0_63 = arith.constant 0 : index
    %57 = vector.load %arg10[%c0_62, %c0_63] : memref<256x1152xbf16, #tpu.memory_space<vmem>>, vector<256x128xbf16>
    tpu.vector_store %arg10[%c0_62, %c0_63], %56 {strides = array<i32>} : memref<256x1152xbf16, #tpu.memory_space<vmem>>, vector<256x128xbf16>,
    %c0_64 = arith.constant 0 : index
    %c1_65 = arith.constant 1 : index
    %c0_66 = arith.constant 0 : index
    %58 = vector.load %arg8[%c0_64, %c1_65, %c0_66] : memref<18x18x128xf32, #tpu.memory_space<vmem>>, vector<16x16x128xf32>
    %59 = vector.shape_cast %58 : vector<16x16x128xf32> to vector<256x128xf32>
    %60 = arith.truncf %59 : vector<256x128xf32> to vector<256x128xbf16>
    %c0_67 = arith.constant 0 : index
    %c128_68 = arith.constant 128 : index
    %61 = vector.load %arg10[%c0_67, %c128_68] : memref<256x1152xbf16, #tpu.memory_space<vmem>>, vector<256x128xbf16>
    tpu.vector_store %arg10[%c0_67, %c128_68], %60 {strides = array<i32>} : memref<256x1152xbf16, #tpu.memory_space<vmem>>, vector<256x128xbf16>,
    %c0_69 = arith.constant 0 : index
    %c2_70 = arith.constant 2 : index
    %c0_71 = arith.constant 0 : index
    %62 = vector.load %arg8[%c0_69, %c2_70, %c0_71] : memref<18x18x128xf32, #tpu.memory_space<vmem>>, vector<16x16x128xf32>
    %63 = vector.shape_cast %62 : vector<16x16x128xf32> to vector<256x128xf32>
    %64 = arith.truncf %63 : vector<256x128xf32> to vector<256x128xbf16>
    %c0_72 = arith.constant 0 : index
    %c256_73 = arith.constant 256 : index
    %65 = vector.load %arg10[%c0_72, %c256_73] : memref<256x1152xbf16, #tpu.memory_space<vmem>>, vector<256x128xbf16>
    tpu.vector_store %arg10[%c0_72, %c256_73], %64 {strides = array<i32>} : memref<256x1152xbf16, #tpu.memory_space<vmem>>, vector<256x128xbf16>,
    %c1_74 = arith.constant 1 : index
    %c0_75 = arith.constant 0 : index
    %c0_76 = arith.constant 0 : index
    %66 = vector.load %arg8[%c1_74, %c0_75, %c0_76] : memref<18x18x128xf32, #tpu.memory_space<vmem>>, vector<16x16x128xf32>
    %67 = vector.shape_cast %66 : vector<16x16x128xf32> to vector<256x128xf32>
    %68 = arith.truncf %67 : vector<256x128xf32> to vector<256x128xbf16>
    %c0_77 = arith.constant 0 : index
    %c384_78 = arith.constant 384 : index
    %69 = vector.load %arg10[%c0_77, %c384_78] : memref<256x1152xbf16, #tpu.memory_space<vmem>>, vector<256x128xbf16>
    tpu.vector_store %arg10[%c0_77, %c384_78], %68 {strides = array<i32>} : memref<256x1152xbf16, #tpu.memory_space<vmem>>, vector<256x128xbf16>,
    %c1_79 = arith.constant 1 : index
    %c1_80 = arith.constant 1 : index
    %c0_81 = arith.constant 0 : index
    %70 = vector.load %arg8[%c1_79, %c1_80, %c0_81] : memref<18x18x128xf32, #tpu.memory_space<vmem>>, vector<16x16x128xf32>
    %71 = vector.shape_cast %70 : vector<16x16x128xf32> to vector<256x128xf32>
    %72 = arith.truncf %71 : vector<256x128xf32> to vector<256x128xbf16>
    %c0_82 = arith.constant 0 : index
    %c512_83 = arith.constant 512 : index
    %73 = vector.load %arg10[%c0_82, %c512_83] : memref<256x1152xbf16, #tpu.memory_space<vmem>>, vector<256x128xbf16>
    tpu.vector_store %arg10[%c0_82, %c512_83], %72 {strides = array<i32>} : memref<256x1152xbf16, #tpu.memory_space<vmem>>, vector<256x128xbf16>,
    %c1_84 = arith.constant 1 : index
    %c2_85 = arith.constant 2 : index
    %c0_86 = arith.constant 0 : index
    %74 = vector.load %arg8[%c1_84, %c2_85, %c0_86] : memref<18x18x128xf32, #tpu.memory_space<vmem>>, vector<16x16x128xf32>
    %75 = vector.shape_cast %74 : vector<16x16x128xf32> to vector<256x128xf32>
    %76 = arith.truncf %75 : vector<256x128xf32> to vector<256x128xbf16>
    %c0_87 = arith.constant 0 : index
    %c640_88 = arith.constant 640 : index
    %77 = vector.load %arg10[%c0_87, %c640_88] : memref<256x1152xbf16, #tpu.memory_space<vmem>>, vector<256x128xbf16>
    tpu.vector_store %arg10[%c0_87, %c640_88], %76 {strides = array<i32>} : memref<256x1152xbf16, #tpu.memory_space<vmem>>, vector<256x128xbf16>,
    %c2_89 = arith.constant 2 : index
    %c0_90 = arith.constant 0 : index
    %c0_91 = arith.constant 0 : index
    %78 = vector.load %arg8[%c2_89, %c0_90, %c0_91] : memref<18x18x128xf32, #tpu.memory_space<vmem>>, vector<16x16x128xf32>
    %79 = vector.shape_cast %78 : vector<16x16x128xf32> to vector<256x128xf32>
    %80 = arith.truncf %79 : vector<256x128xf32> to vector<256x128xbf16>
    %c0_92 = arith.constant 0 : index
    %c768_93 = arith.constant 768 : index
    %81 = vector.load %arg10[%c0_92, %c768_93] : memref<256x1152xbf16, #tpu.memory_space<vmem>>, vector<256x128xbf16>
    tpu.vector_store %arg10[%c0_92, %c768_93], %80 {strides = array<i32>} : memref<256x1152xbf16, #tpu.memory_space<vmem>>, vector<256x128xbf16>,
    %c2_94 = arith.constant 2 : index
    %c1_95 = arith.constant 1 : index
    %c0_96 = arith.constant 0 : index
    %82 = vector.load %arg8[%c2_94, %c1_95, %c0_96] : memref<18x18x128xf32, #tpu.memory_space<vmem>>, vector<16x16x128xf32>
    %83 = vector.shape_cast %82 : vector<16x16x128xf32> to vector<256x128xf32>
    %84 = arith.truncf %83 : vector<256x128xf32> to vector<256x128xbf16>
    %c0_97 = arith.constant 0 : index
    %c896_98 = arith.constant 896 : index
    %85 = vector.load %arg10[%c0_97, %c896_98] : memref<256x1152xbf16, #tpu.memory_space<vmem>>, vector<256x128xbf16>
    tpu.vector_store %arg10[%c0_97, %c896_98], %84 {strides = array<i32>} : memref<256x1152xbf16, #tpu.memory_space<vmem>>, vector<256x128xbf16>,
    %c2_99 = arith.constant 2 : index
    %c2_100 = arith.constant 2 : index
    %c0_101 = arith.constant 0 : index
    %86 = vector.load %arg8[%c2_99, %c2_100, %c0_101] : memref<18x18x128xf32, #tpu.memory_space<vmem>>, vector<16x16x128xf32>
    %87 = vector.shape_cast %86 : vector<16x16x128xf32> to vector<256x128xf32>
    %88 = arith.truncf %87 : vector<256x128xf32> to vector<256x128xbf16>
    %c0_102 = arith.constant 0 : index
    %c1024_103 = arith.constant 1024 : index
    %89 = vector.load %arg10[%c0_102, %c1024_103] : memref<256x1152xbf16, #tpu.memory_space<vmem>>, vector<256x128xbf16>
    tpu.vector_store %arg10[%c0_102, %c1024_103], %88 {strides = array<i32>} : memref<256x1152xbf16, #tpu.memory_space<vmem>>, vector<256x128xbf16>,
    %c0_104 = arith.constant 0 : index
    %c0_105 = arith.constant 0 : index
    %90 = vector.load %arg10[%c0_104, %c0_105] : memref<256x1152xbf16, #tpu.memory_space<vmem>>, vector<256x1152xbf16>
    %c0_106 = arith.constant 0 : index
    %c0_107 = arith.constant 0 : index
    %91 = vector.load %arg4[%c0_106, %c0_107] : memref<1152x128xbf16, #tpu.memory_space<vmem>>, vector<1152x128xbf16>
    %cst_108 = arith.constant dense<0.000000e+00> : vector<256x128xf32>
    %92 = tpu.matmul %90, %91, %cst_108 {dimension_numbers = #tpu.dot_dimension_numbers<[1], [0], [0], [1], [0, 0, 1, 1], [], []>} : vector<256x1152xbf16>, vector<1152x128xbf16>, vector<256x128xf32> -> vector<256x128xf32>
    %c0_109 = arith.constant 0 : index
    %c0_110 = arith.constant 0 : index
    %93 = vector.load %arg5[%c0_109, %c0_110] : memref<1x128xf32, #tpu.memory_space<vmem>>, vector<1x128xf32>
    %94 = vector.broadcast %93 : vector<1x128xf32> to vector<256x128xf32>
    %95 = arith.addf %92, %94 : vector<256x128xf32>
    %cst_111 = arith.constant 0.000000e+00 : f32
    %96 = vector.broadcast %cst_111 : f32 to vector<256x128xf32>
    %97 = arith.maximumf %95, %96 : vector<256x128xf32>
    %98 = vector.shape_cast %97 : vector<256x128xf32> to vector<16x16x128xf32>
    %c0_112 = arith.constant 0 : index
    %c0_113 = arith.constant 0 : index
    %c0_114 = arith.constant 0 : index
    %c0_115 = arith.constant 0 : index
    %99 = vector.load %arg6[%c0_112, %c0_113, %c0_114, %c0_115] : memref<1x16x16x128xf32, #tpu.memory_space<vmem>>, vector<1x16x16x128xf32>
    %100 = vector.shape_cast %99 : vector<1x16x16x128xf32> to vector<16x16x128xf32>
    %101 = vector.shape_cast %98 : vector<16x16x128xf32> to vector<1x16x16x128xf32>
    tpu.vector_store %arg6[%c0_112, %c0_113, %c0_114, %c0_115], %101 {strides = array<i32>} : memref<1x16x16x128xf32, #tpu.memory_space<vmem>>, vector<1x16x16x128xf32>,
    return
  }
  func.func @transform_0(%arg0: i32) -> (i32, i32, i32, i32) {
    %c0_i32 = arith.constant 0 : i32
    %c0_i32_0 = arith.constant 0 : i32
    %c0_i32_1 = arith.constant 0 : i32
    %c0_i32_2 = arith.constant 0 : i32
    return %arg0, %c0_i32, %c0_i32_0, %c0_i32_1 : i32, i32, i32, i32
  }
  func.func @transform_1(%arg0: i32) -> (i32, i32) {
    %c0_i32 = arith.constant 0 : i32
    %c0_i32_0 = arith.constant 0 : i32
    %c0_i32_1 = arith.constant 0 : i32
    return %c0_i32, %c0_i32_0 : i32, i32
  }
  func.func @transform_2(%arg0: i32) -> (i32, i32) {
    %c0_i32 = arith.constant 0 : i32
    %c0_i32_0 = arith.constant 0 : i32
    %c0_i32_1 = arith.constant 0 : i32
    return %c0_i32, %c0_i32_0 : i32, i32
  }
  func.func @transform_3(%arg0: i32) -> (i32, i32) {
    %c0_i32 = arith.constant 0 : i32
    %c0_i32_0 = arith.constant 0 : i32
    %c0_i32_1 = arith.constant 0 : i32
    return %c0_i32, %c0_i32_0 : i32, i32
  }
  func.func @transform_4(%arg0: i32) -> (i32, i32) {
    %c0_i32 = arith.constant 0 : i32
    %c0_i32_0 = arith.constant 0 : i32
    %c0_i32_1 = arith.constant 0 : i32
    return %c0_i32, %c0_i32_0 : i32, i32
  }
  func.func @transform_5(%arg0: i32) -> (i32, i32, i32, i32) {
    %c0_i32 = arith.constant 0 : i32
    %c0_i32_0 = arith.constant 0 : i32
    %c0_i32_1 = arith.constant 0 : i32
    %c0_i32_2 = arith.constant 0 : i32
    return %arg0, %c0_i32, %c0_i32_0, %c0_i32_1 : i32, i32, i32, i32
  }
}

</mosaic_0001>

<bundles_post_ra>
// kernel: tpu_custom_call.1
= control target key start
LH: loop header
LB: loop body
LE: loop exit
PB: predicated region body
PF: predicated region fallthrough
CT: control target
= control target key end

     0   :  { %10 = vsyncpa [#allocation7], 0  ;;  %s7929_s0 = inlined_call_operand.hbm [shape: bf16[2,16,16,128], index: 0, kind: input, shape index: {}]   ;;  %s7930_s1 = inlined_call_operand.hbm [shape: bf16[1152,128], index: 1, kind: input, shape index: {}]   ;;  %s7931_s2 = inlined_call_operand.vmem [shape: f32[1,128], index: 2, kind: input, shape index: {}]   ;;  %s7932_s3 = inlined_call_operand.hbm [shape: bf16[1152,128], index: 3, kind: input, shape index: {}]   ;;  %s7933_s4 = inlined_call_operand.vmem [shape: f32[1,128], index: 4, kind: input, shape index: {}]   ;;  %s7934_s5 = inlined_call_operand.hbm [shape: f32[2,16,16,128], index: 5, kind: output, shape index: {}]  }
   0x1   :  { %12 = vsyncpa [#allocation7 + $0x1], 0 }
   0x2   :  { %13 = vsyncpa [#allocation10], 0 }
   0x3   :  { %14 = vsyncpa [#allocation8], 0 }
   0x4   :  { %16 = vsyncpa [#allocation8 + $0x1], 0  ;;  %s6649_s18 = smov 0   ;;  %s6651_s19 = smov 0  }
   0x5   :  { %s6653_s20 = smov 0   ;;  %s6655_s21 = smov 0  }
   0x6 LB: > { %s6670_s22 = sadd.s32 4294967295, %s6607_s21   ;;  %s4931_s23 = sadd.s32 4294967294, %s6607_s21   ;;  %s6607_s21 = sphi %s6655_s21, %s7954_s21   ;;  %s6603_s20 = sphi %s6653_s20, %s7953_s20   ;;  %s6599_s19 = sphi %s6651_s19, %s7952_s19   ;;  %s6595_s18 = sphi %s6649_s18, %s7951_s18  }
   0x7   : > { %p42_p0 = scmp.ne.s32.totalorder %s6599_s19, %s6595_s18  ;;  %p7935_p1 = scmp.eq.s32.totalorder %s6670_s22, 0 }
   0x8   : > { %p156_p3 = scmp.eq.s32.totalorder %s4931_s23, 1  ;;  %p4932_p5 = scmp.ge.s32.totalorder %s6607_s21, 1 }
   0x9   : > { %p6679_p4 = por %p7935_p1, %p42_p0  ;;  %p163_p7 = scmp.lt.s32.totalorder %s6607_s21, 3 }
   0xa   : > { %p6684_p6 = por %p156_p3, %p42_p0  ;;  %s6609_s27 = smov [#allocation9]  }
   0xb   : > { %s7938_s24 = scalar_select %p6679_p4, 1, 0 }
   0xc   : > { %s7939_s25 = scalar_select %p6684_p6, 1, 0 }
   0xd   : > { %p6689_p8 = pnand %p4932_p5, %p163_p7  ;;  %s175_s28 = sshll.u32 %s6609_s27, 4  ;;  %s6693_s28 = int_to_ptr.vmem [resolvable:$true] %s175_s28 }
   0xe   : > { %s6610_s30 = smov [#allocation11]   ;;  %s6451_s9 = scalar_lea.hbm %s7930_s1, 9216 }
   0xf   : > { %p6228_p9 = pneg %p6689_p8  ;;  %s191_s6 = sshll.u32 %s6610_s30, 4  ;;  %s6704_s6 = int_to_ptr.vmem [resolvable:$true] %s191_s6 }
  0x10   : > { %p6452_p12 = scmp.ne.s32.totalorder %s7930_s1, %s6451_s9  ;;  %p6458_p5 = scmp.lt.u32.totalorder %s6451_s9, %s7930_s1 }
  0x11   : > { %p6700_p11 = pnand %p6228_p9, %p7935_p1 }
  0x13   : > { %p6453_p13 = pneg %p6700_p11 }
  0x15   : > { %p6454_p0 = pnand %p6453_p13, %p6452_p12 }
  0x17   : > { %p6455_p3 = pneg %p6454_p0 }
  0x19   : > { %p6460_p7 = pnand %p6458_p5, %p6455_p3 }
  0x1b   : > { %6463 = shalt.err (!%p6460_p7)
}
  0x1c   : > { %s6464_s14 = scalar_lea.vmem %s6693_s28, 9216  ;;  %p6472_p2 = scmp.lt.s32.totalorder %s6693_s28, %s6693_s28 }
  0x1d   : > { %p6465_p9 = scmp.ne.s32.totalorder %s6693_s28, %s6464_s14  ;;  %p6473_p12 = scmp.lt.s32.totalorder %s6464_s14, %s6464_s14 }
  0x1f   : > { %p6467_p10 = pnand %p6465_p9, %p6453_p13  ;;  %p6474_p0 = por %p6473_p12, %p6472_p2 }
  0x21   : > { %p6468_p1 = pneg %p6467_p10 }
  0x23   : > { %p6475_p6 = pnand %p6474_p0, %p6468_p1 }
  0x25   : > { %6478 = shalt.err (!%p6475_p6)
}
  0x26   : > { %s6611_s15 = smov 64   ;;  %s6612_s16 = smov 4  }
  0x27   : > { %6231 = dma.hbm_to_vmem [thread:$0]  (!%p6700_p11), %s7930_s1, 9216, %s6693_s28, [#allocation10], %s6611_s15, %s6611_s15, %s6612_s16  }
  0x28   : > { %s6479_s7 = scalar_lea.hbm %s7932_s3, 9216 }
  0x29   : > { %p6480_p1 = scmp.ne.s32.totalorder %s7932_s3, %s6479_s7  ;;  %p6486_p10 = scmp.lt.u32.totalorder %s6479_s7, %s7932_s3 }
  0x2b   : > { %p6482_p2 = pnand %p6480_p1, %p6453_p13 }
  0x2d   : > { %p6483_p6 = pneg %p6482_p2 }
  0x2f   : > { %p6488_p3 = pnand %p6486_p10, %p6483_p6 }
  0x31   : > { %6491 = shalt.err (!%p6488_p3)
}
  0x32   : > { %s6492_s28 = scalar_lea.vmem %s6704_s6, 9216  ;;  %p6500_p12 = scmp.lt.s32.totalorder %s6704_s6, %s6704_s6 }
  0x33   : > { %p6493_p5 = scmp.ne.s32.totalorder %s6704_s6, %s6492_s28  ;;  %p6501_p0 = scmp.lt.s32.totalorder %s6492_s28, %s6492_s28 }
  0x35   : > { %p6495_p7 = pnand %p6493_p5, %p6453_p13  ;;  %p6502_p1 = por %p6501_p0, %p6500_p12 }
  0x37   : > { %p6496_p9 = pneg %p6495_p7 }
  0x39   : > { %p6503_p2 = pnand %p6502_p1, %p6496_p9 }
  0x3b   : > { %6506 = shalt.err (!%p6503_p2)
}
  0x3c   : > { %6234 = dma.hbm_to_vmem [thread:$0]  (!%p6700_p11), %s7932_s3, 9216, %s6704_s6, [#allocation10], %s6611_s15, %s6611_s15, %s6612_s16  }
  0x3d   : > { %s6765_s29 = sadd.s32 1, %s6607_s21   ;;  %s29_s14 = sadd.s32 1, %s6603_s20 }
  0x3e   : > { %s26_s17 = ssub.s32 %s6607_s21, %s6765_s29  ;;  %p36_p13 = scmp.ne.s32.totalorder %s6603_s20, %s6599_s19 }
  0x3f   : > { %p27_p6 = scmp.eq.s32.totalorder %s26_s17, 0  ;;  %p37_p10 = scmp.eq.s32.totalorder %s6607_s21, 0 }
  0x40   : > { %p7942_p3 = scmp.eq.s32.totalorder %s6670_s22, 1  ;;  %p6245_p7 = scmp.lt.s32.totalorder %s6607_s21, 2 }
  0x41   : > { %s6781_s27 = scalar_select %p27_p6, %s6603_s20, %s29_s14  }
  0x42   : > { %p6775_p5 = por %p7942_p3, %p36_p13  ;;  %p38_p9 = por %p37_p10, %p36_p13 }
  0x43   : > { %s208_s30 = sand.u32 1, %s6603_s20   ;;  %s5095_s6 = sshll.u32 %s6607_s21, 11 }
  0x44   : > { %s7943_s23 = scalar_select %p6775_p5, 1, 0 }
  0x45   : > { %s4936_s7 = sshll.u32 %s208_s30, 7  ;;  %s6788_s10 = scalar_lea.hbm %s7929_s0, %s5095_s6 }
  0x46   : > { %s212_s11 = scalar_lea.vmem [#allocation6], %s4936_s7  ;;  %p6792_p11 = pnand %p6245_p7, %p38_p9 }
  0x47   : > { %s219_s28 = sshll.u32 %s212_s11, 4  ;;  %s6796_s13 = scalar_lea.sflag [#allocation7], %s208_s30  ;;  %s6790_s28 = int_to_ptr.vmem [resolvable:$true] %s219_s28 }
  0x48   : > { %s6507_s14 = scalar_lea.hbm %s6788_s10, 2048  ;;  %p6509_p0 = pneg %p6792_p11 }
  0x49   : > { %p6508_p12 = scmp.ne.s32.totalorder %s6788_s10, %s6507_s14  ;;  %s6512_s6 = scalar_lea.hbm %s7929_s0, 4096 }
  0x4a   : > { %p6513_p13 = scmp.lt.u32.totalorder %s6788_s10, %s7929_s0  ;;  %p6514_p6 = scmp.lt.u32.totalorder %s6512_s6, %s6507_s14 }
  0x4b   : > { %p6510_p1 = pnand %p6509_p0, %p6508_p12  ;;  %p6516_p3 = scmp.lt.u32.totalorder %s6507_s14, %s6788_s10 }
  0x4c   : > { %p6515_p10 = por %p6514_p6, %p6513_p13 }
  0x4d   : > { %p6511_p2 = pneg %p6510_p1 }
  0x4e   : > { %p6517_p7 = por %p6516_p3, %p6515_p10 }
  0x50   : > { %p6518_p9 = pnand %p6517_p7, %p6511_p2 }
  0x52   : > { %6521 = shalt.err (!%p6518_p9)
}
  0x53   : > { %s6522_s30 = scalar_lea.vmem %s6790_s28, 2048  ;;  %s6613_s11 = smov [#allocation6]  }
  0x54   : > { %p6523_p12 = scmp.ne.s32.totalorder %s6790_s28, %s6522_s30  ;;  %s6527_s17 = sshll.u32 %s6613_s11, 4  ;;  %s6528_s17 = int_to_ptr.vmem [resolvable:$false] %s6527_s17 }
  0x55   : > { %s6529_s7 = scalar_lea.vmem %s6528_s17, 4096  ;;  %p6530_p4 = scmp.lt.s32.totalorder %s6790_s28, %s6528_s17 }
  0x56   : > { %p6525_p1 = pnand %p6523_p12, %p6509_p0  ;;  %p6531_p13 = scmp.lt.s32.totalorder %s6529_s7, %s6522_s30 }
  0x58   : > { %p6526_p5 = pneg %p6525_p1  ;;  %p6532_p6 = por %p6531_p13, %p6530_p4 }
  0x5a   : > { %p6533_p10 = pnand %p6532_p6, %p6526_p5 }
  0x5c   : > { %6536 = shalt.err (!%p6533_p10)
}
  0x5d   : > { %6238 = dma.hbm_to_vmem [thread:$0]  (!%p6792_p11), %s6788_s10, 2048, %s6790_s28, %s6796_s13, %s6611_s15, %s6611_s15, %s6612_s16  }
  0x5e   : > { %231 = sbr.rel (%p6689_p8) target bundleno = 1186 (0x4a2), region = 40  ;;  %s6830_s14 = sand.u32 (!%p6689_p8), 1, %s6599_s19  }
  0x5f   : > { %s4940_s6 = sshll.u32 (!%p6689_p8), %s6830_s14, 7  ;;  %s234_s8 = scalar_lea.sflag (!%p6689_p8), [#allocation7], %s6830_s14 }
  0x60   : > { %s6834_s9 = scalar_lea.vmem (!%p6689_p8), [#allocation6], %s4940_s6  ;;  %p7945_p4 = scmp.ne.s32.totalorder (!%p6689_p8), %s7938_s24, 0 }
  0x65   : > { %6582 = dma.done.wait (%p7945_p4), %s234_s8, 2048  }
  0x66   : > { %6584 = vsyncadd (%p7945_p4), %s234_s8, 4294965248  ;;  %p7946_p5 = scmp.eq.s32.totalorder %s6670_s22, 0 }
  0x68   : > { %6586 = dma.done.wait (%p7946_p5), [#allocation10], 18432   ;;  %p7947_p8 = pmov %p7946_p5 }
  0x69   : > { %v6614_v0 = vmov 0.0   ;;  %v6288_v1 = vld [vmem:[#allocation9 + $0x40] sm:$0xff]   ;;  %v6292_v5 = vld [vmem:[#allocation9 + $0x48] sm:$0xff]   ;;  %v6296_v9 = vld [vmem:[#allocation9 + $0x50] sm:$0xff]   ;;  %v6615_v41 = vmov 0.0|0.0   ;;  %s4943_s10 = sshll.u32 %s6830_s14, 8 }
  0x6a   : > { %6588 = vsyncadd (%p7947_p8), [#allocation10], 4294948864  ;;  %273 = vst [vmem:[#allocation2] sm:$0xff] %v6614_v0  ;;  %v6289_v2 = vld [vmem:[#allocation9] sm:$0xff]   ;;  %5176 = vmatprep.subr.bf16.mxu0 %v6288_v1  ;;  %v6293_v6 = vld [vmem:[#allocation9 + $0x8] sm:$0xff]   ;;  %s7812_s28 = scalar_lea.vmem [#allocation12], %s4943_s10 }
  0x6b   : > { %274 = vst [vmem:[#allocation2 + $0x8] sm:$0xff] %v6614_v0  ;;  %275 = vst [vmem:[#allocation2 + $0x10] sm:$0x3] %v6614_v0  ;;  %v6290_v3 = vld [vmem:[#allocation9 + $0xc0] sm:$0xff]   ;;  %5177 = vmatpush3.bf16.msra.mxu0 %v6289_v2  ;;  %v6294_v7 = vld [vmem:[#allocation9 + $0xc8] sm:$0xff]   ;;  %s5096_s12 = sshll.u32 %s6670_s22, 12 }
  0x6c   : > { %276 = vst [vmem:[#allocation2 + $0x18] sm:$0xff] %v6614_v0  ;;  %277 = vst [vmem:[#allocation2 + $0x20] sm:$0xff] %v6614_v0  ;;  %v6291_v4 = vld [vmem:[#allocation9 + $0x80] sm:$0xff]   ;;  %5288 = vmatprep.subr.bf16.mxu1 %v6290_v3  ;;  %5178 = vmatprep.subr.bf16.mxu0 %v6292_v5  ;;  %v6295_v8 = vld [vmem:[#allocation9 + $0x88] sm:$0xff]   ;;  %s4839_s13 = sshll.u32 %s7812_s28, 4  ;;  %s7880_s17 = scalar_lea.hbm %s7934_s5, %s5096_s12  ;;  %s7882_s13 = int_to_ptr.vmem [resolvable:$true] %s4839_s13 }
  0x6d   : > { %278 = vst [vmem:[#allocation2 + $0x28] sm:$0x3] %v6614_v0  ;;  %279 = vst [vmem:[#allocation2 + $0x30] sm:$0xff] %v6614_v0  ;;  %5289 = vmatpush3.bf16.msra.mxu1 %v6291_v4  ;;  %v6297_v10 = vld [vmem:[#allocation9 + $0x10] sm:$0xff]   ;;  %v6300_v13 = vld [vmem:[#allocation9 + $0x58] sm:$0xff]   ;;  %s4826_s22 = scalar_lea.sflag [#allocation8], %s6830_s14 }
  0x6e   : > { %280 = vst [vmem:[#allocation2 + $0x38] sm:$0xff] %v6614_v0  ;;  %281 = vst [vmem:[#allocation2 + $0x40] sm:$0x3] %v6614_v0  ;;  %5290 = vmatprep.subr.bf16.mxu1 %v6294_v7  ;;  %v6298_v11 = vld [vmem:[#allocation9 + $0xd0] sm:$0xff]   ;;  %v6301_v14 = vld [vmem:[#allocation9 + $0x18] sm:$0xff]   ;;  %s6537_s7 = scalar_lea.vmem %s7882_s13, 4096 }
  0x6f   : > { %282 = vst [vmem:[#allocation2 + $0x48] sm:$0xff] %v6614_v0  ;;  %283 = vst [vmem:[#allocation2 + $0x50] sm:$0xff] %v6614_v0  ;;  %5179 = vmatpush3.bf16.msra.mxu0 %v6293_v6  ;;  %v6299_v12 = vld [vmem:[#allocation9 + $0x90] sm:$0xff]   ;;  %v6302_v15 = vld [vmem:[#allocation9 + $0xd8] sm:$0xff]   ;;  %p6538_p11 = scmp.ne.s32.totalorder %s7882_s13, %s6537_s7  ;;  %p7948_p0 = scmp.ne.s32.totalorder %s7943_s23, 0 }
  0x70   : > { %284 = vst [vmem:[#allocation2 + $0x58] sm:$0x3] %v6614_v0  ;;  %285 = vst [vmem:[#allocation2 + $0x60] sm:$0xff] %v6614_v0  ;;  %5180 = vmatprep.subr.bf16.mxu0 %v6296_v9  ;;  %v6303_v16 = vld [vmem:[#allocation9 + $0x98] sm:$0xff]   ;;  %v6304_v17 = vld [vmem:[#allocation9 + $0x60] sm:$0xff]   ;;  %s6616_s6 = smov [#allocation12]  }
  0x71   : > { %286 = vst [vmem:[#allocation2 + $0x68] sm:$0xff] %v6614_v0  ;;  %287 = vst [vmem:[#allocation2 + $0x70] sm:$0x3] %v6614_v0  ;;  %5291 = vmatpush3.bf16.msra.mxu1 %v6295_v8  ;;  %v6305_v18 = vld [vmem:[#allocation9 + $0x20] sm:$0xff]   ;;  %v6308_v21 = vld [vmem:[#allocation9 + $0x68] sm:$0xff]   ;;  %p6539_p2 = pnand %p6538_p11, %p7948_p0  ;;  %s6541_s8 = sshll.u32 %s6616_s6, 4  ;;  %s6542_s8 = int_to_ptr.vmem [resolvable:$false] %s6541_s8 }
  0x72   : > { %288 = vst [vmem:[#allocation2 + $0x78] sm:$0xff] %v6614_v0  ;;  %289 = vst [vmem:[#allocation2 + $0x80] sm:$0xff] %v6614_v0  ;;  %5292 = vmatprep.subr.bf16.mxu1 %v6298_v11  ;;  %v6306_v19 = vld [vmem:[#allocation9 + $0xe0] sm:$0xff]   ;;  %v6309_v22 = vld [vmem:[#allocation9 + $0x28] sm:$0xff]   ;;  %p6544_p7 = scmp.lt.s32.totalorder %s7882_s13, %s6542_s8 }
  0x73   : > { %290 = vst [vmem:[#allocation2 + $0x88] sm:$0x3] %v6614_v0  ;;  %291 = vst [vmem:[#allocation2 + $0x90] sm:$0xff] %v6614_v0  ;;  %5181 = vmatpush3.bf16.msra.mxu0 %v6297_v10  ;;  %v6307_v20 = vld [vmem:[#allocation9 + $0xa0] sm:$0xff]   ;;  %v6310_v23 = vld [vmem:[#allocation9 + $0xe8] sm:$0xff]   ;;  %p6540_p3 = pneg %p6539_p2 }
  0x74   : > { %292 = vst [vmem:[#allocation2 + $0x98] sm:$0xff] %v6614_v0  ;;  %293 = vst [vmem:[#allocation2 + $0xa0] sm:$0x3] %v6614_v0  ;;  %5182 = vmatprep.subr.bf16.mxu0 %v6300_v13  ;;  %v6311_v24 = vld [vmem:[#allocation9 + $0xa8] sm:$0xff]   ;;  %v6312_v25 = vld [vmem:[#allocation9 + $0x70] sm:$0xff]  }
  0x75   : > { %294 = vst [vmem:[#allocation2 + $0xa8] sm:$0xff] %v6614_v0  ;;  %295 = vst [vmem:[#allocation2 + $0xb0] sm:$0xff] %v6614_v0  ;;  %5293 = vmatpush3.bf16.msra.mxu1 %v6299_v12  ;;  %v6313_v26 = vld [vmem:[#allocation9 + $0x30] sm:$0xff]   ;;  %v6316_v29 = vld [vmem:[#allocation9 + $0x78] sm:$0xff]  }
  0x76   : > { %296 = vst [vmem:[#allocation2 + $0xb8] sm:$0x3] %v6614_v0  ;;  %297 = vst [vmem:[#allocation2 + $0xc0] sm:$0xff] %v6614_v0  ;;  %5294 = vmatprep.subr.bf16.mxu1 %v6302_v15  ;;  %v6314_v27 = vld [vmem:[#allocation9 + $0xf0] sm:$0xff]   ;;  %v6317_v30 = vld [vmem:[#allocation9 + $0x38] sm:$0xff]  }
  0x77   : > { %298 = vst [vmem:[#allocation2 + $0xc8] sm:$0xff] %v6614_v0  ;;  %299 = vst [vmem:[#allocation2 + $0xd0] sm:$0x3] %v6614_v0  ;;  %5183 = vmatpush3.bf16.msra.mxu0 %v6301_v14  ;;  %v6315_v28 = vld [vmem:[#allocation9 + $0xb0] sm:$0xff]   ;;  %v6318_v31 = vld [vmem:[#allocation9 + $0xf8] sm:$0xff]  }
  0x78   : > { %300 = vst [vmem:[#allocation2 + $0xd8] sm:$0xff] %v6614_v0  ;;  %301 = vst [vmem:[#allocation2 + $0xe0] sm:$0xff] %v6614_v0  ;;  %5184 = vmatprep.subr.bf16.mxu0 %v6304_v17  ;;  %v542_v32 = vld [vmem:[#allocation2 + $0x1] sm:$0xff]  ;;  %v543_v33 = vld [vmem:[#allocation2 + $0x9] sm:$0xff] }
  0x79   : > { %302 = vst [vmem:[#allocation2 + $0xe8] sm:$0x3] %v6614_v0  ;;  %303 = vst [vmem:[#allocation2 + $0xf0] sm:$0xff] %v6614_v0  ;;  %5295 = vmatpush3.bf16.msra.mxu1 %v6303_v16  ;;  %v574_v34 = vpack.c.bf16 %v543_v33, %v542_v32  ;;  %v6319_v35 = vld [vmem:[#allocation9 + $0xb8] sm:$0xff]   ;;  %v6320_v36 = vld [vmem:[#allocation9 + $0x140] sm:$0xff]  }
  0x7a   : > { %304 = vst [vmem:[#allocation2 + $0xf8] sm:$0xff] %v6614_v0  ;;  %305 = vst [vmem:[#allocation2 + $0x100] sm:$0x3] %v6614_v0  ;;  %5296 = vmatprep.subr.bf16.mxu1 %v6306_v19  ;;  %v5098_v37 = vld [vmem:[%s6834_s9] sm:$0xff]   ;;  %v5161_v43 = vld [vmem:[%s6834_s9 + $0x8] sm:$0xff]  }
  0x7b   : > { %306 = vst [vmem:[#allocation2 + $0x108] sm:$0xff] %v6614_v0  ;;  %307 = vst [vmem:[#allocation2 + $0x110] sm:$0xff] %v6614_v0  ;;  %5185 = vmatpush3.bf16.msra.mxu0 %v6305_v18  ;;  %1814 = vmatprep.mubr.bf16.mxu0 %v574_v34  ;;  %v5099_v38 = vunpack.c.l.bf16 %v5098_v37  ;;  %v5100_v39 = vunpack.c.h.bf16 %v5098_v37  ;;  %v6321_v40 = vld [vmem:[#allocation9 + $0x100] sm:$0xff]   ;;  %v5103_v44 = vunpack.c.l.bf16 %v5161_v43  ;;  %v5104_v45 = vunpack.c.h.bf16 %v5161_v43  ;;  %v6324_v46 = vld [vmem:[#allocation9 + $0x148] sm:$0xff]  }
  0x7c   : > { %308 = vst [vmem:[#allocation2 + $0x118] sm:$0x3] %v6614_v0  ;;  %309 = vst [vmem:[#allocation2 + $0x120] sm:$0xff] %v6614_v0  ;;  %5186 = vmatprep.subr.bf16.mxu0 %v6308_v21  ;;  %v6322_v42 = vld [vmem:[%s6834_s9] sm:$0xff]  ;;  %v5162_v47 = vld [vmem:[%s6834_s9 + $0x10] sm:$0xff]  }
  0x7d   : > { %310 = vst [vmem:[#allocation2 + $0x128] sm:$0xff] %v6614_v0  ;;  %311 = vst [vmem:[#allocation2 + $0x130] sm:$0x3] %v6614_v0  ;;  %5297 = vmatpush3.bf16.msra.mxu1 %v6307_v20  ;;  %v5107_v48 = vunpack.c.l.bf16 %v5162_v47  ;;  %v5108_v49 = vunpack.c.h.bf16 %v5162_v47  ;;  %v6325_v50 = vld [vmem:[#allocation9 + $0x108] sm:$0xff]   ;;  %v5163_v53 = vld [vmem:[%s6834_s9 + $0x18] sm:$0xff]  }
  0x7e   : > { %312 = vst [vmem:[#allocation2 + $0x138] sm:$0xff] %v6614_v0  ;;  %313 = vst [vmem:[#allocation2 + $0x140] sm:$0xff] %v6614_v0  ;;  %5298 = vmatprep.subr.bf16.mxu1 %v6310_v23  ;;  %v606_v51 = vld [vmem:[#allocation2 + $0x2] sm:$0xff]  ;;  %v607_v52 = vld [vmem:[#allocation2 + $0xa] sm:$0xff]  ;;  %v5111_v54 = vunpack.c.l.bf16 %v5163_v53  ;;  %v5112_v55 = vunpack.c.h.bf16 %v5163_v53 }
  0x7f   : > { %314 = vst [vmem:[#allocation2 + $0x148] sm:$0x3] %v6614_v0  ;;  %315 = vst [vmem:[#allocation2 + $0x150] sm:$0xff] %v6614_v0  ;;  %5187 = vmatpush3.bf16.msra.mxu0 %v6309_v22  ;;  %v6328_v56 = vld [vmem:[#allocation9 + $0x150] sm:$0xff]   ;;  %v5164_v57 = vld [vmem:[%s6834_s9 + $0x20] sm:$0xff]  }
  0x80   : > { %316 = vst [vmem:[#allocation2 + $0x158] sm:$0xff] %v6614_v0  ;;  %317 = vst [vmem:[#allocation2 + $0x160] sm:$0x3] %v6614_v0  ;;  %5188 = vmatprep.subr.bf16.mxu0 %v6312_v25  ;;  %v5115_v58 = vunpack.c.l.bf16 %v5164_v57  ;;  %v5116_v59 = vunpack.c.h.bf16 %v5164_v57  ;;  %v6329_v60 = vld [vmem:[#allocation9 + $0x110] sm:$0xff]   ;;  %v5165_v61 = vld [vmem:[%s6834_s9 + $0x28] sm:$0xff]  }
  0x81   : > { %318 = vst [vmem:[#allocation2 + $0x168] sm:$0xff] %v6614_v0  ;;  %319 = vst [vmem:[#allocation2 + $0x170] sm:$0xff] %v6614_v0  ;;  %5299 = vmatpush3.bf16.msra.mxu1 %v6311_v24  ;;  %v6960_v1 = vld [vmem:[%s6834_s9 + $0x8] sm:$0xff]  ;;  %v5119_v2 = vunpack.c.l.bf16 %v5165_v61  ;;  %v5120_v3 = vunpack.c.h.bf16 %v5165_v61  ;;  %v6332_v5 = vld [vmem:[#allocation9 + $0x158] sm:$0xff]  }
  0x82   : > { %320 = vst [vmem:[#allocation2 + $0x178] sm:$0x3] %v6614_v0  ;;  %321 = vst [vmem:[#allocation2 + $0x180] sm:$0xff] %v6614_v0  ;;  %5300 = vmatprep.subr.bf16.mxu1 %v6314_v27  ;;  %v5166_v6 = vld [vmem:[%s6834_s9 + $0x30] sm:$0xff]   ;;  %v6333_v16 = vld [vmem:[#allocation9 + $0x118] sm:$0xff]  }
  0x83   : > { %322 = vst [vmem:[#allocation2 + $0x188] sm:$0xff] %v6614_v0  ;;  %323 = vst [vmem:[#allocation2 + $0x190] sm:$0x3] %v6614_v0  ;;  %5189 = vmatpush3.bf16.msra.mxu0 %v6313_v26  ;;  %v5123_v9 = vunpack.c.l.bf16 %v5166_v6  ;;  %v5124_v10 = vunpack.c.h.bf16 %v5166_v6  ;;  %v6970_v18 = vld [vmem:[%s6834_s9 + $0x10] sm:$0xff]  ;;  %v5167_v20 = vld [vmem:[%s6834_s9 + $0x38] sm:$0xff]  }
  0x84   : > { %324 = vst [vmem:[#allocation2 + $0x198] sm:$0xff] %v6614_v0  ;;  %325 = vst [vmem:[#allocation2 + $0x1a0] sm:$0xff] %v6614_v0  ;;  %5190 = vmatprep.subr.bf16.mxu0 %v6316_v29  ;;  %v5127_v24 = vunpack.c.l.bf16 %v5167_v20  ;;  %v5128_v25 = vunpack.c.h.bf16 %v5167_v20  ;;  %v6336_v27 = vld [vmem:[#allocation9 + $0x160] sm:$0xff]   ;;  %v5169_v32 = vld [vmem:[%s6834_s9 + $0x48] sm:$0xff]  }
  0x85   : > { %326 = vst [vmem:[#allocation2 + $0x1a8] sm:$0x3] %v6614_v0  ;;  %327 = vst [vmem:[#allocation3] sm:$0xff] %v6614_v0  ;;  %5301 = vmatpush3.bf16.msra.mxu1 %v6315_v28  ;;  %v5168_v28 = vld [vmem:[%s6834_s9 + $0x40] sm:$0xff]   ;;  %v6984_v34 = vld [vmem:[%s6834_s9 + $0x18] sm:$0xff] }
  0x86   : > { %328 = vst [vmem:[#allocation3 + $0x8] sm:$0xff] %v6614_v0  ;;  %329 = vst [vmem:[#allocation3 + $0x10] sm:$0x3] %v6614_v0  ;;  %5302 = vmatprep.subr.bf16.mxu1 %v6318_v31  ;;  %v5131_v29 = vunpack.c.l.bf16 %v5168_v28  ;;  %v6337_v31 = vld [vmem:[#allocation9 + $0x120] sm:$0xff]   ;;  %v5171_v43 = vld [vmem:[%s6834_s9 + $0x58] sm:$0xff]  }
  0x87   : > { %330 = vst [vmem:[#allocation3 + $0x18] sm:$0xff] %v6614_v0  ;;  %331 = vst [vmem:[#allocation3 + $0x20] sm:$0xff] %v6614_v0  ;;  %5191 = vmatpush3.bf16.msra.mxu0 %v6317_v30  ;;  %v5132_v30 = vunpack.c.h.bf16 %v5168_v28  ;;  %v5172_v47 = vld [vmem:[%s6834_s9 + $0x60] sm:$0xff]   ;;  %v5173_v6 = vld [vmem:[%s6834_s9 + $0x68] sm:$0xff]  }
  0x88   : > { %332 = vst [vmem:[#allocation3 + $0x28] sm:$0x3] %v6614_v0  ;;  %333 = vst [vmem:[#allocation3 + $0x30] sm:$0xff] %v6614_v0  ;;  %5400 = vmatprep.subr.bf16.mxu0 %v6320_v36  ;;  %v5136_v36 = vunpack.c.h.bf16 %v5169_v32  ;;  %v6353_v20 = vld [vmem:[#allocation9 + $0x1d8] sm:$0xff]  }
  0x89   : > { %334 = vst [vmem:[#allocation3 + $0x38] sm:$0xff] %v6614_v0  ;;  %335 = vst [vmem:[#allocation3 + $0x40] sm:$0x3] %v6614_v0  ;;  %5303 = vmatpush3.bf16.msra.mxu1 %v6319_v35  ;;  %v5135_v35 = vunpack.c.l.bf16 %v5169_v32  ;;  %v6357_v28 = vld [vmem:[#allocation9 + $0x138] sm:$0xff]  }
  0x8a   : > { %336 = vst [vmem:[#allocation3 + $0x48] sm:$0xff] %v6614_v0  ;;  %337 = vst [vmem:[#allocation3 + $0x50] sm:$0xff] %v6614_v0  ;;  %1815 = vmatmul.mubr.bf16.vlgmr.msra.gmra.mrb[0].mxu0 %v6615_v41 }
  0x8b   : > { %338 = vst [vmem:[#allocation3 + $0x58] sm:$0x3] %v6614_v0  ;;  %339 = vst [vmem:[#allocation3 + $0x60] sm:$0xff] %v6614_v0  ;;  %5401 = vmatpush3.bf16.msra.mxu0 %v6321_v40  ;;  %1822 = vmatprep.mubr.bf16.mxu0 %v6322_v42  ;;  %v6341_v42 = vld [vmem:[#allocation9 + $0x128] sm:$0xff]  }
  0x8c   : > { %340 = vst [vmem:[#allocation3 + $0x68] sm:$0xff] %v6614_v0  ;;  %341 = vst [vmem:[#allocation3 + $0x70] sm:$0x3] %v6614_v0  ;;  %5402 = vmatprep.subr.bf16.mxu0 %v6324_v46  ;;  %v6344_v46 = vld [vmem:[#allocation9 + $0x170] sm:$0xff]  }
  0x8d   : > { %342 = vst [vmem:[#allocation3 + $0x78] sm:$0xff] %v6614_v0  ;;  %343 = vst [vmem:[#allocation3 + $0x80] sm:$0xff] %v6614_v0 }
  0x8e   : > { %344 = vst [vmem:[#allocation3 + $0x88] sm:$0x3] %v6614_v0  ;;  %345 = vst [vmem:[#allocation3 + $0x90] sm:$0xff] %v6614_v0 }
  0x8f   : > { %346 = vst [vmem:[#allocation3 + $0x98] sm:$0xff] %v6614_v0  ;;  %347 = vst [vmem:[#allocation3 + $0xa0] sm:$0x3] %v6614_v0  ;;  %5403 = vmatpush3.bf16.msra.mxu0 %v6325_v50 }
  0x90   : > { %348 = vst [vmem:[#allocation3 + $0xa8] sm:$0xff] %v6614_v0  ;;  %349 = vst [vmem:[#allocation3 + $0xb0] sm:$0xff] %v6614_v0  ;;  %5404 = vmatprep.subr.bf16.mxu0 %v6328_v56  ;;  %v6998_v56 = vld [vmem:[%s6834_s9 + $0x20] sm:$0xff] }
  0x91   : > { %350 = vst [vmem:[#allocation3 + $0xb8] sm:$0x3] %v6614_v0  ;;  %351 = vst [vmem:[#allocation3 + $0xc0] sm:$0xff] %v6614_v0 }
  0x92   : > { %352 = vst [vmem:[#allocation3 + $0xc8] sm:$0xff] %v6614_v0  ;;  %353 = vst [vmem:[#allocation3 + $0xd0] sm:$0x3] %v6614_v0 }
  0x93   : > { %354 = vst [vmem:[#allocation3 + $0xd8] sm:$0xff] %v6614_v0  ;;  %355 = vst [vmem:[#allocation3 + $0xe0] sm:$0xff] %v6614_v0  ;;  %5405 = vmatpush3.bf16.msra.mxu0 %v6329_v60 }
  0x94   : > { %356 = vst [vmem:[#allocation3 + $0xe8] sm:$0x3] %v6614_v0  ;;  %357 = vst [vmem:[#allocation3 + $0xf0] sm:$0xff] %v6614_v0  ;;  %5406 = vmatprep.subr.bf16.mxu0 %v6332_v5  ;;  %v6350_v5 = vld [vmem:[#allocation9 + $0x188] sm:$0xff]  }
  0x95   : > { %358 = vst [vmem:[#allocation3 + $0xf8] sm:$0xff] %v6614_v0  ;;  %359 = vst [vmem:[#allocation3 + $0x100] sm:$0x3] %v6614_v0 }
  0x96   : > { %360 = vst [vmem:[#allocation3 + $0x108] sm:$0xff] %v6614_v0  ;;  %361 = vst [vmem:[#allocation3 + $0x110] sm:$0xff] %v6614_v0 }
  0x97   : > { %362 = vst [vmem:[#allocation3 + $0x118] sm:$0x3] %v6614_v0  ;;  %363 = vst [vmem:[#allocation3 + $0x120] sm:$0xff] %v6614_v0  ;;  %5407 = vmatpush3.bf16.msra.mxu0 %v6333_v16  ;;  %v7019_v16 = vld [vmem:[%s6834_s9 + $0x30] sm:$0xff] }
  0x98   : > { %364 = vst [vmem:[#allocation3 + $0x128] sm:$0xff] %v6614_v0  ;;  %365 = vst [vmem:[#allocation3 + $0x130] sm:$0x3] %v6614_v0  ;;  %5408 = vmatprep.subr.bf16.mxu0 %v6336_v27 }
  0x99   : > { %366 = vst [vmem:[#allocation3 + $0x138] sm:$0xff] %v6614_v0  ;;  %367 = vst [vmem:[#allocation3 + $0x140] sm:$0xff] %v6614_v0 }
  0x9a   : > { %368 = vst [vmem:[#allocation3 + $0x148] sm:$0x3] %v6614_v0  ;;  %369 = vst [vmem:[#allocation3 + $0x150] sm:$0xff] %v6614_v0 }
  0x9b   : > { %370 = vst [vmem:[#allocation3 + $0x158] sm:$0xff] %v6614_v0  ;;  %371 = vst [vmem:[#allocation3 + $0x160] sm:$0x3] %v6614_v0  ;;  %5409 = vmatpush3.bf16.msra.mxu0 %v6337_v31 }
  0x9c   : > { %372 = vst [vmem:[#allocation3 + $0x168] sm:$0xff] %v6614_v0  ;;  %373 = vst [vmem:[#allocation3 + $0x170] sm:$0xff] %v6614_v0 }
  0x9d   : > { %374 = vst [vmem:[#allocation3 + $0x178] sm:$0x3] %v6614_v0  ;;  %375 = vst [vmem:[#allocation3 + $0x180] sm:$0xff] %v6614_v0 }
  0x9e   : > { %376 = vst [vmem:[#allocation3 + $0x188] sm:$0xff] %v6614_v0  ;;  %377 = vst [vmem:[#allocation3 + $0x190] sm:$0x3] %v6614_v0 }
  0x9f   : > { %378 = vst [vmem:[#allocation3 + $0x198] sm:$0xff] %v6614_v0  ;;  %379 = vst [vmem:[#allocation3 + $0x1a0] sm:$0xff] %v6614_v0 }
  0xa0   : > { %380 = vst [vmem:[#allocation3 + $0x1a8] sm:$0x3] %v6614_v0  ;;  %446 = vst [vmem:[#allocation2 + $0x19] sm:$0xff] %v5099_v38  ;;  %v638_v0 = vpack.c.bf16 %v607_v52, %v606_v51  ;;  %v6340_v38 = vld [vmem:[#allocation9 + $0x168] sm:$0xff]   ;;  %v5147_v51 = vunpack.c.l.bf16 %v5172_v47  ;;  %v5148_v52 = vunpack.c.h.bf16 %v5172_v47 }
  0xa1   : > { %447 = vst [vmem:[#allocation2 + $0x21] sm:$0xff] %v5100_v39  ;;  %448 = vst [vmem:[#allocation2 + $0x31] sm:$0xff] %v5103_v44  ;;  %v5170_v39 = vld [vmem:[%s6834_s9 + $0x50] sm:$0xff]   ;;  %5410 = vmatprep.subr.bf16.mxu0 %v6340_v38  ;;  %v5143_v44 = vunpack.c.l.bf16 %v5171_v43  ;;  %v6360_v38 = vld [vmem:[#allocation9 + $0x1e8] sm:$0xff]  }
  0xa2   : > { %449 = vst [vmem:[#allocation2 + $0x39] sm:$0xff] %v5104_v45  ;;  %450 = vst [vmem:[#allocation2 + $0x49] sm:$0xff] %v5107_v48  ;;  %v5139_v40 = vunpack.c.l.bf16 %v5170_v39  ;;  %v5140_v41 = vunpack.c.h.bf16 %v5170_v39  ;;  %v5144_v45 = vunpack.c.h.bf16 %v5171_v43  ;;  %5411 = vmatpush3.bf16.msra.mxu0 %v6341_v42  ;;  %v5175_v39 = vld [vmem:[%s6834_s9 + $0x78] sm:$0xff]  }
  0xa3   : > { %451 = vst [vmem:[#allocation2 + $0x51] sm:$0xff] %v5108_v49  ;;  %452 = vst [vmem:[#allocation2 + $0x61] sm:$0xff] %v5111_v54  ;;  %5412 = vmatprep.subr.bf16.mxu0 %v6344_v46  ;;  %v6345_v54 = vld [vmem:[#allocation9 + $0x130] sm:$0xff]   ;;  %v5159_v42 = vunpack.c.l.bf16 %v5175_v39  ;;  %v5160_v43 = vunpack.c.h.bf16 %v5175_v39 }
  0xa4   : > { %453 = vst [vmem:[#allocation2 + $0x69] sm:$0xff] %v5112_v55  ;;  %454 = vst [vmem:[#allocation2 + $0x79] sm:$0xff] %v5115_v58  ;;  %v6346_v58 = vld [vmem:[#allocation9 + $0x1c0] sm:$0xff]   ;;  %v6363_v46 = vld [vmem:[#allocation9 + $0x1f0] sm:$0xff]  }
  0xa5   : > { %455 = vst [vmem:[#allocation2 + $0x81] sm:$0xff] %v5116_v59  ;;  %456 = vst [vmem:[#allocation2 + $0x91] sm:$0xff] %v5119_v2  ;;  %5512 = vmatprep.subr.bf16.mxu1 %v6346_v58  ;;  %v7009_v2 = vld [vmem:[%s6834_s9 + $0x28] sm:$0xff]  ;;  %v7048_v58 = vld [vmem:[%s6834_s9 + $0x40] sm:$0xff] }
  0xa6   : > { %457 = vst [vmem:[#allocation2 + $0x99] sm:$0xff] %v5120_v3  ;;  %458 = vst [vmem:[#allocation2 + $0xa9] sm:$0xff] %v5123_v9  ;;  %5413 = vmatpush3.bf16.msra.mxu0 %v6345_v54  ;;  %v6348_v3 = vld [vmem:[#allocation9 + $0x1c8] sm:$0xff]  }
  0xa7   : > { %v670_v62 = vld [vmem:[#allocation2 + $0x18] sm:$0xff]  ;;  %459 = vst [vmem:[#allocation2 + $0xb1] sm:$0xff] %v5124_v10  ;;  %460 = vst [vmem:[#allocation2 + $0xc1] sm:$0xff] %v5127_v24  ;;  %v5174_v24 = vld [vmem:[%s6834_s9 + $0x70] sm:$0xff]  }
  0xa8   : > { %v671_v63 = vld [vmem:[#allocation2 + $0x20] sm:$0xff]  ;;  %v672_v7 = vld [vmem:[#allocation2 + $0x30] sm:$0xff]  ;;  %461 = vst [vmem:[#allocation2 + $0xc9] sm:$0xff] %v5128_v25  ;;  %462 = vst [vmem:[#allocation2 + $0xd9] sm:$0xff] %v5131_v29  ;;  %v5156_v27 = vunpack.c.h.bf16 %v5174_v24 }
  0xa9   : > { %v702_v4 = vpack.c.bf16 %v671_v63, %v670_v62  ;;  %v673_v8 = vld [vmem:[#allocation2 + $0x38] sm:$0xff]  ;;  %v609_v13 = vld [vmem:[#allocation2 + $0x22] sm:$0xff]  ;;  %463 = vst [vmem:[#allocation2 + $0xe1] sm:$0xff] %v5132_v30  ;;  %464 = vst [vmem:[#allocation2 + $0xf1] sm:$0xff] %v5135_v35 }
  0xaa   : > { %v6963_v11 = vpack.c.bf16 %v673_v8, %v672_v7  ;;  %v608_v12 = vld [vmem:[#allocation2 + $0x1a] sm:$0xff]  ;;  %v674_v14 = vld [vmem:[#allocation2 + $0x48] sm:$0xff]  ;;  %v675_v15 = vld [vmem:[#allocation2 + $0x50] sm:$0xff]  ;;  %465 = vst [vmem:[#allocation2 + $0xf9] sm:$0xff] %v5136_v36  ;;  %v5151_v7 = vunpack.c.l.bf16 %v5173_v6  ;;  %v5152_v8 = vunpack.c.h.bf16 %v5173_v6 }
  0xab   : > { %1975 = vmatprep.mubr.bf16.mxu1 %v702_v4  ;;  %1823 = vmatmul.mubr.bf16.gmra.mrb[4].mxu0 %v702_v4  ;;  %v6967_v17 = vpack.c.bf16 %v609_v13, %v608_v12  ;;  %v6972_v19 = vpack.c.bf16 %v675_v15, %v674_v14  ;;  %v610_v21 = vld [vmem:[#allocation2 + $0x32] sm:$0xff]  ;;  %v611_v22 = vld [vmem:[#allocation2 + $0x3a] sm:$0xff]  ;;  %v677_v26 = vld [vmem:[#allocation2 + $0x68] sm:$0xff]  ;;  %466 = vst [vmem:[#allocation2 + $0x109] sm:$0xff] %v5139_v40 }
  0xac   : > { %1976 = vmatmul.mubr.bf16.vlgmr.msra.gmra.mrb[0].mxu1 %v638_v0  ;;  %1830 = vmatprep.mubr.bf16.mxu0 %v6960_v1  ;;  %v676_v23 = vld [vmem:[#allocation2 + $0x60] sm:$0xff]  ;;  %v6981_v33 = vpack.c.bf16 %v611_v22, %v610_v21  ;;  %467 = vst [vmem:[#allocation2 + $0x111] sm:$0xff] %v5140_v41  ;;  %v612_v48 = vld [vmem:[#allocation2 + $0x4a] sm:$0xff]  ;;  %v613_v49 = vld [vmem:[#allocation2 + $0x52] sm:$0xff] }
  0xad   : > { %1983 = vmatprep.mubr.bf16.mxu1 %v6963_v11  ;;  %v6986_v37 = vpack.c.bf16 %v677_v26, %v676_v23  ;;  %v678_v50 = vld [vmem:[#allocation2 + $0x78] sm:$0xff]  ;;  %v679_v53 = vld [vmem:[#allocation2 + $0x80] sm:$0xff]  ;;  %468 = vst [vmem:[#allocation2 + $0x121] sm:$0xff] %v5143_v44  ;;  %469 = vst [vmem:[#allocation2 + $0x129] sm:$0xff] %v5144_v45  ;;  %v6995_v55 = vpack.c.bf16 %v613_v49, %v612_v48  ;;  %v5155_v26 = vunpack.c.l.bf16 %v5174_v24 }
  0xae   : > { %470 = vst [vmem:[#allocation2 + $0x139] sm:$0xff] %v5147_v51  ;;  %471 = vst [vmem:[#allocation2 + $0x141] sm:$0xff] %v5148_v52  ;;  %v7000_v57 = vpack.c.bf16 %v679_v53, %v678_v50  ;;  %v614_v59 = vld [vmem:[#allocation2 + $0x62] sm:$0xff]  ;;  %v615_v60 = vld [vmem:[#allocation2 + $0x6a] sm:$0xff] }
  0xaf   : > { %v680_v61 = vld [vmem:[#allocation2 + $0x90] sm:$0xff]  ;;  %v681_v62 = vld [vmem:[#allocation2 + $0x98] sm:$0xff]  ;;  %v6347_v63 = vld [vmem:[#allocation9 + $0x180] sm:$0xff]   ;;  %v7006_v0 = vpack.c.bf16 %v615_v60, %v614_v59  ;;  %472 = vst [vmem:[#allocation2 + $0x151] sm:$0xff] %v5151_v7 }
  0xb0   : > { %v7011_v4 = vpack.c.bf16 %v681_v62, %v680_v61  ;;  %5513 = vmatpush3.bf16.msra.mxu1 %v6347_v63  ;;  %v616_v9 = vld [vmem:[#allocation2 + $0x7a] sm:$0xff]  ;;  %v617_v10 = vld [vmem:[#allocation2 + $0x82] sm:$0xff]  ;;  %v6351_v12 = vld [vmem:[#allocation9 + $0x1d0] sm:$0xff]   ;;  %473 = vst [vmem:[#allocation2 + $0x159] sm:$0xff] %v5152_v8 }
  0xb1   : > { %5514 = vmatprep.subr.bf16.mxu1 %v6348_v3  ;;  %v682_v13 = vld [vmem:[#allocation2 + $0xa8] sm:$0xff]  ;;  %v683_v14 = vld [vmem:[#allocation2 + $0xb0] sm:$0xff]  ;;  %v6355_v21 = vld [vmem:[#allocation9 + $0x198] sm:$0xff]   ;;  %v7021_v23 = vpack.c.bf16 %v617_v10, %v616_v9  ;;  %474 = vst [vmem:[#allocation2 + $0x169] sm:$0xff] %v5155_v26 }
  0xb2   : > { %v6352_v15 = vld [vmem:[#allocation9 + $0x190] sm:$0xff]   ;;  %v6356_v22 = vld [vmem:[#allocation9 + $0x178] sm:$0xff]   ;;  %v7024_v25 = vpack.c.bf16 %v683_v14, %v682_v13  ;;  %v6358_v29 = vld [vmem:[#allocation9 + $0x1e0] sm:$0xff]   ;;  %475 = vst [vmem:[#allocation2 + $0x171] sm:$0xff] %v5156_v27 }
  0xb3   : > { %1831 = vmatmul.mubr.bf16.gmra.mrb[8].mxu0 %v6963_v11  ;;  %5414 = vmatprep.subr.bf16.mxu0 %v6356_v22  ;;  %v618_v30 = vld [vmem:[#allocation2 + $0x92] sm:$0xff]  ;;  %v619_v31 = vld [vmem:[#allocation2 + $0x9a] sm:$0xff]  ;;  %v685_v35 = vld [vmem:[#allocation2 + $0xc8] sm:$0xff]  ;;  %476 = vst [vmem:[#allocation2 + $0x181] sm:$0xff] %v5159_v42 }
  0xb4   : > { %1984 = vmatmul.mubr.bf16.gmra.mrb[4].mxu1 %v6967_v17  ;;  %1838 = vmatprep.mubr.bf16.mxu0 %v6970_v18  ;;  %v684_v32 = vld [vmem:[#allocation2 + $0xc0] sm:$0xff]  ;;  %v7031_v40 = vpack.c.bf16 %v619_v31, %v618_v30  ;;  %v7034_v41 = vld [vmem:[%s6834_s9 + $0x38] sm:$0xff]  ;;  %v6362_v45 = vld [vmem:[#allocation9 + $0x1a8] sm:$0xff]   ;;  %477 = vst [vmem:[#allocation2 + $0x189] sm:$0xff] %v5160_v43 }
  0xb5   : > { %1991 = vmatprep.mubr.bf16.mxu1 %v6972_v19  ;;  %5515 = vmatpush3.bf16.msra.mxu1 %v6350_v5  ;;  %v6359_v36 = vld [vmem:[#allocation9 + $0x1a0] sm:$0xff]   ;;  %v7036_v44 = vpack.c.bf16 %v685_v35, %v684_v32  ;;  %v620_v47 = vld [vmem:[#allocation2 + $0xaa] sm:$0xff]  ;;  %v621_v48 = vld [vmem:[#allocation2 + $0xb2] sm:$0xff] }
  0xb6   : > { %5516 = vmatprep.subr.bf16.mxu1 %v6351_v12  ;;  %5415 = vmatpush3.bf16.msra.mxu0 %v6357_v28  ;;  %v686_v49 = vld [vmem:[#allocation2 + $0xd8] sm:$0xff]  ;;  %v687_v50 = vld [vmem:[#allocation2 + $0xe0] sm:$0xff]  ;;  %v6364_v51 = vld [vmem:[#allocation9 + $0x1b0] sm:$0xff]   ;;  %v7045_v54 = vpack.c.bf16 %v621_v48, %v620_v47 }
  0xb7   : > { %v7042_v52 = vld [vmem:[#allocation9 + $0x200] sm:$0xff]   ;;  %v6365_v53 = vld [vmem:[#allocation9 + $0x1f8] sm:$0xff]   ;;  %v7050_v59 = vpack.c.bf16 %v687_v50, %v686_v49  ;;  %v623_v62 = vld [vmem:[#allocation2 + $0xca] sm:$0xff] }
  0xb8   : > { %6120 = vmatprep.subr.bf16.mxu0 %v7042_v52  ;;  %v6366_v60 = vld [vmem:[#allocation9 + $0x1b8] sm:$0xff]   ;;  %v622_v61 = vld [vmem:[#allocation2 + $0xc2] sm:$0xff]  ;;  %v688_v63 = vld [vmem:[#allocation2 + $0xf0] sm:$0xff] }
  0xb9   : > { %5517 = vmatpush3.bf16.msra.mxu1 %v6352_v15  ;;  %v689_v3 = vld [vmem:[#allocation2 + $0xf8] sm:$0xff]  ;;  %v7057_v5 = vld [vmem:[%s6834_s9 + $0x48] sm:$0xff]  ;;  %v7059_v6 = vpack.c.bf16 %v623_v62, %v622_v61  ;;  %v691_v12 = vld [vmem:[#allocation2 + $0x110] sm:$0xff] }
  0xba   : > { %5518 = vmatprep.subr.bf16.mxu1 %v6353_v20  ;;  %v7061_v7 = vpack.c.bf16 %v689_v3, %v688_v63  ;;  %v624_v8 = vld [vmem:[#allocation2 + $0xda] sm:$0xff]  ;;  %v625_v9 = vld [vmem:[#allocation2 + $0xe2] sm:$0xff]  ;;  %v7068_v13 = vld [vmem:[%s6834_s9 + $0x50] sm:$0xff] }
  0xbb   : > { %1839 = vmatmul.mubr.bf16.gmra.mrb[12].mxu0 %v6972_v19  ;;  %v690_v10 = vld [vmem:[#allocation2 + $0x108] sm:$0xff]  ;;  %v7070_v14 = vpack.c.bf16 %v625_v9, %v624_v8  ;;  %v626_v20 = vld [vmem:[#allocation2 + $0xf2] sm:$0xff]  ;;  %v692_v22 = vld [vmem:[#allocation2 + $0x120] sm:$0xff] }
  0xbc   : > { %1992 = vmatmul.mubr.bf16.gmra.mrb[8].mxu1 %v6981_v33  ;;  %1846 = vmatprep.mubr.bf16.mxu0 %v6984_v34  ;;  %v7072_v15 = vpack.c.bf16 %v691_v12, %v690_v10  ;;  %v693_v24 = vld [vmem:[#allocation2 + $0x128] sm:$0xff]  ;;  %v7079_v26 = vld [vmem:[%s6834_s9 + $0x58] sm:$0xff]  ;;  %v695_v32 = vld [vmem:[#allocation2 + $0x140] sm:$0xff] }
  0xbd   : > { %1999 = vmatprep.mubr.bf16.mxu1 %v6986_v37  ;;  %5519 = vmatpush3.bf16.msra.mxu1 %v6355_v21  ;;  %v627_v21 = vld [vmem:[#allocation2 + $0xfa] sm:$0xff]  ;;  %v7083_v28 = vpack.c.bf16 %v693_v24, %v692_v22  ;;  %v629_v30 = vld [vmem:[#allocation2 + $0x112] sm:$0xff]  ;;  %v630_v39 = vld [vmem:[#allocation2 + $0x122] sm:$0xff] }
  0xbe   : > { %5520 = vmatprep.subr.bf16.mxu1 %v6358_v29  ;;  %v7081_v27 = vpack.c.bf16 %v627_v21, %v626_v20  ;;  %v628_v29 = vld [vmem:[#allocation2 + $0x10a] sm:$0xff]  ;;  %v694_v31 = vld [vmem:[#allocation2 + $0x138] sm:$0xff]  ;;  %v7090_v35 = vld [vmem:[%s6834_s9 + $0x60] sm:$0xff] }
  0xbf   : > { %v631_v42 = vld [vmem:[#allocation2 + $0x12a] sm:$0xff]  ;;  %v632_v49 = vld [vmem:[#allocation2 + $0x13a] sm:$0xff]  ;;  %v633_v50 = vld [vmem:[#allocation2 + $0x142] sm:$0xff] }
  0xc0   : > { %v696_v43 = vld [vmem:[#allocation2 + $0x150] sm:$0xff]  ;;  %v7103_v47 = vpack.c.bf16 %v631_v42, %v630_v39  ;;  %v7114_v61 = vpack.c.bf16 %v633_v50, %v632_v49  ;;  %v635_v3 = vld [vmem:[#allocation2 + $0x15a] sm:$0xff]  ;;  %v701_v9 = vld [vmem:[#allocation2 + $0x188] sm:$0xff] }
  0xc1   : > { %5521 = vmatpush3.bf16.msra.mxu1 %v6359_v36  ;;  %v7092_v36 = vpack.c.bf16 %v629_v30, %v628_v29  ;;  %v634_v63 = vld [vmem:[#allocation2 + $0x152] sm:$0xff]  ;;  %v700_v8 = vld [vmem:[#allocation2 + $0x180] sm:$0xff]  ;;  %v636_v20 = vld [vmem:[#allocation2 + $0x16a] sm:$0xff] }
  0xc2   : > { %5522 = vmatprep.subr.bf16.mxu1 %v6360_v38  ;;  %v7094_v38 = vpack.c.bf16 %v695_v32, %v694_v31  ;;  %v7122_v10 = vpack.c.bf16 %v635_v3, %v634_v63  ;;  %v7124_v12 = vpack.c.bf16 %v701_v9, %v700_v8  ;;  %v637_v21 = vld [vmem:[#allocation2 + $0x172] sm:$0xff]  ;;  %v6368_v24 = vld [vmem:[#allocation9 + $0x208] sm:$0xff]   ;;  %v6448_v29 = vld [vmem:[%s6834_s9] sm:$0xff] }
  0xc3   : > { %1847 = vmatmul.mubr.bf16.gmra.mrb[16].mxu0 %v6986_v37  ;;  %v7130_v22 = vpack.c.bf16 %v637_v21, %v636_v20  ;;  %v6369_v30 = vld [vmem:[#allocation9 + $0x210] sm:$0xff]   ;;  %v6372_v31 = vld [vmem:[#allocation9 + $0x228] sm:$0xff]  }
  0xc4   : > { %2000 = vmatmul.mubr.bf16.gmra.mrb[12].mxu1 %v6995_v55  ;;  %1854 = vmatprep.mubr.bf16.mxu0 %v6998_v56 }
  0xc5   : > { %2007 = vmatprep.mubr.bf16.mxu1 %v7000_v57  ;;  %5523 = vmatpush3.bf16.msra.mxu1 %v6362_v45  ;;  %v697_v45 = vld [vmem:[#allocation2 + $0x158] sm:$0xff] }
  0xc6   : > { %5524 = vmatprep.subr.bf16.mxu1 %v6363_v46  ;;  %v7101_v46 = vld [vmem:[%s6834_s9 + $0x68] sm:$0xff]  ;;  %v7105_v48 = vpack.c.bf16 %v697_v45, %v696_v43  ;;  %v6377_v43 = vld [vmem:[#allocation11] sm:$0xff]  }
  0xc9   : > { %5525 = vmatpush3.bf16.msra.mxu1 %v6364_v51  ;;  %v698_v51 = vld [vmem:[#allocation2 + $0x168] sm:$0xff] }
  0xca   : > { %5526 = vmatprep.subr.bf16.mxu1 %v6365_v53  ;;  %v699_v53 = vld [vmem:[#allocation2 + $0x170] sm:$0xff] }
  0xcb   : > { %1855 = vmatmul.mubr.bf16.gmra.mrb[20].mxu0 %v7000_v57  ;;  %v7116_v62 = vpack.c.bf16 %v699_v53, %v698_v51  ;;  %v828_v51 = vld [vmem:[#allocation2 + $0x182] sm:$0xff]  ;;  %v829_v53 = vld [vmem:[#allocation2 + $0x18a] sm:$0xff] }
  0xcc   : > { %2008 = vmatmul.mubr.bf16.gmra.mrb[16].mxu1 %v7006_v0  ;;  %1862 = vmatprep.mubr.bf16.mxu0 %v7009_v2  ;;  %v7207_v21 = vpack.c.bf16 %v829_v53, %v828_v51 }
  0xcd   : > { %2015 = vmatprep.mubr.bf16.mxu1 %v7011_v4  ;;  %5527 = vmatpush3.bf16.msra.mxu1 %v6366_v60  ;;  %v7112_v60 = vld [vmem:[%s6834_s9 + $0x70] sm:$0xff] }
  0xd3   : > { %1863 = vmatmul.mubr.bf16.gmra.mrb[24].mxu0 %v7011_v4 }
  0xd4   : > { %2016 = vmatmul.mubr.bf16.gmra.mrb[20].mxu1 %v7021_v23  ;;  %1870 = vmatprep.mubr.bf16.mxu0 %v7019_v16 }
  0xd5   : > { %2023 = vmatprep.mubr.bf16.mxu1 %v7024_v25 }
  0xdb   : > { %1871 = vmatmul.mubr.bf16.gmra.mrb[28].mxu0 %v7024_v25 }
  0xdc   : > { %2024 = vmatmul.mubr.bf16.gmra.mrb[24].mxu1 %v7031_v40  ;;  %1878 = vmatprep.mubr.bf16.mxu0 %v7034_v41 }
  0xdd   : > { %2031 = vmatprep.mubr.bf16.mxu1 %v7036_v44 }
  0xe3   : > { %1879 = vmatmul.mubr.bf16.gmra.mrb[32].mxu0 %v7036_v44 }
  0xe4   : > { %2032 = vmatmul.mubr.bf16.gmra.mrb[28].mxu1 %v7045_v54  ;;  %1886 = vmatprep.mubr.bf16.mxu0 %v7048_v58 }
  0xe5   : > { %2039 = vmatprep.mubr.bf16.mxu1 %v7050_v59 }
  0xeb   : > { %1887 = vmatmul.mubr.bf16.gmra.mrb[36].mxu0 %v7050_v59 }
  0xec   : > { %2040 = vmatmul.mubr.bf16.gmra.mrb[32].mxu1 %v7059_v6  ;;  %1894 = vmatprep.mubr.bf16.mxu0 %v7057_v5 }
  0xed   : > { %2047 = vmatprep.mubr.bf16.mxu1 %v7061_v7 }
  0xf3   : > { %1895 = vmatmul.mubr.bf16.gmra.mrb[40].mxu0 %v7061_v7 }
  0xf4   : > { %2048 = vmatmul.mubr.bf16.gmra.mrb[36].mxu1 %v7070_v14  ;;  %1902 = vmatprep.mubr.bf16.mxu0 %v7068_v13 }
  0xf5   : > { %2055 = vmatprep.mubr.bf16.mxu1 %v7072_v15 }
  0xfb   : > { %1903 = vmatmul.mubr.bf16.gmra.mrb[44].mxu0 %v7072_v15 }
  0xfc   : > { %2056 = vmatmul.mubr.bf16.gmra.mrb[40].mxu1 %v7081_v27  ;;  %1910 = vmatprep.mubr.bf16.mxu0 %v7079_v26 }
  0xfd   : > { %2063 = vmatprep.mubr.bf16.mxu1 %v7083_v28 }
 0x103   : > { %1911 = vmatmul.mubr.bf16.gmra.mrb[48].mxu0 %v7083_v28 }
 0x104   : > { %2064 = vmatmul.mubr.bf16.gmra.mrb[44].mxu1 %v7092_v36  ;;  %1918 = vmatprep.mubr.bf16.mxu0 %v7090_v35 }
 0x105   : > { %2071 = vmatprep.mubr.bf16.mxu1 %v7094_v38 }
 0x10b   : > { %1919 = vmatmul.mubr.bf16.gmra.mrb[52].mxu0 %v7094_v38 }
 0x10c   : > { %2072 = vmatmul.mubr.bf16.gmra.mrb[48].mxu1 %v7103_v47  ;;  %1926 = vmatprep.mubr.bf16.mxu0 %v7101_v46 }
 0x10d   : > { %2079 = vmatprep.mubr.bf16.mxu1 %v7105_v48 }
 0x113   : > { %1927 = vmatmul.mubr.bf16.gmra.mrb[56].mxu0 %v7105_v48 }
 0x114   : > { %2080 = vmatmul.mubr.bf16.gmra.mrb[52].mxu1 %v7114_v61  ;;  %1934 = vmatprep.mubr.bf16.mxu0 %v7112_v60 }
 0x115   : > { %2087 = vmatprep.mubr.bf16.mxu1 %v7116_v62 }
 0x11b   : > { %1935 = vmatmul.mubr.bf16.gmra.mrb[60].mxu0 %v7116_v62 }
 0x11c   : > { %2088 = vmatmul.mubr.bf16.gmra.mrb[56].mxu1 %v7122_v10  ;;  %2136 = vmatprep.mubr.bf16.mxu0 %v6967_v17  ;;  %v6370_v17 = vld [vmem:[#allocation9 + $0x218] sm:$0xff]  }
 0x11d   : > { %2095 = vmatprep.mubr.bf16.mxu1 %v7124_v12 }
 0x123   : > { %2137 = vmatmul.mubr.bf16.vlgmr.msra.gmra.mrb[64].mxu0 %v6448_v29 }
 0x124   : > { %2096 = vmatmul.mubr.bf16.gmra.mrb[60].mxu1 %v7130_v22  ;;  %6121 = vmatpush3.bf16.msra.mxu0 %v7042_v52  ;;  %v6371_v52 = vld [vmem:[#allocation9 + $0x220] sm:$0xff]  }
 0x125   : > { %2297 = vmatprep.mubr.bf16.mxu1 %v6960_v1  ;;  %2144 = vmatprep.mubr.bf16.mxu0 %v6981_v33 }
 0x126   : > { %6122 = vmatprep.subr.bf16.mxu0 %v6368_v24 }
 0x128   : > { %6123 = vmatpush3.bf16.msra.mxu0 %v6368_v24 }
 0x129   : > { %6124 = vmatprep.subr.bf16.mxu0 %v6369_v30 }
 0x12b   : > { %2145 = vmatmul.mubr.bf16.gmra.mrb[68].mxu0 %v6960_v1  ;;  %v6373_v1 = vld [vmem:[#allocation9 + $0x230] sm:$0xff]  }
 0x12c   : > { %2298 = vmatmul.mubr.bf16.vlgmr.msra.gmra.mrb[64].mxu1 %v6963_v11  ;;  %2152 = vmatprep.mubr.bf16.mxu0 %v6995_v55  ;;  %v6374_v11 = vld [vmem:[#allocation9 + $0x238] sm:$0xff]  }
 0x12d   : > { %2305 = vmatprep.mubr.bf16.mxu1 %v6970_v18  ;;  %6125 = vmatpush3.bf16.msra.mxu0 %v6369_v30  ;;  %v6375_v30 = vld [vmem:[%s6834_s9 + $0x78] sm:$0xff]  ;;  %s6543_s9 = scalar_lea.vmem %s6542_s8, 8192 }
 0x12e   : > { %6126 = vmatprep.subr.bf16.mxu0 %v6370_v17  ;;  %p6545_p9 = scmp.lt.s32.totalorder %s6543_s9, %s6537_s7 }
 0x130   : > { %p6546_p12 = por %p6545_p9, %p6544_p7 }
 0x131   : > { %6127 = vmatpush3.bf16.msra.mxu0 %v6370_v17 }
 0x132   : > { %6128 = vmatprep.subr.bf16.mxu0 %v6371_v52  ;;  %p6547_p1 = pnand %p6546_p12, %p6540_p3 }
 0x133   : > { %2153 = vmatmul.mubr.bf16.gmra.mrb[72].mxu0 %v6970_v18 }
 0x134   : > { %2306 = vmatmul.mubr.bf16.gmra.mrb[68].mxu1 %v6972_v19  ;;  %2160 = vmatprep.mubr.bf16.mxu0 %v7006_v0 }
 0x135   : > { %2313 = vmatprep.mubr.bf16.mxu1 %v6984_v34  ;;  %6129 = vmatpush3.bf16.msra.mxu0 %v6371_v52 }
 0x136   : > { %6130 = vmatprep.subr.bf16.mxu0 %v6372_v31 }
 0x139   : > { %6131 = vmatpush3.bf16.msra.mxu0 %v6372_v31 }
 0x13a   : > { %6132 = vmatprep.subr.bf16.mxu0 %v6373_v1 }
 0x13b   : > { %2161 = vmatmul.mubr.bf16.gmra.mrb[76].mxu0 %v6984_v34 }
 0x13c   : > { %2314 = vmatmul.mubr.bf16.gmra.mrb[72].mxu1 %v6986_v37  ;;  %2168 = vmatprep.mubr.bf16.mxu0 %v7021_v23 }
 0x13d   : > { %2321 = vmatprep.mubr.bf16.mxu1 %v6998_v56  ;;  %6133 = vmatpush3.bf16.msra.mxu0 %v6373_v1 }
 0x13e   : > { %6134 = vmatprep.subr.bf16.mxu0 %v6374_v11 }
 0x141   : > { %6135 = vmatpush3.bf16.msra.mxu0 %v6374_v11  ;;  %v991_v11 = vld [vmem:[#allocation2 + $0x32] sm:$0xff] }
 0x143   : > { %2169 = vmatmul.mubr.bf16.gmra.mrb[80].mxu0 %v6998_v56  ;;  %v7182_v56 = vld [vmem:[%s7931_s2] ss:$0 sm:$0xff] }
 0x144   : > { %2322 = vmatmul.mubr.bf16.gmra.mrb[76].mxu1 %v7000_v57  ;;  %2176 = vmatprep.mubr.bf16.mxu0 %v7031_v40 }
 0x145   : > { %2329 = vmatprep.mubr.bf16.mxu1 %v7009_v2 }
 0x14b   : > { %2177 = vmatmul.mubr.bf16.gmra.mrb[84].mxu0 %v7009_v2 }
 0x14c   : > { %2330 = vmatmul.mubr.bf16.gmra.mrb[80].mxu1 %v7011_v4  ;;  %2184 = vmatprep.mubr.bf16.mxu0 %v7045_v54 }
 0x14d   : > { %2337 = vmatprep.mubr.bf16.mxu1 %v7019_v16 }
 0x153   : > { %2185 = vmatmul.mubr.bf16.gmra.mrb[88].mxu0 %v7019_v16 }
 0x154   : > { %2338 = vmatmul.mubr.bf16.gmra.mrb[84].mxu1 %v7024_v25  ;;  %2192 = vmatprep.mubr.bf16.mxu0 %v7059_v6 }
 0x155   : > { %2345 = vmatprep.mubr.bf16.mxu1 %v7034_v41 }
 0x15b   : > { %2193 = vmatmul.mubr.bf16.gmra.mrb[92].mxu0 %v7034_v41 }
 0x15c   : > { %2346 = vmatmul.mubr.bf16.gmra.mrb[88].mxu1 %v7036_v44  ;;  %2200 = vmatprep.mubr.bf16.mxu0 %v7070_v14 }
 0x15d   : > { %2353 = vmatprep.mubr.bf16.mxu1 %v7048_v58  ;;  %v5192_v18 = vpop.f32.mrb[0].mxu0 }
 0x15e   : > { %v5193_v19 = vpop.f32.mrb[1].mxu0 }
 0x15f   : > { %v5194_v33 = vadd.f32 %v5193_v19, %v5192_v18  ;;  %v5195_v34 = vpop.f32.mrb[2].mxu0  ;;  %v992_v18 = vld [vmem:[#allocation2 + $0x3a] sm:$0xff] }
 0x160   : > { %v5196_v37 = vpop.f32.mrb[3].mxu0 }
 0x161   : > { %v5197_v55 = vadd.f32 %v5196_v37, %v5195_v34  ;;  %v1817_v0 = vadd.f32 %v5194_v33, %v7182_v56  ;;  %v957_v34 = vld [vmem:[#allocation2 + $0x199] sm:$0xff]  ;;  %v958_v37 = vld [vmem:[#allocation2 + $0x1a1] sm:$0xff] }
 0x163   : > { %2201 = vmatmul.mubr.bf16.gmra.mrb[96].mxu0 %v7048_v58  ;;  %v1820_v40 = vadd.f32 %v5197_v55, %v7182_v56 }
 0x164   : > { %2354 = vmatmul.mubr.bf16.gmra.mrb[92].mxu1 %v7050_v59  ;;  %2208 = vmatprep.mubr.bf16.mxu0 %v7081_v27 }
 0x165   : > { %2361 = vmatprep.mubr.bf16.mxu1 %v7057_v5 }
 0x16b   : > { %2209 = vmatmul.mubr.bf16.gmra.mrb[100].mxu0 %v7057_v5 }
 0x16c   : > { %2362 = vmatmul.mubr.bf16.gmra.mrb[96].mxu1 %v7061_v7  ;;  %2216 = vmatprep.mubr.bf16.mxu0 %v7092_v36 }
 0x16d   : > { %2369 = vmatprep.mubr.bf16.mxu1 %v7068_v13 }
 0x173   : > { %2217 = vmatmul.mubr.bf16.gmra.mrb[104].mxu0 %v7068_v13 }
 0x174   : > { %2370 = vmatmul.mubr.bf16.gmra.mrb[100].mxu1 %v7072_v15  ;;  %2224 = vmatprep.mubr.bf16.mxu0 %v7103_v47 }
 0x175   : > { %2377 = vmatprep.mubr.bf16.mxu1 %v7079_v26 }
 0x17b   : > { %2225 = vmatmul.mubr.bf16.gmra.mrb[108].mxu0 %v7079_v26 }
 0x17c   : > { %2378 = vmatmul.mubr.bf16.gmra.mrb[104].mxu1 %v7083_v28  ;;  %2232 = vmatprep.mubr.bf16.mxu0 %v7114_v61 }
 0x17d   : > { %2385 = vmatprep.mubr.bf16.mxu1 %v7090_v35 }
 0x17e   : > { %v5198_v57 = vpop.f32.mrb[4].mxu0 }
 0x17f   : > { %v5304_v2 = vpop.f32.mrb[0].mxu1  ;;  %v5199_v4 = vpop.f32.mrb[5].mxu0 }
 0x180   : > { %v5305_v16 = vpop.f32.mrb[1].mxu1  ;;  %v5200_v23 = vadd.f32 %v5199_v4, %v5198_v57  ;;  %v5201_v25 = vpop.f32.mrb[6].mxu0 }
 0x181   : > { %v5306_v41 = vadd.f32 %v5305_v16, %v5304_v2  ;;  %v5307_v44 = vpop.f32.mrb[2].mxu1  ;;  %v5202_v54 = vpop.f32.mrb[7].mxu0  ;;  %v1023_v16 = vpack.c.bf16 %v992_v18, %v991_v11 }
 0x182   : > { %v5308_v58 = vpop.f32.mrb[3].mxu1  ;;  %v5203_v59 = vadd.f32 %v5202_v54, %v5201_v25  ;;  %v1825_v14 = vadd.f32 %v5200_v23, %v7182_v56  ;;  %v6379_v54 = vld [vmem:[#allocation11 + $0x8] sm:$0xff]  }
 0x183   : > { %v5309_v5 = vadd.f32 %v5308_v58, %v5307_v44  ;;  %2233 = vmatmul.mubr.bf16.gmra.mrb[112].mxu0 %v7090_v35  ;;  %v7189_v6 = vadd.f32 %v5306_v41, %v1817_v0  ;;  %v974_v41 = vpack.c.bf16 %v958_v37, %v957_v34  ;;  %v6378_v44 = vld [vmem:[#allocation11 + $0x48] sm:$0xff]  }
 0x184   : > { %2386 = vmatmul.mubr.bf16.gmra.mrb[108].mxu1 %v7094_v38  ;;  %2240 = vmatprep.mubr.bf16.mxu0 %v7122_v10  ;;  %v1828_v35 = vadd.f32 %v5203_v59, %v7182_v56  ;;  %v6376_v38 = vld [vmem:[#allocation11 + $0x40] sm:$0xff]  }
 0x185   : > { %2393 = vmatprep.mubr.bf16.mxu1 %v7101_v46  ;;  %v7194_v7 = vadd.f32 %v5309_v5, %v1820_v40  ;;  %5648 = vmatprep.subr.bf16.mxu1 %v6376_v38 }
 0x186   : > { %v5204_v13 = vpop.f32.mrb[8].mxu0  ;;  %5649 = vmatpush3.bf16.msra.mxu1 %v6377_v43  ;;  %v6449_v43 = vld [vmem:[#allocation2] sm:$0xff] }
 0x187   : > { %v5310_v15 = vpop.f32.mrb[4].mxu1  ;;  %v5205_v26 = vpop.f32.mrb[9].mxu0  ;;  %5650 = vmatprep.subr.bf16.mxu1 %v6378_v44  ;;  %v1003_v44 = vld [vmem:[#allocation2 + $0xc2] sm:$0xff] }
 0x188   : > { %v5311_v27 = vpop.f32.mrb[5].mxu1  ;;  %v5206_v28 = vadd.f32 %v5205_v26, %v5204_v13  ;;  %v5207_v32 = vpop.f32.mrb[10].mxu0  ;;  %v995_v26 = vld [vmem:[#allocation2 + $0x62] sm:$0xff] }
 0x189   : > { %v5312_v36 = vadd.f32 %v5311_v27, %v5310_v15  ;;  %v5313_v39 = vpop.f32.mrb[6].mxu1  ;;  %v5208_v42 = vpop.f32.mrb[11].mxu0  ;;  %v994_v15 = vld [vmem:[#allocation2 + $0x52] sm:$0xff]  ;;  %v996_v27 = vld [vmem:[#allocation2 + $0x6a] sm:$0xff] }
 0x18a   : > { %v5314_v45 = vpop.f32.mrb[7].mxu1  ;;  %v5209_v47 = vadd.f32 %v5208_v42, %v5207_v32  ;;  %v1833_v3 = vadd.f32 %v5206_v28, %v7182_v56  ;;  %5651 = vmatpush3.bf16.msra.mxu1 %v6379_v54  ;;  %v1004_v54 = vld [vmem:[#allocation2 + $0xca] sm:$0xff] }
 0x18b   : > { %v5315_v49 = vadd.f32 %v5314_v45, %v5313_v39  ;;  %2241 = vmatmul.mubr.bf16.gmra.mrb[116].mxu0 %v7101_v46  ;;  %v7199_v50 = vadd.f32 %v5312_v36, %v1825_v14  ;;  %v993_v14 = vld [vmem:[#allocation2 + $0x4a] sm:$0xff]  ;;  %v7226_v45 = vpack.c.bf16 %v6449_v43, %v6449_v43 }
 0x18c   : > { %2394 = vmatmul.mubr.bf16.gmra.mrb[112].mxu1 %v7105_v48  ;;  %2248 = vmatprep.mubr.bf16.mxu0 %v7130_v22  ;;  %v1836_v48 = vadd.f32 %v5209_v47, %v7182_v56  ;;  %v1024_v42 = vpack.c.bf16 %v994_v15, %v993_v14 }
 0x18d   : > { %2401 = vmatprep.mubr.bf16.mxu1 %v7112_v60  ;;  %v7204_v61 = vadd.f32 %v5315_v49, %v1828_v35  ;;  %v1025_v49 = vpack.c.bf16 %v996_v27, %v995_v26 }
 0x18e   : > { %v5210_v63 = vpop.f32.mrb[12].mxu0 }
 0x18f   : > { %v5316_v8 = vpop.f32.mrb[8].mxu1  ;;  %v5211_v46 = vpop.f32.mrb[13].mxu0 }
 0x190   : > { %v5317_v9 = vpop.f32.mrb[9].mxu1  ;;  %v5212_v10 = vadd.f32 %v5211_v46, %v5210_v63  ;;  %v5213_v20 = vpop.f32.mrb[14].mxu0 }
 0x191   : > { %v5318_v22 = vadd.f32 %v5317_v9, %v5316_v8  ;;  %v5319_v24 = vpop.f32.mrb[10].mxu1  ;;  %v5214_v29 = vpop.f32.mrb[15].mxu0 }
 0x192   : > { %v5320_v17 = vpop.f32.mrb[11].mxu1  ;;  %v5215_v52 = vadd.f32 %v5214_v29, %v5213_v20  ;;  %v1841_v55 = vadd.f32 %v5212_v10, %v7182_v56  ;;  %v997_v20 = vld [vmem:[#allocation2 + $0x7a] sm:$0xff] }
 0x193   : > { %v5321_v31 = vadd.f32 %v5320_v17, %v5319_v24  ;;  %2249 = vmatmul.mubr.bf16.gmra.mrb[120].mxu0 %v7112_v60  ;;  %v7212_v1 = vadd.f32 %v5318_v22, %v1833_v3  ;;  %v999_v22 = vld [vmem:[#allocation2 + $0x92] sm:$0xff]  ;;  %v1000_v24 = vld [vmem:[#allocation2 + $0x9a] sm:$0xff] }
 0x194   : > { %2402 = vmatmul.mubr.bf16.gmra.mrb[116].mxu1 %v7116_v62  ;;  %2256 = vmatprep.mubr.bf16.mxu0 %v7207_v21  ;;  %v1844_v62 = vadd.f32 %v5215_v52, %v7182_v56  ;;  %v1027_v37 = vpack.c.bf16 %v1000_v24, %v999_v22 }
 0x195   : > { %2409 = vmatprep.mubr.bf16.mxu1 %v6375_v30  ;;  %v7216_v19 = vadd.f32 %v5321_v31, %v1836_v48  ;;  %v998_v48 = vld [vmem:[#allocation2 + $0x82] sm:$0xff] }
 0x196   : > { %v5216_v33 = vpop.f32.mrb[16].mxu0  ;;  %v1026_v11 = vpack.c.bf16 %v998_v48, %v997_v20 }
 0x197   : > { %v5322_v57 = vpop.f32.mrb[12].mxu1  ;;  %v5217_v0 = vpop.f32.mrb[17].mxu0 }
 0x198   : > { %v5323_v2 = vpop.f32.mrb[13].mxu1  ;;  %v5218_v60 = vadd.f32 %v5217_v0, %v5216_v33  ;;  %v5219_v4 = vpop.f32.mrb[18].mxu0 }
 0x199   : > { %v5324_v23 = vadd.f32 %v5323_v2, %v5322_v57  ;;  %v5325_v25 = vpop.f32.mrb[14].mxu1  ;;  %v5220_v40 = vpop.f32.mrb[19].mxu0 }
 0x19a   : > { %v5326_v58 = vpop.f32.mrb[15].mxu1  ;;  %v5221_v59 = vadd.f32 %v5220_v40, %v5219_v4  ;;  %v1849_v35 = vadd.f32 %v5218_v60, %v7182_v56  ;;  %v6380_v60 = vld [vmem:[#allocation11 + $0x50] sm:$0xff]  }
 0x19b   : > { %v5327_v5 = vadd.f32 %v5326_v58, %v5325_v25  ;;  %2257 = vmatmul.mubr.bf16.gmra.mrb[124].mxu0 %v6375_v30  ;;  %v7220_v13 = vadd.f32 %v5324_v23, %v1841_v55  ;;  %v6381_v4 = vld [vmem:[#allocation11 + $0x10] sm:$0xff]   ;;  %5652 = vmatprep.subr.bf16.mxu1 %v6380_v60 }
 0x19c   : > { %2410 = vmatmul.mubr.bf16.gmra.mrb[120].mxu1 %v7124_v12  ;;  %6136 = vmatprep.mubr.bf16.mxu0 %v1023_v16  ;;  %v1852_v51 = vadd.f32 %v5221_v59, %v7182_v56  ;;  %v1001_v40 = vld [vmem:[#allocation2 + $0xaa] sm:$0xff] }
 0x19d   : > { %2417 = vmatprep.mubr.bf16.mxu1 %v974_v41  ;;  %v7223_v28 = vadd.f32 %v5327_v5, %v1844_v62  ;;  %v1002_v41 = vld [vmem:[#allocation2 + $0xb2] sm:$0xff]  ;;  %5653 = vmatpush3.bf16.msra.mxu1 %v6381_v4  ;;  %v1009_v4 = vld [vmem:[#allocation2 + $0x10a] sm:$0xff] }
 0x19e   : > { %v5222_v32 = vpop.f32.mrb[20].mxu0  ;;  %v1028_v26 = vpack.c.bf16 %v1002_v41, %v1001_v40 }
 0x19f   : > { %v5328_v36 = vpop.f32.mrb[16].mxu1  ;;  %v5223_v39 = vpop.f32.mrb[21].mxu0 }
 0x1a0   : > { %v5329_v38 = vpop.f32.mrb[17].mxu1  ;;  %v5224_v12 = vadd.f32 %v5223_v39, %v5222_v32  ;;  %v5225_v47 = vpop.f32.mrb[22].mxu0 }
 0x1a1   : > { %v5330_v53 = vadd.f32 %v5329_v38, %v5328_v36  ;;  %v5331_v63 = vpop.f32.mrb[18].mxu1  ;;  %v5226_v3 = vpop.f32.mrb[23].mxu0  ;;  %v1029_v36 = vpack.c.bf16 %v1004_v54, %v1003_v44 }
 0x1a2   : > { %v5332_v8 = vpop.f32.mrb[19].mxu1  ;;  %v5227_v46 = vadd.f32 %v5226_v3, %v5225_v47  ;;  %v1857_v17 = vadd.f32 %v5224_v12, %v7182_v56  ;;  %v1007_v3 = vld [vmem:[#allocation2 + $0xf2] sm:$0xff] }
 0x1a3   : > { %v5333_v9 = vadd.f32 %v5332_v8, %v5331_v63  ;;  %6137 = vmatmul.mubr.bf16.vlgmr.msra.gmra.mrb[128].mxu0 %v1024_v42  ;;  %v7229_v10 = vadd.f32 %v5330_v53, %v1849_v35  ;;  %v1005_v53 = vld [vmem:[#allocation2 + $0xda] sm:$0xff]  ;;  %v1006_v63 = vld [vmem:[#allocation2 + $0xe2] sm:$0xff] }
 0x1a4   : > { %2418 = vmatmul.mubr.bf16.gmra.mrb[124].mxu1 %v7226_v45  ;;  %6140 = vmatprep.mubr.bf16.mxu0 %v1025_v49  ;;  %v1860_v55 = vadd.f32 %v5227_v46, %v7182_v56  ;;  %v1008_v8 = vld [vmem:[#allocation2 + $0xfa] sm:$0xff]  ;;  %v1030_v24 = vpack.c.bf16 %v1006_v63, %v1005_v53  ;;  %v1015_v63 = vld [vmem:[#allocation2 + $0x152] sm:$0xff] }
 0x1a5   : > { %v7232_v29 = vadd.f32 %v5333_v9, %v1852_v51 }
 0x1a6   : > { %v5228_v30 = vpop.f32.mrb[24].mxu0 }
 0x1a7   : > { %v5334_v52 = vpop.f32.mrb[20].mxu1  ;;  %v5229_v31 = vpop.f32.mrb[25].mxu0 }
 0x1a8   : > { %v5335_v18 = vpop.f32.mrb[21].mxu1  ;;  %v5230_v33 = vadd.f32 %v5229_v31, %v5228_v30  ;;  %v5231_v34 = vpop.f32.mrb[26].mxu0  ;;  %v1031_v31 = vpack.c.bf16 %v1008_v8, %v1007_v3  ;;  %v1016_v3 = vld [vmem:[#allocation2 + $0x15a] sm:$0xff] }
 0x1a9   : > { %v5336_v57 = vadd.f32 %v5335_v18, %v5334_v52  ;;  %v5337_v0 = vpop.f32.mrb[22].mxu1  ;;  %v5232_v2 = vpop.f32.mrb[27].mxu0 }
 0x1aa   : > { %v5338_v16 = vpop.f32.mrb[23].mxu1  ;;  %v5233_v62 = vadd.f32 %v5232_v2, %v5231_v34  ;;  %v1865_v5 = vadd.f32 %v5230_v33, %v7182_v56 }
 0x1ab   : > { %v5339_v23 = vadd.f32 %v5338_v16, %v5337_v0  ;;  %6141 = vmatmul.mubr.bf16.gmra.mrb[132].mxu0 %v1026_v11  ;;  %v7236_v25 = vadd.f32 %v5336_v57, %v1857_v17  ;;  %v1010_v16 = vld [vmem:[#allocation2 + $0x112] sm:$0xff] }
 0x1ac   : > { %6144 = vmatprep.mubr.bf16.mxu0 %v1027_v37  ;;  %v1868_v39 = vadd.f32 %v5233_v62, %v7182_v56  ;;  %v6382_v37 = vld [vmem:[#allocation11 + $0x58] sm:$0xff]   ;;  %v1011_v62 = vld [vmem:[#allocation2 + $0x122] sm:$0xff] }
 0x1ad   : > { %v7238_v58 = vadd.f32 %v5339_v23, %v1860_v55  ;;  %v6383_v55 = vld [vmem:[#allocation11 + $0x18] sm:$0xff]   ;;  %5654 = vmatprep.subr.bf16.mxu1 %v6382_v37  ;;  %v1012_v23 = vld [vmem:[#allocation2 + $0x12a] sm:$0xff]  ;;  %v6385_v37 = vld [vmem:[#allocation11 + $0x20] sm:$0xff]  }
 0x1ae   : > { %v5234_v59 = vpop.f32.mrb[28].mxu0  ;;  %5655 = vmatpush3.bf16.msra.mxu1 %v6383_v55 }
 0x1af   : > { %v5340_v14 = vpop.f32.mrb[24].mxu1  ;;  %v5235_v15 = vpop.f32.mrb[29].mxu0 }
 0x1b0   : > { %v5341_v27 = vpop.f32.mrb[25].mxu1  ;;  %v5236_v32 = vadd.f32 %v5235_v15, %v5234_v59  ;;  %v5237_v35 = vpop.f32.mrb[30].mxu0 }
 0x1b1   : > { %v5342_v42 = vadd.f32 %v5341_v27, %v5340_v14  ;;  %v5343_v38 = vpop.f32.mrb[26].mxu1  ;;  %v5238_v43 = vpop.f32.mrb[31].mxu0  ;;  %v1033_v27 = vpack.c.bf16 %v1012_v23, %v1011_v62 }
 0x1b2   : > { %v5344_v12 = vpop.f32.mrb[27].mxu1  ;;  %v5239_v47 = vadd.f32 %v5238_v43, %v5237_v35  ;;  %v1873_v20 = vadd.f32 %v5236_v32, %v7182_v56 }
 0x1b3   : > { %v5345_v49 = vadd.f32 %v5344_v12, %v5343_v38  ;;  %6145 = vmatmul.mubr.bf16.gmra.mrb[136].mxu0 %v1028_v26  ;;  %v7242_v51 = vadd.f32 %v5342_v42, %v1865_v5  ;;  %v1032_v5 = vpack.c.bf16 %v1010_v16, %v1009_v4  ;;  %v1017_v4 = vld [vmem:[#allocation2 + $0x16a] sm:$0xff]  ;;  %v1018_v16 = vld [vmem:[#allocation2 + $0x172] sm:$0xff] }
 0x1b4   : > { %6148 = vmatprep.mubr.bf16.mxu0 %v1029_v36  ;;  %v1876_v11 = vadd.f32 %v5239_v47, %v7182_v56  ;;  %v1013_v47 = vld [vmem:[#allocation2 + $0x13a] sm:$0xff] }
 0x1b5   : > { %v7244_v46 = vadd.f32 %v5345_v49, %v1868_v39  ;;  %v1014_v49 = vld [vmem:[#allocation2 + $0x142] sm:$0xff] }
 0x1b6   : > { %v5240_v9 = vpop.f32.mrb[32].mxu0 }
 0x1b7   : > { %v5346_v48 = vpop.f32.mrb[28].mxu1  ;;  %v5241_v22 = vpop.f32.mrb[33].mxu0 }
 0x1b8   : > { %v5347_v30 = vpop.f32.mrb[29].mxu1  ;;  %v5242_v17 = vadd.f32 %v5241_v22, %v5240_v9  ;;  %v5243_v52 = vpop.f32.mrb[34].mxu0  ;;  %v1034_v22 = vpack.c.bf16 %v1014_v49, %v1013_v47  ;;  %v1022_v47 = vld [vmem:[#allocation2 + $0x1a2] sm:$0xff] }
 0x1b9   : > { %v5348_v18 = vadd.f32 %v5347_v30, %v5346_v48  ;;  %v5349_v33 = vpop.f32.mrb[30].mxu1  ;;  %v5244_v34 = vpop.f32.mrb[35].mxu0 }
 0x1ba   : > { %v5350_v57 = vpop.f32.mrb[31].mxu1  ;;  %v5245_v0 = vadd.f32 %v5244_v34, %v5243_v52  ;;  %v1881_v44 = vadd.f32 %v5242_v17, %v7182_v56  ;;  %v1035_v52 = vpack.c.bf16 %v1016_v3, %v1015_v63  ;;  %v6384_v34 = vld [vmem:[#allocation11 + $0x60] sm:$0xff]  }
 0x1bb   : > { %v5351_v2 = vadd.f32 %v5350_v57, %v5349_v33  ;;  %6149 = vmatmul.mubr.bf16.gmra.mrb[140].mxu0 %v1030_v24  ;;  %v7248_v60 = vadd.f32 %v5348_v18, %v1873_v20  ;;  %5656 = vmatprep.subr.bf16.mxu1 %v6384_v34 }
 0x1bc   : > { %6152 = vmatprep.mubr.bf16.mxu0 %v1031_v31  ;;  %v1884_v32 = vadd.f32 %v5245_v0, %v7182_v56  ;;  %5657 = vmatpush3.bf16.msra.mxu1 %v6385_v37 }
 0x1bd   : > { %v7250_v40 = vadd.f32 %v5351_v2, %v1876_v11 }
 0x1be   : > { %v5246_v41 = vpop.f32.mrb[36].mxu0 }
 0x1bf   : > { %v5352_v54 = vpop.f32.mrb[32].mxu1  ;;  %v5247_v59 = vpop.f32.mrb[37].mxu0 }
 0x1c0   : > { %v5353_v14 = vpop.f32.mrb[33].mxu1  ;;  %v5248_v15 = vadd.f32 %v5247_v59, %v5246_v41  ;;  %v5249_v26 = vpop.f32.mrb[38].mxu0  ;;  %v1036_v59 = vpack.c.bf16 %v1018_v16, %v1017_v4 }
 0x1c1   : > { %v5354_v35 = vadd.f32 %v5353_v14, %v5352_v54  ;;  %v5355_v36 = vpop.f32.mrb[34].mxu1  ;;  %v5250_v39 = vpop.f32.mrb[39].mxu0 }
 0x1c2   : > { %v5356_v42 = vpop.f32.mrb[35].mxu1  ;;  %v5251_v38 = vadd.f32 %v5250_v39, %v5249_v26  ;;  %v1889_v9 = vadd.f32 %v5248_v15, %v7182_v56 }
 0x1c3   : > { %v7254_v43 = vadd.f32 %v5354_v35, %v1881_v44  ;;  %v5357_v12 = vadd.f32 %v5356_v42, %v5355_v36  ;;  %6153 = vmatmul.mubr.bf16.gmra.mrb[144].mxu0 %v1032_v5 }
 0x1c4   : > { %6156 = vmatprep.mubr.bf16.mxu0 %v1033_v27  ;;  %v1892_v31 = vadd.f32 %v5251_v38, %v7182_v56 }
 0x1c5   : > { %v7256_v53 = vadd.f32 %v5357_v12, %v1884_v32  ;;  %v1021_v12 = vld [vmem:[#allocation2 + $0x19a] sm:$0xff] }
 0x1c6   : > { %v5252_v8 = vpop.f32.mrb[40].mxu0 }
 0x1c7   : > { %v5358_v20 = vpop.f32.mrb[36].mxu1  ;;  %v5253_v48 = vpop.f32.mrb[41].mxu0 }
 0x1c8   : > { %v5359_v24 = vpop.f32.mrb[37].mxu1  ;;  %v5254_v30 = vadd.f32 %v5253_v48, %v5252_v8  ;;  %v5255_v17 = vpop.f32.mrb[42].mxu0 }
 0x1c9   : > { %v5360_v11 = vadd.f32 %v5359_v24, %v5358_v20  ;;  %v5361_v18 = vpop.f32.mrb[38].mxu1  ;;  %v5256_v33 = vpop.f32.mrb[43].mxu0  ;;  %v1038_v20 = vpack.c.bf16 %v1022_v47, %v1021_v12 }
 0x1ca   : > { %v5362_v55 = vpop.f32.mrb[39].mxu1  ;;  %v5257_v57 = vadd.f32 %v5256_v33, %v5255_v17  ;;  %v1897_v41 = vadd.f32 %v5254_v30, %v7182_v56 }
 0x1cb   : > { %v7260_v0 = vadd.f32 %v5360_v11, %v1889_v9  ;;  %v5363_v2 = vadd.f32 %v5362_v55, %v5361_v18  ;;  %6157 = vmatmul.mubr.bf16.gmra.mrb[148].mxu0 %v1034_v22  ;;  %v6386_v11 = vld [vmem:[#allocation11 + $0x68] sm:$0xff]  }
 0x1cc   : > { %6160 = vmatprep.mubr.bf16.mxu0 %v1035_v52  ;;  %v1900_v26 = vadd.f32 %v5257_v57, %v7182_v56  ;;  %5658 = vmatprep.subr.bf16.mxu1 %v6386_v11 }
 0x1cd   : > { %v7262_v62 = vadd.f32 %v5363_v2, %v1892_v31 }
 0x1ce   : > { %v5258_v23 = vpop.f32.mrb[44].mxu0 }
 0x1cf   : > { %v5364_v44 = vpop.f32.mrb[40].mxu1  ;;  %v5259_v54 = vpop.f32.mrb[45].mxu0 }
 0x1d0   : > { %v5365_v5 = vpop.f32.mrb[41].mxu1  ;;  %v5260_v14 = vadd.f32 %v5259_v54, %v5258_v23  ;;  %v5261_v15 = vpop.f32.mrb[46].mxu0 }
 0x1d1   : > { %v5366_v27 = vadd.f32 %v5365_v5, %v5364_v44  ;;  %v5367_v32 = vpop.f32.mrb[42].mxu1  ;;  %v5262_v35 = vpop.f32.mrb[47].mxu0 }
 0x1d2   : > { %v5368_v36 = vpop.f32.mrb[43].mxu1  ;;  %v5263_v39 = vadd.f32 %v5262_v35, %v5261_v15  ;;  %v1905_v3 = vadd.f32 %v5260_v14, %v7182_v56 }
 0x1d3   : > { %v7266_v42 = vadd.f32 %v5366_v27, %v1897_v41  ;;  %v5369_v38 = vadd.f32 %v5368_v36, %v5367_v32  ;;  %6161 = vmatmul.mubr.bf16.gmra.mrb[152].mxu0 %v1036_v59 }
 0x1d4   : > { %6164 = vmatprep.mubr.bf16.mxu0 %v7207_v21  ;;  %v1908_v30 = vadd.f32 %v5263_v39, %v7182_v56  ;;  %v6387_v21 = vld [vmem:[#allocation11 + $0x28] sm:$0xff]  }
 0x1d5   : > { %v7269_v49 = vadd.f32 %v5369_v38, %v1900_v26  ;;  %5659 = vmatpush3.bf16.msra.mxu1 %v6387_v21 }
 0x1d6   : > { %v5264_v63 = vpop.f32.mrb[48].mxu0 }
 0x1d7   : > { %v5370_v8 = vpop.f32.mrb[44].mxu1  ;;  %v5265_v9 = vpop.f32.mrb[49].mxu0 }
 0x1d8   : > { %v5371_v48 = vpop.f32.mrb[45].mxu1  ;;  %v5266_v22 = vadd.f32 %v5265_v9, %v5264_v63  ;;  %v5267_v24 = vpop.f32.mrb[50].mxu0 }
 0x1d9   : > { %v5372_v17 = vadd.f32 %v5371_v48, %v5370_v8  ;;  %v5373_v52 = vpop.f32.mrb[46].mxu1  ;;  %v5268_v31 = vpop.f32.mrb[51].mxu0 }
 0x1da   : > { %v5374_v18 = vpop.f32.mrb[47].mxu1  ;;  %v5269_v33 = vadd.f32 %v5268_v31, %v5267_v24  ;;  %v1913_v2 = vadd.f32 %v5266_v22, %v7182_v56  ;;  %v6388_v22 = vld [vmem:[#allocation11 + $0x70] sm:$0xff]  }
 0x1db   : > { %v7273_v34 = vadd.f32 %v5372_v17, %v1905_v3  ;;  %v5375_v37 = vadd.f32 %v5374_v18, %v5373_v52  ;;  %6165 = vmatmul.mubr.bf16.gmra.mrb[156].mxu0 %v1038_v20  ;;  %v6389_v24 = vld [vmem:[#allocation11 + $0x30] sm:$0xff]   ;;  %5660 = vmatprep.subr.bf16.mxu1 %v6388_v22  ;;  %v6390_v18 = vld [vmem:[#allocation11 + $0xc0] sm:$0xff]  }
 0x1dc   : > { %v1916_v54 = vadd.f32 %v5269_v33, %v7182_v56  ;;  %5661 = vmatpush3.bf16.msra.mxu1 %v6389_v24  ;;  %5760 = vmatprep.subr.bf16.mxu0 %v6390_v18 }
 0x1dd   : > { %v7275_v55 = vadd.f32 %v5375_v37, %v1908_v30 }
 0x1de   : > { %v5270_v57 = vpop.f32.mrb[52].mxu0 }
 0x1df   : > { %v5376_v4 = vpop.f32.mrb[48].mxu1  ;;  %v5271_v16 = vpop.f32.mrb[53].mxu0 }
 0x1e0   : > { %v5377_v23 = vpop.f32.mrb[49].mxu1  ;;  %v5272_v41 = vadd.f32 %v5271_v16, %v5270_v57  ;;  %v5273_v44 = vpop.f32.mrb[54].mxu0 }
 0x1e1   : > { %v5378_v59 = vadd.f32 %v5377_v23, %v5376_v4  ;;  %v5379_v5 = vpop.f32.mrb[50].mxu1  ;;  %v5274_v14 = vpop.f32.mrb[55].mxu0 }
 0x1e2   : > { %v5380_v15 = vpop.f32.mrb[51].mxu1  ;;  %v5275_v26 = vadd.f32 %v5274_v14, %v5273_v44  ;;  %v1921_v39 = vadd.f32 %v5272_v41, %v7182_v56 }
 0x1e3   : > { %v7279_v27 = vadd.f32 %v5378_v59, %v1913_v2  ;;  %v5381_v32 = vadd.f32 %v5380_v15, %v5379_v5  ;;  %v6391_v2 = vld [vmem:[#allocation11 + $0x80] sm:$0xff]   ;;  %v6392_v15 = vld [vmem:[#allocation11 + $0xc8] sm:$0xff]  }
 0x1e4   : > { %v1924_v8 = vadd.f32 %v5275_v26, %v7182_v56  ;;  %5761 = vmatpush3.bf16.msra.mxu0 %v6391_v2 }
 0x1e5   : > { %v7281_v35 = vadd.f32 %v5381_v32, %v1916_v54  ;;  %5762 = vmatprep.subr.bf16.mxu0 %v6392_v15 }
 0x1e6   : > { %v5276_v36 = vpop.f32.mrb[56].mxu0 }
 0x1e7   : > { %v5382_v38 = vpop.f32.mrb[52].mxu1  ;;  %v5277_v12 = vpop.f32.mrb[57].mxu0 }
 0x1e8   : > { %v5383_v47 = vpop.f32.mrb[53].mxu1  ;;  %v5278_v63 = vadd.f32 %v5277_v12, %v5276_v36  ;;  %v5279_v3 = vpop.f32.mrb[58].mxu0  ;;  %v6393_v36 = vld [vmem:[#allocation11 + $0x88] sm:$0xff]   ;;  %v6395_v12 = vld [vmem:[#allocation11 + $0xd0] sm:$0xff]  }
 0x1e9   : > { %v5384_v9 = vadd.f32 %v5383_v47, %v5382_v38  ;;  %v5385_v20 = vpop.f32.mrb[54].mxu1  ;;  %v5280_v48 = vpop.f32.mrb[59].mxu0  ;;  %5763 = vmatpush3.bf16.msra.mxu0 %v6393_v36  ;;  %v2716_v36 = vld [vmem:[#allocation3 + $0x1] sm:$0xff] }
 0x1ea   : > { %v5386_v30 = vpop.f32.mrb[55].mxu1  ;;  %v5281_v17 = vadd.f32 %v5280_v48, %v5279_v3  ;;  %v1929_v33 = vadd.f32 %v5278_v63, %v7182_v56  ;;  %5764 = vmatprep.subr.bf16.mxu0 %v6395_v12 }
 0x1eb   : > { %v7285_v52 = vadd.f32 %v5384_v9, %v1921_v39  ;;  %v5387_v31 = vadd.f32 %v5386_v30, %v5385_v20 }
 0x1ec   : > { %v1932_v41 = vadd.f32 %v5281_v17, %v7182_v56 }
 0x1ed   : > { %v7287_v11 = vadd.f32 %v5387_v31, %v1924_v8  ;;  %v6397_v8 = vld [vmem:[#allocation11 + $0x90] sm:$0xff]   ;;  %v6394_v31 = vld [vmem:[#allocation11 + $0x78] sm:$0xff]  }
 0x1ee   : > { %v5282_v21 = vpop.f32.mrb[60].mxu0  ;;  %5765 = vmatpush3.bf16.msra.mxu0 %v6397_v8  ;;  %5662 = vmatprep.subr.bf16.mxu1 %v6394_v31  ;;  %v6404_v31 = vld [vmem:[#allocation11 + $0xf0] sm:$0xff]  }
 0x1ef   : > { %v5388_v37 = vpop.f32.mrb[56].mxu1  ;;  %v5283_v57 = vpop.f32.mrb[61].mxu0 }
 0x1f0   : > { %v5389_v4 = vpop.f32.mrb[57].mxu1  ;;  %v5284_v16 = vadd.f32 %v5283_v57, %v5282_v21  ;;  %v5285_v23 = vpop.f32.mrb[62].mxu0  ;;  %v6396_v21 = vld [vmem:[#allocation11 + $0x38] sm:$0xff]  }
 0x1f1   : > { %v5390_v44 = vadd.f32 %v5389_v4, %v5388_v37  ;;  %v5391_v54 = vpop.f32.mrb[58].mxu1  ;;  %v5286_v59 = vpop.f32.mrb[63].mxu0  ;;  %v6398_v57 = vld [vmem:[#allocation11 + $0xd8] sm:$0xff]   ;;  %5663 = vmatpush3.bf16.msra.mxu1 %v6396_v21  ;;  %v6405_v21 = vld [vmem:[#allocation11 + $0x140] sm:$0xff]  }
 0x1f2   : > { %v5392_v5 = vpop.f32.mrb[59].mxu1  ;;  %v5287_v14 = vadd.f32 %v5286_v59, %v5285_v23  ;;  %v1937_v47 = vadd.f32 %v5284_v16, %v7182_v56  ;;  %v6399_v16 = vld [vmem:[#allocation11 + $0x98] sm:$0xff]   ;;  %5766 = vmatprep.subr.bf16.mxu0 %v6398_v57  ;;  %v6402_v59 = vld [vmem:[#allocation11 + $0xe8] sm:$0xff]   ;;  %v6407_v57 = vld [vmem:[#allocation11 + $0x100] sm:$0xff]   ;;  %5872 = vmatprep.subr.bf16.mxu1 %v6405_v21 }
 0x1f3   : > { %v7291_v26 = vadd.f32 %v5390_v44, %v1929_v33  ;;  %v5393_v32 = vadd.f32 %v5392_v5, %v5391_v54  ;;  %5767 = vmatpush3.bf16.msra.mxu0 %v6399_v16  ;;  %v6400_v44 = vld [vmem:[#allocation11 + $0xe0] sm:$0xff]  }
 0x1f4   : > { %v1940_v22 = vadd.f32 %v5287_v14, %v7182_v56  ;;  %v6401_v54 = vld [vmem:[#allocation11 + $0xa0] sm:$0xff]   ;;  %5768 = vmatprep.subr.bf16.mxu0 %v6400_v44 }
 0x1f5   : > { %v7293_v39 = vadd.f32 %v5393_v32, %v1932_v41 }
 0x1f6   : > { %v5416_v38 = vpop.f32.mrb[64].mxu0 }
 0x1f7   : > { %v5394_v63 = vpop.f32.mrb[60].mxu1  ;;  %v5417_v3 = vpop.f32.mrb[65].mxu0  ;;  %5769 = vmatpush3.bf16.msra.mxu0 %v6401_v54 }
 0x1f8   : > { %v5395_v9 = vpop.f32.mrb[61].mxu1  ;;  %v5418_v20 = vadd.f32 %v5417_v3, %v5416_v38  ;;  %v5419_v48 = vpop.f32.mrb[66].mxu0  ;;  %v2717_v38 = vld [vmem:[#allocation3 + $0x9] sm:$0xff]  ;;  %5770 = vmatprep.subr.bf16.mxu0 %v6402_v59 }
 0x1f9   : > { %v5396_v24 = vadd.f32 %v5395_v9, %v5394_v63  ;;  %v5397_v30 = vpop.f32.mrb[62].mxu1  ;;  %v5420_v17 = vpop.f32.mrb[67].mxu0  ;;  %v2748_v63 = vpack.c.bf16 %v2717_v38, %v2716_v36 }
 0x1fa   : > { %v5398_v18 = vpop.f32.mrb[63].mxu1  ;;  %v2139_v33 = vadd.f32 %v5418_v20, %v7189_v6  ;;  %v5421_v37 = vadd.f32 %v5420_v17, %v5419_v48 }
 0x1fb   : > { %v7298_v2 = vadd.f32 %v5396_v24, %v1937_v47  ;;  %v5399_v4 = vadd.f32 %v5398_v18, %v5397_v30  ;;  %3988 = vmatprep.mubr.bf16.mxu1 %v2748_v63  ;;  %v6406_v18 = vld [vmem:[#allocation11 + $0xb0] sm:$0xff]  }
 0x1fc   : > { %v2142_v23 = vadd.f32 %v5421_v37, %v7194_v7  ;;  %3989 = vmatmul.mubr.bf16.vlgmr.msra.gmra.mrb[128].mxu1 %v7226_v45 }
 0x1fd   : > { %v7301_v56 = vadd.f32 %v5399_v4, %v1940_v22  ;;  %v6403_v22 = vld [vmem:[#allocation11 + $0xa8] sm:$0xff]   ;;  %v6408_v4 = vld [vmem:[#allocation11 + $0xf8] sm:$0xff]   ;;  %5873 = vmatpush3.bf16.msra.mxu1 %v6407_v57 }
 0x1fe   : > { %v5422_v41 = vpop.f32.mrb[68].mxu0  ;;  %5771 = vmatpush3.bf16.msra.mxu0 %v6403_v22 }
 0x1ff   : > { %v5528_v5 = vpop.f32.mrb[64].mxu1  ;;  %v5423_v6 = vpop.f32.mrb[69].mxu0  ;;  %5772 = vmatprep.subr.bf16.mxu0 %v6404_v31 }
 0x200   : > { %v5529_v14 = vpop.f32.mrb[65].mxu1  ;;  %v5424_v15 = vadd.f32 %v5423_v6, %v5422_v41  ;;  %v5425_v32 = vpop.f32.mrb[70].mxu0 }
 0x201   : > { %v5530_v12 = vadd.f32 %v5529_v14, %v5528_v5  ;;  %v5531_v47 = vpop.f32.mrb[66].mxu1  ;;  %v5426_v7 = vpop.f32.mrb[71].mxu0  ;;  %v6409_v14 = vld [vmem:[#allocation11 + $0xb8] sm:$0xff]  }
 0x202   : > { %v5532_v3 = vpop.f32.mrb[67].mxu1  ;;  %v2147_v8 = vadd.f32 %v5424_v15, %v7199_v50  ;;  %v5427_v9 = vadd.f32 %v5426_v7, %v5425_v32  ;;  %5773 = vmatpush3.bf16.msra.mxu0 %v6406_v18  ;;  %v6410_v18 = vld [vmem:[#allocation11 + $0x148] sm:$0xff]  }
 0x203   : > { %v5533_v20 = vadd.f32 %v5532_v3, %v5531_v47  ;;  %v7304_v48 = vadd.f32 %v5530_v12, %v2139_v33  ;;  %5774 = vmatprep.subr.bf16.mxu0 %v6408_v4  ;;  %5874 = vmatprep.subr.bf16.mxu1 %v6410_v18 }
 0x204   : > { %v2150_v24 = vadd.f32 %v5427_v9, %v7204_v61 }
 0x205   : > { %v7308_v30 = vadd.f32 %v5533_v20, %v2142_v23 }
 0x206   : > { %v5428_v17 = vpop.f32.mrb[72].mxu0  ;;  %5775 = vmatpush3.bf16.msra.mxu0 %v6409_v14 }
 0x207   : > { %v5534_v37 = vpop.f32.mrb[68].mxu1  ;;  %v5429_v50 = vpop.f32.mrb[73].mxu0 }
 0x208   : > { %v5535_v16 = vpop.f32.mrb[69].mxu1  ;;  %v5430_v33 = vadd.f32 %v5429_v50, %v5428_v17  ;;  %v5431_v41 = vpop.f32.mrb[74].mxu0 }
 0x209   : > { %v5536_v44 = vadd.f32 %v5535_v16, %v5534_v37  ;;  %v5537_v61 = vpop.f32.mrb[70].mxu1  ;;  %v5432_v54 = vpop.f32.mrb[75].mxu0  ;;  %v6411_v37 = vld [vmem:[#allocation11 + $0x108] sm:$0xff]  }
 0x20a   : > { %v5538_v45 = vpop.f32.mrb[71].mxu1  ;;  %v2155_v23 = vadd.f32 %v5430_v33, %v7212_v1  ;;  %v5433_v59 = vadd.f32 %v5432_v54, %v5431_v41  ;;  %5875 = vmatpush3.bf16.msra.mxu1 %v6411_v37 }
 0x20b   : > { %v5539_v5 = vadd.f32 %v5538_v45, %v5537_v61  ;;  %v7311_v6 = vadd.f32 %v5536_v44, %v2147_v8 }
 0x20c   : > { %v2158_v15 = vadd.f32 %v5433_v59, %v7216_v19 }
 0x20d   : > { %v7314_v32 = vadd.f32 %v5539_v5, %v2150_v24 }
 0x20e   : > { %v5434_v36 = vpop.f32.mrb[76].mxu0 }
 0x20f   : > { %v5540_v38 = vpop.f32.mrb[72].mxu1  ;;  %v5435_v12 = vpop.f32.mrb[77].mxu0 }
 0x210   : > { %v5541_v47 = vpop.f32.mrb[73].mxu1  ;;  %v5436_v7 = vadd.f32 %v5435_v12, %v5434_v36  ;;  %v5437_v63 = vpop.f32.mrb[78].mxu0 }
 0x211   : > { %v5542_v3 = vadd.f32 %v5541_v47, %v5540_v38  ;;  %v5543_v9 = vpop.f32.mrb[74].mxu1  ;;  %v5438_v1 = vpop.f32.mrb[79].mxu0 }
 0x212   : > { %v5544_v20 = vpop.f32.mrb[75].mxu1  ;;  %v2163_v22 = vadd.f32 %v5436_v7, %v7220_v13  ;;  %v5439_v8 = vadd.f32 %v5438_v1, %v5437_v63 }
 0x213   : > { %v5545_v17 = vadd.f32 %v5544_v20, %v5543_v9  ;;  %v7317_v31 = vadd.f32 %v5542_v3, %v2155_v23 }
 0x214   : > { %v2166_v19 = vadd.f32 %v5439_v8, %v7223_v28 }
 0x215   : > { %v7320_v24 = vadd.f32 %v5545_v17, %v2158_v15 }
 0x216   : > { %v5440_v21 = vpop.f32.mrb[80].mxu0 }
 0x217   : > { %v5546_v50 = vpop.f32.mrb[76].mxu1  ;;  %v5441_v57 = vpop.f32.mrb[81].mxu0 }
 0x218   : > { %v5547_v4 = vpop.f32.mrb[77].mxu1  ;;  %v5442_v16 = vadd.f32 %v5441_v57, %v5440_v21  ;;  %v5443_v33 = vpop.f32.mrb[82].mxu0  ;;  %v6413_v21 = vld [vmem:[#allocation11 + $0x110] sm:$0xff]  }
 0x219   : > { %v5548_v41 = vadd.f32 %v5547_v4, %v5546_v50  ;;  %v5549_v44 = vpop.f32.mrb[78].mxu1  ;;  %v5444_v13 = vpop.f32.mrb[83].mxu0 }
 0x21a   : > { %v5550_v61 = vpop.f32.mrb[79].mxu1  ;;  %v2171_v54 = vadd.f32 %v5442_v16, %v7229_v10  ;;  %v5445_v45 = vadd.f32 %v5444_v13, %v5443_v33 }
 0x21b   : > { %v5551_v28 = vadd.f32 %v5550_v61, %v5549_v44  ;;  %v7323_v23 = vadd.f32 %v5548_v41, %v2163_v22 }
 0x21c   : > { %v2174_v59 = vadd.f32 %v5445_v45, %v7232_v29 }
 0x21d   : > { %v7326_v5 = vadd.f32 %v5551_v28, %v2166_v19  ;;  %v6412_v19 = vld [vmem:[#allocation11 + $0x150] sm:$0xff]  }
 0x21e   : > { %v5446_v14 = vpop.f32.mrb[84].mxu0  ;;  %5876 = vmatprep.subr.bf16.mxu1 %v6412_v19 }
 0x21f   : > { %v5552_v15 = vpop.f32.mrb[80].mxu1  ;;  %v5447_v36 = vpop.f32.mrb[85].mxu0  ;;  %5877 = vmatpush3.bf16.msra.mxu1 %v6413_v21 }
 0x220   : > { %v5553_v38 = vpop.f32.mrb[81].mxu1  ;;  %v5448_v12 = vadd.f32 %v5447_v36, %v5446_v14  ;;  %v5449_v47 = vpop.f32.mrb[86].mxu0 }
 0x221   : > { %v5554_v7 = vadd.f32 %v5553_v38, %v5552_v15  ;;  %v5555_v63 = vpop.f32.mrb[82].mxu1  ;;  %v5450_v3 = vpop.f32.mrb[87].mxu0 }
 0x222   : > { %v5556_v9 = vpop.f32.mrb[83].mxu1  ;;  %v2179_v10 = vadd.f32 %v5448_v12, %v7236_v25  ;;  %v5451_v1 = vadd.f32 %v5450_v3, %v5449_v47 }
 0x223   : > { %v5557_v20 = vadd.f32 %v5556_v9, %v5555_v63  ;;  %v7329_v22 = vadd.f32 %v5554_v7, %v2171_v54 }
 0x224   : > { %v2182_v29 = vadd.f32 %v5451_v1, %v7238_v58 }
 0x225   : > { %v7332_v8 = vadd.f32 %v5557_v20, %v2174_v59 }
 0x226   : > { %v5452_v17 = vpop.f32.mrb[88].mxu0 }
 0x227   : > { %v5558_v18 = vpop.f32.mrb[84].mxu1  ;;  %v5453_v37 = vpop.f32.mrb[89].mxu0 }
 0x228   : > { %v5559_v50 = vpop.f32.mrb[85].mxu1  ;;  %v5454_v57 = vadd.f32 %v5453_v37, %v5452_v17  ;;  %v5455_v4 = vpop.f32.mrb[90].mxu0  ;;  %v6415_v17 = vld [vmem:[#allocation11 + $0x118] sm:$0xff]  }
 0x229   : > { %v5560_v16 = vadd.f32 %v5559_v50, %v5558_v18  ;;  %v5561_v33 = vpop.f32.mrb[86].mxu1  ;;  %v5456_v25 = vpop.f32.mrb[91].mxu0 }
 0x22a   : > { %v5562_v41 = vpop.f32.mrb[87].mxu1  ;;  %v2187_v44 = vadd.f32 %v5454_v57, %v7242_v51  ;;  %v5457_v13 = vadd.f32 %v5456_v25, %v5455_v4 }
 0x22b   : > { %v5563_v58 = vadd.f32 %v5562_v41, %v5561_v33  ;;  %v7335_v61 = vadd.f32 %v5560_v16, %v2179_v10 }
 0x22c   : > { %v2190_v54 = vadd.f32 %v5457_v13, %v7244_v46 }
 0x22d   : > { %v7338_v45 = vadd.f32 %v5563_v58, %v2182_v29  ;;  %v6414_v29 = vld [vmem:[#allocation11 + $0x158] sm:$0xff]  }
 0x22e   : > { %v5458_v28 = vpop.f32.mrb[92].mxu0  ;;  %5878 = vmatprep.subr.bf16.mxu1 %v6414_v29 }
 0x22f   : > { %v5564_v59 = vpop.f32.mrb[88].mxu1  ;;  %v5459_v14 = vpop.f32.mrb[93].mxu0  ;;  %5879 = vmatpush3.bf16.msra.mxu1 %v6415_v17 }
 0x230   : > { %v5565_v15 = vpop.f32.mrb[89].mxu1  ;;  %v5460_v36 = vadd.f32 %v5459_v14, %v5458_v28  ;;  %v5461_v38 = vpop.f32.mrb[94].mxu0 }
 0x231   : > { %v5566_v12 = vadd.f32 %v5565_v15, %v5564_v59  ;;  %v5567_v47 = vpop.f32.mrb[90].mxu1  ;;  %v5462_v7 = vpop.f32.mrb[95].mxu0 }
 0x232   : > { %v5568_v63 = vpop.f32.mrb[91].mxu1  ;;  %v2195_v51 = vadd.f32 %v5460_v36, %v7248_v60  ;;  %v5463_v3 = vadd.f32 %v5462_v7, %v5461_v38 }
 0x233   : > { %v5569_v9 = vadd.f32 %v5568_v63, %v5567_v47  ;;  %v7341_v10 = vadd.f32 %v5566_v12, %v2187_v44 }
 0x234   : > { %v2198_v46 = vadd.f32 %v5463_v3, %v7250_v40  ;;  %v6416_v40 = vld [vmem:[#allocation11 + $0x1c0] sm:$0xff]  }
 0x235   : > { %v7344_v1 = vadd.f32 %v5569_v9, %v2190_v54  ;;  %5984 = vmatprep.subr.bf16.mxu0 %v6416_v40  ;;  %v6419_v3 = vld [vmem:[#allocation11 + $0x120] sm:$0xff]  }
 0x236   : > { %v5464_v20 = vpop.f32.mrb[96].mxu0 }
 0x237   : > { %v5570_v19 = vpop.f32.mrb[92].mxu1  ;;  %v5465_v21 = vpop.f32.mrb[97].mxu0 }
 0x238   : > { %v5571_v18 = vpop.f32.mrb[93].mxu1  ;;  %v5466_v37 = vadd.f32 %v5465_v21, %v5464_v20  ;;  %v5467_v50 = vpop.f32.mrb[98].mxu0 }
 0x239   : > { %v5572_v57 = vadd.f32 %v5571_v18, %v5570_v19  ;;  %v5573_v4 = vpop.f32.mrb[94].mxu1  ;;  %v5468_v60 = vpop.f32.mrb[99].mxu0 }
 0x23a   : > { %v5574_v16 = vpop.f32.mrb[95].mxu1  ;;  %v2203_v33 = vadd.f32 %v5466_v37, %v7254_v43  ;;  %v5469_v25 = vadd.f32 %v5468_v60, %v5467_v50  ;;  %v6418_v43 = vld [vmem:[#allocation11 + $0x160] sm:$0xff]  }
 0x23b   : > { %v5575_v41 = vadd.f32 %v5574_v16, %v5573_v4  ;;  %v7347_v44 = vadd.f32 %v5572_v57, %v2195_v51  ;;  %5880 = vmatprep.subr.bf16.mxu1 %v6418_v43 }
 0x23c   : > { %v2206_v13 = vadd.f32 %v5469_v25, %v7256_v53  ;;  %5881 = vmatpush3.bf16.msra.mxu1 %v6419_v3 }
 0x23d   : > { %v7350_v58 = vadd.f32 %v5575_v41, %v2198_v46 }
 0x23e   : > { %v5470_v54 = vpop.f32.mrb[100].mxu0 }
 0x23f   : > { %v5576_v28 = vpop.f32.mrb[96].mxu1  ;;  %v5471_v59 = vpop.f32.mrb[101].mxu0 }
 0x240   : > { %v5577_v14 = vpop.f32.mrb[97].mxu1  ;;  %v5472_v15 = vadd.f32 %v5471_v59, %v5470_v54  ;;  %v5473_v36 = vpop.f32.mrb[102].mxu0 }
 0x241   : > { %v5578_v38 = vadd.f32 %v5577_v14, %v5576_v28  ;;  %v5579_v12 = vpop.f32.mrb[98].mxu1  ;;  %v5474_v47 = vpop.f32.mrb[103].mxu0 }
 0x242   : > { %v5580_v7 = vpop.f32.mrb[99].mxu1  ;;  %v2211_v63 = vadd.f32 %v5472_v15, %v7260_v0  ;;  %v5475_v51 = vadd.f32 %v5474_v47, %v5473_v36 }
 0x243   : > { %v5581_v9 = vadd.f32 %v5580_v7, %v5579_v12  ;;  %v7353_v53 = vadd.f32 %v5578_v38, %v2203_v33  ;;  %v6422_v12 = vld [vmem:[#allocation11 + $0x168] sm:$0xff]  }
 0x244   : > { %v2214_v46 = vadd.f32 %v5475_v51, %v7262_v62  ;;  %v6423_v7 = vld [vmem:[#allocation11 + $0x128] sm:$0xff]   ;;  %5882 = vmatprep.subr.bf16.mxu1 %v6422_v12 }
 0x245   : > { %v7356_v20 = vadd.f32 %v5581_v9, %v2206_v13  ;;  %5883 = vmatpush3.bf16.msra.mxu1 %v6423_v7 }
 0x246   : > { %v5476_v29 = vpop.f32.mrb[104].mxu0 }
 0x247   : > { %v5582_v17 = vpop.f32.mrb[100].mxu1  ;;  %v5477_v19 = vpop.f32.mrb[105].mxu0 }
 0x248   : > { %v5583_v21 = vpop.f32.mrb[101].mxu1  ;;  %v5478_v18 = vadd.f32 %v5477_v19, %v5476_v29  ;;  %v5479_v37 = vpop.f32.mrb[106].mxu0 }
 0x249   : > { %v5584_v50 = vadd.f32 %v5583_v21, %v5582_v17  ;;  %v5585_v57 = vpop.f32.mrb[102].mxu1  ;;  %v5480_v0 = vpop.f32.mrb[107].mxu0 }
 0x24a   : > { %v5586_v4 = vpop.f32.mrb[103].mxu1  ;;  %v2219_v60 = vadd.f32 %v5478_v18, %v7266_v42  ;;  %v5481_v16 = vadd.f32 %v5480_v0, %v5479_v37 }
 0x24b   : > { %v5587_v33 = vadd.f32 %v5586_v4, %v5585_v57  ;;  %v7359_v25 = vadd.f32 %v5584_v50, %v2211_v63 }
 0x24c   : > { %v2222_v62 = vadd.f32 %v5481_v16, %v7269_v49 }
 0x24d   : > { %v7362_v40 = vadd.f32 %v5587_v33, %v2214_v46 }
 0x24e   : > { %v5482_v41 = vpop.f32.mrb[108].mxu0 }
 0x24f   : > { %v5588_v13 = vpop.f32.mrb[104].mxu1  ;;  %v5483_v54 = vpop.f32.mrb[109].mxu0 }
 0x250   : > { %v5589_v28 = vpop.f32.mrb[105].mxu1  ;;  %v5484_v59 = vadd.f32 %v5483_v54, %v5482_v41  ;;  %v5485_v14 = vpop.f32.mrb[110].mxu0 }
 0x251   : > { %v5590_v15 = vadd.f32 %v5589_v28, %v5588_v13  ;;  %v5591_v36 = vpop.f32.mrb[106].mxu1  ;;  %v5486_v38 = vpop.f32.mrb[111].mxu0 }
 0x252   : > { %v5592_v47 = vpop.f32.mrb[107].mxu1  ;;  %v2227_v42 = vadd.f32 %v5484_v59, %v7273_v34  ;;  %v5487_v43 = vadd.f32 %v5486_v38, %v5485_v14 }
 0x253   : > { %v5593_v63 = vadd.f32 %v5592_v47, %v5591_v36  ;;  %v7365_v51 = vadd.f32 %v5590_v15, %v2219_v60  ;;  %v6426_v36 = vld [vmem:[#allocation11 + $0x170] sm:$0xff]  }
 0x254   : > { %v2230_v49 = vadd.f32 %v5487_v43, %v7275_v55  ;;  %v6427_v47 = vld [vmem:[#allocation11 + $0x130] sm:$0xff]   ;;  %5884 = vmatprep.subr.bf16.mxu1 %v6426_v36 }
 0x255   : > { %v7368_v3 = vadd.f32 %v5593_v63, %v2222_v62  ;;  %5885 = vmatpush3.bf16.msra.mxu1 %v6427_v47 }
 0x256   : > { %v5488_v9 = vpop.f32.mrb[112].mxu0 }
 0x257   : > { %v5594_v46 = vpop.f32.mrb[108].mxu1  ;;  %v5489_v29 = vpop.f32.mrb[113].mxu0 }
 0x258   : > { %v5595_v17 = vpop.f32.mrb[109].mxu1  ;;  %v5490_v19 = vadd.f32 %v5489_v29, %v5488_v9  ;;  %v5491_v21 = vpop.f32.mrb[114].mxu0 }
 0x259   : > { %v5596_v18 = vadd.f32 %v5595_v17, %v5594_v46  ;;  %v5597_v37 = vpop.f32.mrb[110].mxu1  ;;  %v5492_v34 = vpop.f32.mrb[115].mxu0 }
 0x25a   : > { %v5598_v50 = vpop.f32.mrb[111].mxu1  ;;  %v2235_v57 = vadd.f32 %v5490_v19, %v7279_v27  ;;  %v5493_v0 = vadd.f32 %v5492_v34, %v5491_v21 }
 0x25b   : > { %v5599_v4 = vadd.f32 %v5598_v50, %v5597_v37  ;;  %v7371_v60 = vadd.f32 %v5596_v18, %v2227_v42 }
 0x25c   : > { %v2238_v55 = vadd.f32 %v5493_v0, %v7281_v35 }
 0x25d   : > { %v7374_v16 = vadd.f32 %v5599_v4, %v2230_v49 }
 0x25e   : > { %v5494_v33 = vpop.f32.mrb[116].mxu0 }
 0x25f   : > { %v5600_v62 = vpop.f32.mrb[112].mxu1  ;;  %v5495_v41 = vpop.f32.mrb[117].mxu0 }
 0x260   : > { %v5601_v13 = vpop.f32.mrb[113].mxu1  ;;  %v5496_v54 = vadd.f32 %v5495_v41, %v5494_v33  ;;  %v5497_v28 = vpop.f32.mrb[118].mxu0 }
 0x261   : > { %v5602_v59 = vadd.f32 %v5601_v13, %v5600_v62  ;;  %v5603_v14 = vpop.f32.mrb[114].mxu1  ;;  %v5498_v15 = vpop.f32.mrb[119].mxu0 }
 0x262   : > { %v5604_v38 = vpop.f32.mrb[115].mxu1  ;;  %v2243_v27 = vadd.f32 %v5496_v54, %v7285_v52  ;;  %v5499_v12 = vadd.f32 %v5498_v15, %v5497_v28 }
 0x263   : > { %v5605_v42 = vadd.f32 %v5604_v38, %v5603_v14  ;;  %v7377_v43 = vadd.f32 %v5602_v59, %v2235_v57  ;;  %v6430_v14 = vld [vmem:[#allocation11 + $0x178] sm:$0xff]  }
 0x264   : > { %v2246_v35 = vadd.f32 %v5499_v12, %v7287_v11  ;;  %v6431_v38 = vld [vmem:[#allocation11 + $0x138] sm:$0xff]   ;;  %5886 = vmatprep.subr.bf16.mxu1 %v6430_v14 }
 0x265   : > { %v7380_v7 = vadd.f32 %v5605_v42, %v2238_v55  ;;  %5887 = vmatpush3.bf16.msra.mxu1 %v6431_v38 }
 0x266   : > { %v5500_v63 = vpop.f32.mrb[120].mxu0 }
 0x267   : > { %v5606_v49 = vpop.f32.mrb[116].mxu1  ;;  %v5501_v9 = vpop.f32.mrb[121].mxu0 }
 0x268   : > { %v5607_v46 = vpop.f32.mrb[117].mxu1  ;;  %v5502_v29 = vadd.f32 %v5501_v9, %v5500_v63  ;;  %v5503_v17 = vpop.f32.mrb[122].mxu0 }
 0x269   : > { %v5608_v19 = vadd.f32 %v5607_v46, %v5606_v49  ;;  %v5609_v21 = vpop.f32.mrb[118].mxu1  ;;  %v5504_v52 = vpop.f32.mrb[123].mxu0 }
 0x26a   : > { %v5610_v18 = vpop.f32.mrb[119].mxu1  ;;  %v2251_v37 = vadd.f32 %v5502_v29, %v7291_v26  ;;  %v5505_v34 = vadd.f32 %v5504_v52, %v5503_v17 }
 0x26b   : > { %v5611_v50 = vadd.f32 %v5610_v18, %v5609_v21  ;;  %v7383_v57 = vadd.f32 %v5608_v19, %v2243_v27 }
 0x26c   : > { %v2254_v11 = vadd.f32 %v5505_v34, %v7293_v39 }
 0x26d   : > { %v7386_v0 = vadd.f32 %v5611_v50, %v2246_v35 }
 0x26e   : > { %v5506_v4 = vpop.f32.mrb[124].mxu0 }
 0x26f   : > { %v5612_v55 = vpop.f32.mrb[120].mxu1  ;;  %v5507_v33 = vpop.f32.mrb[125].mxu0 }
 0x270   : > { %v5613_v62 = vpop.f32.mrb[121].mxu1  ;;  %v5508_v41 = vadd.f32 %v5507_v33, %v5506_v4  ;;  %v5509_v13 = vpop.f32.mrb[126].mxu0 }
 0x271   : > { %v5614_v54 = vadd.f32 %v5613_v62, %v5612_v55  ;;  %v5615_v28 = vpop.f32.mrb[122].mxu1  ;;  %v5510_v59 = vpop.f32.mrb[127].mxu0 }
 0x272   : > { %v5616_v15 = vpop.f32.mrb[123].mxu1  ;;  %v2259_v26 = vadd.f32 %v5508_v41, %v7298_v2  ;;  %v5511_v36 = vadd.f32 %v5510_v59, %v5509_v13  ;;  %v7405_v59 = vld [vmem:[#allocation11 + $0x200] sm:$0xff]  }
 0x273   : > { %v5617_v27 = vadd.f32 %v5616_v15, %v5615_v28  ;;  %v7389_v12 = vadd.f32 %v5614_v54, %v2251_v37  ;;  %6168 = vmatprep.subr.bf16.mxu1 %v7405_v59 }
 0x274   : > { %v2262_v39 = vadd.f32 %v5511_v36, %v7301_v56  ;;  %v2781_v36 = vld [vmem:[#allocation3 + $0xa] sm:$0xff] }
 0x275   : > { %v7392_v47 = vadd.f32 %v5617_v27, %v2254_v11 }
 0x276   : > { %v6138_v42 = vpop.f32.mrb[128].mxu0 }
 0x277   : > { %v5618_v35 = vpop.f32.mrb[124].mxu1  ;;  %v2469_v63 = vadd.f32 %v6138_v42, %v7311_v6  ;;  %v2460_v49 = vpop.f32.mrb[129].mxu0 }
 0x278   : > { %v5619_v9 = vpop.f32.mrb[125].mxu1  ;;  %v2461_v46 = vadd.f32 %v2460_v49, %v7304_v48  ;;  %v6139_v2 = vpop.f32.mrb[130].mxu0 }
 0x279   : > { %v5620_v29 = vadd.f32 %v5619_v9, %v5618_v35  ;;  %v5621_v17 = vpop.f32.mrb[126].mxu1  ;;  %v2589_v19 = vmax.f32 %v2469_v63, 0.0  ;;  %v2472_v21 = vadd.f32 %v6139_v2, %v7314_v32  ;;  %v2463_v52 = vpop.f32.mrb[131].mxu0 }
 0x27a   : > { %v5622_v18 = vpop.f32.mrb[127].mxu1  ;;  %v2587_v56 = vmax.f32 %v2461_v46, 0.0  ;;  %v2464_v37 = vadd.f32 %v2463_v52, %v7308_v30 }
 0x27b   : > { %v5623_v34 = vadd.f32 %v5622_v18, %v5621_v17  ;;  %2622 = vst [vmem:[#allocation3 + $0x31] sm:$0xff] %v2589_v19  ;;  %v2590_v50 = vmax.f32 %v2472_v21, 0.0  ;;  %v7398_v11 = vadd.f32 %v5620_v29, %v2259_v26  ;;  %v2780_v26 = vld [vmem:[#allocation3 + $0x2] sm:$0xff]  ;;  %v6420_v29 = vld [vmem:[#allocation11 + $0x1c8] sm:$0xff]  }
 0x27c   : > { %2620 = vst [vmem:[#allocation3 + $0x19] sm:$0xff] %v2587_v56  ;;  %v2588_v6 = vmax.f32 %v2464_v37, 0.0 }
 0x27d   : > { %2623 = vst [vmem:[#allocation3 + $0x39] sm:$0xff] %v2590_v50  ;;  %v2750_v48 = vpack.c.bf16 %v2590_v50, %v2589_v19  ;;  %v7400_v4 = vadd.f32 %v5623_v34, %v2262_v39  ;;  %v2812_v39 = vpack.c.bf16 %v2781_v36, %v2780_v26  ;;  %v6424_v50 = vld [vmem:[#allocation11 + $0x1d0] sm:$0xff]  }
 0x27e   : > { %2621 = vst [vmem:[#allocation3 + $0x21] sm:$0xff] %v2588_v6  ;;  %v6142_v55 = vpop.f32.mrb[132].mxu0  ;;  %v2749_v33 = vpack.c.bf16 %v2588_v6, %v2587_v56 }
 0x27f   : > { %v2485_v32 = vadd.f32 %v6142_v55, %v7323_v23  ;;  %v2476_v62 = vpop.f32.mrb[133].mxu0 }
 0x280   : > { %v2477_v41 = vadd.f32 %v2476_v62, %v7317_v31  ;;  %v6143_v30 = vpop.f32.mrb[134].mxu0  ;;  %3996 = vmatprep.mubr.bf16.mxu1 %v2749_v33 }
 0x281   : > { %v2593_v13 = vmax.f32 %v2485_v32, 0.0  ;;  %v2488_v54 = vadd.f32 %v6143_v30, %v7326_v5  ;;  %v2479_v28 = vpop.f32.mrb[135].mxu0 }
 0x282   : > { %v2591_v14 = vmax.f32 %v2477_v41, 0.0  ;;  %v2480_v15 = vadd.f32 %v2479_v28, %v7320_v24  ;;  %v6417_v24 = vld [vmem:[#allocation11 + $0x180] sm:$0xff]   ;;  %v6428_v28 = vld [vmem:[#allocation11 + $0x1d8] sm:$0xff]  }
 0x283   : > { %2626 = vst [vmem:[#allocation3 + $0x61] sm:$0xff] %v2593_v13  ;;  %v2594_v38 = vmax.f32 %v2488_v54, 0.0  ;;  %v2844_v31 = vld [vmem:[#allocation3 + $0x18] sm:$0xff]  ;;  %v2846_v2 = vld [vmem:[#allocation3 + $0x30] sm:$0xff] }
 0x284   : > { %2624 = vst [vmem:[#allocation3 + $0x49] sm:$0xff] %v2591_v14  ;;  %v2592_v23 = vmax.f32 %v2480_v15, 0.0  ;;  %v2847_v42 = vld [vmem:[#allocation3 + $0x38] sm:$0xff] }
 0x285   : > { %2627 = vst [vmem:[#allocation3 + $0x69] sm:$0xff] %v2594_v38  ;;  %v2845_v27 = vld [vmem:[#allocation3 + $0x20] sm:$0xff]  ;;  %v7409_v5 = vpack.c.bf16 %v2594_v38, %v2593_v13  ;;  %v7413_v21 = vpack.c.bf16 %v2847_v42, %v2846_v2 }
 0x286   : > { %2625 = vst [vmem:[#allocation3 + $0x51] sm:$0xff] %v2592_v23  ;;  %v6146_v35 = vpop.f32.mrb[136].mxu0  ;;  %v2876_v63 = vpack.c.bf16 %v2845_v27, %v2844_v31  ;;  %v2751_v49 = vpack.c.bf16 %v2592_v23, %v2591_v14  ;;  %v2782_v55 = vld [vmem:[#allocation3 + $0x1a] sm:$0xff]  ;;  %v2783_v33 = vld [vmem:[#allocation3 + $0x22] sm:$0xff] }
 0x287   : > { %v2501_v9 = vadd.f32 %v6146_v35, %v7335_v61  ;;  %v2492_v46 = vpop.f32.mrb[137].mxu0  ;;  %v6421_v61 = vld [vmem:[#allocation11 + $0x188] sm:$0xff]   ;;  %v7423_v13 = vpack.c.bf16 %v2783_v33, %v2782_v55  ;;  %v6429_v27 = vld [vmem:[#allocation11 + $0x198] sm:$0xff]  }
 0x288   : > { %v2493_v17 = vadd.f32 %v2492_v46, %v7329_v22  ;;  %v6147_v19 = vpop.f32.mrb[138].mxu0  ;;  %4149 = vmatprep.mubr.bf16.mxu0 %v2876_v63  ;;  %3997 = vmatmul.mubr.bf16.gmra.mrb[132].mxu1 %v2876_v63  ;;  %v2784_v35 = vld [vmem:[#allocation3 + $0x32] sm:$0xff]  ;;  %v2785_v63 = vld [vmem:[#allocation3 + $0x3a] sm:$0xff] }
 0x289   : > { %v2597_v52 = vmax.f32 %v2501_v9, 0.0  ;;  %v2504_v18 = vadd.f32 %v6147_v19, %v7338_v45  ;;  %v2495_v56 = vpop.f32.mrb[139].mxu0  ;;  %4150 = vmatmul.mubr.bf16.vlgmr.msra.gmra.mrb[160].mxu0 %v2812_v39  ;;  %4004 = vmatprep.mubr.bf16.mxu1 %v2750_v48  ;;  %v6432_v39 = vld [vmem:[#allocation11 + $0x1e0] sm:$0xff]   ;;  %v6434_v19 = vld [vmem:[#allocation11 + $0x1e8] sm:$0xff]  }
 0x28a   : > { %v2595_v37 = vmax.f32 %v2493_v17, 0.0  ;;  %v2496_v34 = vadd.f32 %v2495_v56, %v7332_v8  ;;  %4157 = vmatprep.mubr.bf16.mxu0 %v7413_v21  ;;  %5985 = vmatpush3.bf16.msra.mxu0 %v6417_v24  ;;  %v6425_v8 = vld [vmem:[#allocation11 + $0x190] sm:$0xff]  }
 0x28b   : > { %2630 = vst [vmem:[#allocation3 + $0x91] sm:$0xff] %v2597_v52  ;;  %v2598_v22 = vmax.f32 %v2504_v18, 0.0  ;;  %5986 = vmatprep.subr.bf16.mxu0 %v6420_v29  ;;  %v2848_v54 = vld [vmem:[#allocation3 + $0x48] sm:$0xff]  ;;  %v7438_v29 = vpack.c.bf16 %v2785_v63, %v2784_v35  ;;  %v2850_v17 = vld [vmem:[#allocation3 + $0x60] sm:$0xff] }
 0x28c   : > { %2628 = vst [vmem:[#allocation3 + $0x79] sm:$0xff] %v2595_v37  ;;  %v2596_v6 = vmax.f32 %v2496_v34, 0.0  ;;  %v2789_v35 = vld [vmem:[#allocation3 + $0x6a] sm:$0xff] }
 0x28d   : > { %2631 = vst [vmem:[#allocation3 + $0x99] sm:$0xff] %v2598_v22  ;;  %v2849_v45 = vld [vmem:[#allocation3 + $0x50] sm:$0xff]  ;;  %v7418_v32 = vpack.c.bf16 %v2598_v22, %v2597_v52 }
 0x28e   : > { %2629 = vst [vmem:[#allocation3 + $0x81] sm:$0xff] %v2596_v6  ;;  %v6150_v48 = vpop.f32.mrb[140].mxu0  ;;  %v7420_v62 = vpack.c.bf16 %v2596_v6, %v2595_v37  ;;  %5987 = vmatpush3.bf16.msra.mxu0 %v6421_v61  ;;  %v7427_v26 = vpack.c.bf16 %v2849_v45, %v2848_v54  ;;  %v6436_v6 = vld [vmem:[#allocation11 + $0x1f0] sm:$0xff]   ;;  %v2786_v33 = vld [vmem:[#allocation3 + $0x4a] sm:$0xff] }
 0x28f   : > { %v2517_v41 = vadd.f32 %v6150_v48, %v7347_v44  ;;  %v2508_v30 = vpop.f32.mrb[141].mxu0  ;;  %5988 = vmatprep.subr.bf16.mxu0 %v6424_v50 }
 0x290   : > { %v2509_v14 = vadd.f32 %v2508_v30, %v7341_v10  ;;  %v6151_v15 = vpop.f32.mrb[142].mxu0  ;;  %4005 = vmatmul.mubr.bf16.gmra.mrb[136].mxu1 %v7413_v21 }
 0x291   : > { %v2601_v36 = vmax.f32 %v2517_v41, 0.0  ;;  %v2520_v38 = vadd.f32 %v6151_v15, %v7350_v58  ;;  %v2511_v23 = vpop.f32.mrb[143].mxu0  ;;  %4158 = vmatmul.mubr.bf16.gmra.mrb[164].mxu0 %v7423_v13  ;;  %4012 = vmatprep.mubr.bf16.mxu1 %v2751_v49  ;;  %v2851_v58 = vld [vmem:[#allocation3 + $0x68] sm:$0xff] }
 0x292   : > { %v2599_v44 = vmax.f32 %v2509_v14, 0.0  ;;  %v2512_v31 = vadd.f32 %v2511_v23, %v7344_v1  ;;  %4165 = vmatprep.mubr.bf16.mxu0 %v7427_v26  ;;  %5989 = vmatpush3.bf16.msra.mxu0 %v6425_v8  ;;  %v6433_v1 = vld [vmem:[#allocation11 + $0x1a0] sm:$0xff]   ;;  %v7442_v56 = vpack.c.bf16 %v2851_v58, %v2850_v17  ;;  %v6439_v14 = vld [vmem:[#allocation11 + $0x1f8] sm:$0xff]  }
 0x293   : > { %2634 = vst [vmem:[#allocation3 + $0xc1] sm:$0xff] %v2601_v36  ;;  %v2602_v10 = vmax.f32 %v2520_v38, 0.0  ;;  %5990 = vmatprep.subr.bf16.mxu0 %v6428_v28  ;;  %v2852_v28 = vld [vmem:[#allocation3 + $0x78] sm:$0xff] }
 0x294   : > { %2632 = vst [vmem:[#allocation3 + $0xa9] sm:$0xff] %v2599_v44  ;;  %v2600_v42 = vmax.f32 %v2512_v31, 0.0 }
 0x295   : > { %2635 = vst [vmem:[#allocation3 + $0xc9] sm:$0xff] %v2602_v10  ;;  %v7433_v24 = vpack.c.bf16 %v2602_v10, %v2601_v36  ;;  %v2853_v45 = vld [vmem:[#allocation3 + $0x80] sm:$0xff] }
 0x296   : > { %2633 = vst [vmem:[#allocation3 + $0xb1] sm:$0xff] %v2600_v42  ;;  %v6154_v49 = vpop.f32.mrb[144].mxu0  ;;  %v7435_v9 = vpack.c.bf16 %v2600_v42, %v2599_v44  ;;  %5991 = vmatpush3.bf16.msra.mxu0 %v6429_v27  ;;  %v7458_v38 = vpack.c.bf16 %v2853_v45, %v2852_v28  ;;  %v2788_v42 = vld [vmem:[#allocation3 + $0x62] sm:$0xff] }
 0x297   : > { %v2533_v46 = vadd.f32 %v6154_v49, %v7359_v25  ;;  %v2524_v2 = vpop.f32.mrb[145].mxu0  ;;  %5992 = vmatprep.subr.bf16.mxu0 %v6432_v39 }
 0x298   : > { %v2525_v52 = vadd.f32 %v2524_v2, %v7353_v53  ;;  %v6155_v18 = vpop.f32.mrb[146].mxu0  ;;  %4013 = vmatmul.mubr.bf16.gmra.mrb[140].mxu1 %v7427_v26  ;;  %v6435_v53 = vld [vmem:[#allocation11 + $0x1a8] sm:$0xff]  }
 0x299   : > { %v2605_v37 = vmax.f32 %v2533_v46, 0.0  ;;  %v2536_v34 = vadd.f32 %v6155_v18, %v7362_v40  ;;  %v2527_v61 = vpop.f32.mrb[147].mxu0  ;;  %4166 = vmatmul.mubr.bf16.gmra.mrb[168].mxu0 %v7438_v29  ;;  %4020 = vmatprep.mubr.bf16.mxu1 %v7409_v5  ;;  %v2787_v40 = vld [vmem:[#allocation3 + $0x52] sm:$0xff] }
 0x29a   : > { %v2603_v25 = vmax.f32 %v2525_v52, 0.0  ;;  %v2528_v22 = vadd.f32 %v2527_v61, %v7356_v20  ;;  %4173 = vmatprep.mubr.bf16.mxu0 %v7442_v56  ;;  %5993 = vmatpush3.bf16.msra.mxu0 %v6433_v1  ;;  %v6438_v20 = vld [vmem:[#allocation11 + $0x1b0] sm:$0xff]   ;;  %v7454_v54 = vpack.c.bf16 %v2787_v40, %v2786_v33  ;;  %v7470_v1 = vpack.c.bf16 %v2789_v35, %v2788_v42  ;;  %v2854_v46 = vld [vmem:[#allocation3 + $0x90] sm:$0xff] }
 0x29b   : > { %2638 = vst [vmem:[#allocation3 + $0xf1] sm:$0xff] %v2605_v37  ;;  %v2606_v50 = vmax.f32 %v2536_v34, 0.0  ;;  %5994 = vmatprep.subr.bf16.mxu0 %v6434_v19  ;;  %v2856_v33 = vld [vmem:[#allocation3 + $0xa8] sm:$0xff] }
 0x29c   : > { %2636 = vst [vmem:[#allocation3 + $0xd9] sm:$0xff] %v2603_v25  ;;  %v2604_v55 = vmax.f32 %v2528_v22, 0.0  ;;  %v2791_v22 = vld [vmem:[#allocation3 + $0x82] sm:$0xff] }
 0x29d   : > { %2639 = vst [vmem:[#allocation3 + $0xf9] sm:$0xff] %v2606_v50  ;;  %v7449_v48 = vpack.c.bf16 %v2606_v50, %v2605_v37  ;;  %v2796_v42 = vld [vmem:[#allocation3 + $0xc2] sm:$0xff] }
 0x29e   : > { %2637 = vst [vmem:[#allocation3 + $0xe1] sm:$0xff] %v2604_v55  ;;  %v6158_v5 = vpop.f32.mrb[148].mxu0  ;;  %v7451_v8 = vpack.c.bf16 %v2604_v55, %v2603_v25  ;;  %5995 = vmatpush3.bf16.msra.mxu0 %v6435_v53  ;;  %v2790_v25 = vld [vmem:[#allocation3 + $0x7a] sm:$0xff]  ;;  %v2857_v53 = vld [vmem:[#allocation3 + $0xb0] sm:$0xff] }
 0x29f   : > { %v2549_v41 = vadd.f32 %v6158_v5, %v7371_v60  ;;  %v2540_v30 = vpop.f32.mrb[149].mxu0  ;;  %5996 = vmatprep.subr.bf16.mxu0 %v6436_v6  ;;  %v7490_v5 = vpack.c.bf16 %v2857_v53, %v2856_v33 }
 0x2a0   : > { %v2541_v15 = vadd.f32 %v2540_v30, %v7365_v51  ;;  %v6159_v36 = vpop.f32.mrb[150].mxu0  ;;  %4021 = vmatmul.mubr.bf16.gmra.mrb[144].mxu1 %v7442_v56  ;;  %v6440_v51 = vld [vmem:[#allocation11 + $0x1b8] sm:$0xff]  }
 0x2a1   : > { %v2609_v23 = vmax.f32 %v2549_v41, 0.0  ;;  %v2552_v44 = vadd.f32 %v6159_v36, %v7374_v16  ;;  %v2543_v31 = vpop.f32.mrb[151].mxu0  ;;  %4174 = vmatmul.mubr.bf16.gmra.mrb[172].mxu0 %v7454_v54  ;;  %4028 = vmatprep.mubr.bf16.mxu1 %v7420_v62  ;;  %v2855_v16 = vld [vmem:[#allocation3 + $0x98] sm:$0xff] }
 0x2a2   : > { %v2607_v60 = vmax.f32 %v2541_v15, 0.0  ;;  %v2544_v27 = vadd.f32 %v2543_v31, %v7368_v3  ;;  %4181 = vmatprep.mubr.bf16.mxu0 %v7458_v38  ;;  %5997 = vmatpush3.bf16.msra.mxu0 %v6438_v20  ;;  %v7474_v19 = vpack.c.bf16 %v2855_v16, %v2854_v46  ;;  %v2792_v15 = vld [vmem:[#allocation3 + $0x92] sm:$0xff]  ;;  %v2793_v36 = vld [vmem:[#allocation3 + $0x9a] sm:$0xff] }
 0x2a3   : > { %2642 = vst [vmem:[#allocation3 + $0x121] sm:$0xff] %v2609_v23  ;;  %v2610_v10 = vmax.f32 %v2552_v44, 0.0  ;;  %5998 = vmatprep.subr.bf16.mxu0 %v6439_v14  ;;  %v7499_v44 = vpack.c.bf16 %v2793_v36, %v2792_v15  ;;  %v2858_v31 = vld [vmem:[#allocation3 + $0xc0] sm:$0xff] }
 0x2a4   : > { %2640 = vst [vmem:[#allocation3 + $0x109] sm:$0xff] %v2607_v60  ;;  %v2608_v39 = vmax.f32 %v2544_v27, 0.0  ;;  %v2863_v35 = vld [vmem:[#allocation3 + $0xf8] sm:$0xff] }
 0x2a5   : > { %2643 = vst [vmem:[#allocation3 + $0x129] sm:$0xff] %v2610_v10  ;;  %v7465_v63 = vpack.c.bf16 %v2610_v10, %v2609_v23  ;;  %v2859_v23 = vld [vmem:[#allocation3 + $0xc8] sm:$0xff]  ;;  %v2861_v27 = vld [vmem:[#allocation3 + $0xe0] sm:$0xff]  ;;  %v2860_v10 = vld [vmem:[#allocation3 + $0xd8] sm:$0xff] }
 0x2a6   : > { %2641 = vst [vmem:[#allocation3 + $0x111] sm:$0xff] %v2608_v39  ;;  %v6162_v62 = vpop.f32.mrb[152].mxu0  ;;  %v7467_v58 = vpack.c.bf16 %v2608_v39, %v2607_v60  ;;  %5999 = vmatpush3.bf16.msra.mxu0 %v6440_v51  ;;  %v2795_v60 = vld [vmem:[#allocation3 + $0xb2] sm:$0xff]  ;;  %v7510_v39 = vpack.c.bf16 %v2861_v27, %v2860_v10 }
 0x2a7   : > { %v2565_v3 = vadd.f32 %v6162_v62, %v7383_v57  ;;  %v2556_v49 = vpop.f32.mrb[153].mxu0  ;;  %v2862_v62 = vld [vmem:[#allocation3 + $0xf0] sm:$0xff] }
 0x2a8   : > { %v2557_v2 = vadd.f32 %v2556_v49, %v7377_v43  ;;  %v6163_v17 = vpop.f32.mrb[154].mxu0  ;;  %4029 = vmatmul.mubr.bf16.gmra.mrb[148].mxu1 %v7458_v38  ;;  %v2798_v49 = vld [vmem:[#allocation3 + $0xda] sm:$0xff] }
 0x2a9   : > { %v2613_v52 = vmax.f32 %v2565_v3, 0.0  ;;  %v2568_v18 = vadd.f32 %v6163_v17, %v7386_v0  ;;  %v2559_v37 = vpop.f32.mrb[155].mxu0  ;;  %4182 = vmatmul.mubr.bf16.gmra.mrb[176].mxu0 %v7470_v1  ;;  %4036 = vmatprep.mubr.bf16.mxu1 %v7418_v32  ;;  %v7518_v3 = vpack.c.bf16 %v2863_v35, %v2862_v62  ;;  %v2908_v62 = vld [vmem:[#allocation3 + $0x19] sm:$0xff] }
 0x2aa   : > { %v2611_v57 = vmax.f32 %v2557_v2, 0.0  ;;  %v2560_v34 = vadd.f32 %v2559_v37, %v7380_v7  ;;  %4189 = vmatprep.mubr.bf16.mxu0 %v7474_v19  ;;  %v7486_v7 = vpack.c.bf16 %v2791_v22, %v2790_v25 }
 0x2ab   : > { %2646 = vst [vmem:[#allocation3 + $0x151] sm:$0xff] %v2613_v52  ;;  %v2614_v43 = vmax.f32 %v2568_v18, 0.0  ;;  %v2864_v17 = vld [vmem:[#allocation3 + $0x108] sm:$0xff]  ;;  %v2800_v18 = vld [vmem:[#allocation3 + $0xf2] sm:$0xff] }
 0x2ac   : > { %2644 = vst [vmem:[#allocation3 + $0x139] sm:$0xff] %v2611_v57  ;;  %v2612_v61 = vmax.f32 %v2560_v34, 0.0  ;;  %v2867_v37 = vld [vmem:[#allocation3 + $0x128] sm:$0xff]  ;;  %v2866_v34 = vld [vmem:[#allocation3 + $0x120] sm:$0xff] }
 0x2ad   : > { %2647 = vst [vmem:[#allocation3 + $0x159] sm:$0xff] %v2614_v43  ;;  %v7481_v50 = vpack.c.bf16 %v2614_v43, %v2613_v52  ;;  %v2865_v46 = vld [vmem:[#allocation3 + $0x110] sm:$0xff] }
 0x2ae   : > { %2645 = vst [vmem:[#allocation3 + $0x141] sm:$0xff] %v2612_v61  ;;  %v6166_v0 = vpop.f32.mrb[156].mxu0  ;;  %v7483_v6 = vpack.c.bf16 %v2612_v61, %v2611_v57  ;;  %v7526_v52 = vpack.c.bf16 %v2865_v46, %v2864_v17  ;;  %v7534_v61 = vpack.c.bf16 %v2867_v37, %v2866_v34  ;;  %v3101_v17 = vld [vmem:[#allocation3 + $0x31] sm:$0xff]  ;;  %v3103_v34 = vld [vmem:[#allocation3 + $0x49] sm:$0xff] }
 0x2af   : > { %v2581_v32 = vadd.f32 %v6166_v0, %v7398_v11  ;;  %v2572_v55 = vpop.f32.mrb[157].mxu0  ;;  %v3104_v37 = vld [vmem:[#allocation3 + $0x51] sm:$0xff] }
 0x2b0   : > { %v2573_v40 = vadd.f32 %v2572_v55, %v7389_v12  ;;  %v6167_v45 = vpop.f32.mrb[158].mxu0  ;;  %4037 = vmatmul.mubr.bf16.gmra.mrb[152].mxu1 %v7474_v19  ;;  %v2803_v55 = vld [vmem:[#allocation3 + $0x112] sm:$0xff] }
 0x2b1   : > { %v2617_v20 = vmax.f32 %v2581_v32, 0.0  ;;  %v2584_v41 = vadd.f32 %v6167_v45, %v7400_v4  ;;  %v2575_v30 = vpop.f32.mrb[159].mxu0  ;;  %4190 = vmatmul.mubr.bf16.gmra.mrb[180].mxu0 %v7486_v7  ;;  %4044 = vmatprep.mubr.bf16.mxu1 %v7435_v9  ;;  %v7502_v9 = vpack.c.bf16 %v2859_v23, %v2858_v31  ;;  %v2802_v32 = vld [vmem:[#allocation3 + $0x10a] sm:$0xff] }
 0x2b2   : > { %v2615_v11 = vmax.f32 %v2573_v40, 0.0  ;;  %v2576_v28 = vadd.f32 %v2575_v30, %v7392_v47  ;;  %4197 = vmatprep.mubr.bf16.mxu0 %v7490_v5  ;;  %v2794_v47 = vld [vmem:[#allocation3 + $0xaa] sm:$0xff]  ;;  %v7543_v40 = vpack.c.bf16 %v2803_v55, %v2802_v32  ;;  %v3107_v55 = vld [vmem:[#allocation3 + $0x79] sm:$0xff] }
 0x2b3   : > { %2650 = vst [vmem:[#allocation3 + $0x181] sm:$0xff] %v2617_v20  ;;  %v2618_v12 = vmax.f32 %v2584_v41, 0.0  ;;  %v7507_v51 = vpack.c.bf16 %v2795_v60, %v2794_v47  ;;  %v2868_v45 = vld [vmem:[#allocation3 + $0x138] sm:$0xff]  ;;  %v2805_v41 = vld [vmem:[#allocation3 + $0x12a] sm:$0xff] }
 0x2b4   : > { %2648 = vst [vmem:[#allocation3 + $0x169] sm:$0xff] %v2615_v11  ;;  %v2616_v14 = vmax.f32 %v2576_v28, 0.0  ;;  %v2871_v30 = vld [vmem:[#allocation3 + $0x158] sm:$0xff]  ;;  %v2870_v28 = vld [vmem:[#allocation3 + $0x150] sm:$0xff] }
 0x2b5   : > { %2651 = vst [vmem:[#allocation3 + $0x189] sm:$0xff] %v2618_v12  ;;  %v2869_v33 = vld [vmem:[#allocation3 + $0x140] sm:$0xff]  ;;  %v7554_v12 = vpack.c.bf16 %v2871_v30, %v2870_v28  ;;  %v2808_v47 = vld [vmem:[#allocation3 + $0x152] sm:$0xff]  ;;  %v3111_v30 = vld [vmem:[#allocation3 + $0xa9] sm:$0xff] }
 0x2b6   : > { %2649 = vst [vmem:[#allocation3 + $0x171] sm:$0xff] %v2616_v14  ;;  %v7497_v4 = vpack.c.bf16 %v2616_v14, %v2615_v11  ;;  %v7546_v20 = vpack.c.bf16 %v2869_v33, %v2868_v45  ;;  %v2806_v14 = vld [vmem:[#allocation3 + $0x13a] sm:$0xff]  ;;  %v6447_v33 = vld [vmem:[#allocation11 + $0x238] sm:$0xff]  }
 0x2b8   : > { %4045 = vmatmul.mubr.bf16.gmra.mrb[156].mxu1 %v7490_v5 }
 0x2b9   : > { %4198 = vmatmul.mubr.bf16.gmra.mrb[184].mxu0 %v7499_v44  ;;  %4052 = vmatprep.mubr.bf16.mxu1 %v7433_v24  ;;  %v2797_v24 = vld [vmem:[#allocation3 + $0xca] sm:$0xff] }
 0x2ba   : > { %4205 = vmatprep.mubr.bf16.mxu0 %v7502_v9  ;;  %v7515_v16 = vpack.c.bf16 %v2797_v24, %v2796_v42  ;;  %v2874_v10 = vld [vmem:[#allocation3 + $0x180] sm:$0xff] }
 0x2bb   : > { %v2872_v23 = vld [vmem:[#allocation3 + $0x168] sm:$0xff] }
 0x2bc   : > { %v2875_v60 = vld [vmem:[#allocation3 + $0x188] sm:$0xff] }
 0x2bd   : > { %v2873_v15 = vld [vmem:[#allocation3 + $0x170] sm:$0xff]  ;;  %v7570_v42 = vpack.c.bf16 %v2875_v60, %v2874_v10  ;;  %v2909_v24 = vld [vmem:[#allocation3 + $0x21] sm:$0xff] }
 0x2be   : > { %v7562_v31 = vpack.c.bf16 %v2873_v15, %v2872_v23  ;;  %v2811_v35 = vld [vmem:[#allocation3 + $0x172] sm:$0xff] }
 0x2c0   : > { %4053 = vmatmul.mubr.bf16.gmra.mrb[160].mxu1 %v7502_v9 }
 0x2c1   : > { %4206 = vmatmul.mubr.bf16.gmra.mrb[188].mxu0 %v7507_v51  ;;  %4060 = vmatprep.mubr.bf16.mxu1 %v7451_v8  ;;  %v2799_v8 = vld [vmem:[#allocation3 + $0xe2] sm:$0xff] }
 0x2c2   : > { %4213 = vmatprep.mubr.bf16.mxu0 %v7510_v39  ;;  %v7523_v2 = vpack.c.bf16 %v2799_v8, %v2798_v49  ;;  %v3102_v49 = vld [vmem:[#allocation3 + $0x39] sm:$0xff]  ;;  %v2940_v8 = vpack.c.bf16 %v2909_v24, %v2908_v62 }
 0x2c8   : > { %4061 = vmatmul.mubr.bf16.gmra.mrb[164].mxu1 %v7510_v39 }
 0x2c9   : > { %4214 = vmatmul.mubr.bf16.gmra.mrb[192].mxu0 %v7515_v16  ;;  %4068 = vmatprep.mubr.bf16.mxu1 %v7449_v48  ;;  %v2801_v48 = vld [vmem:[#allocation3 + $0xfa] sm:$0xff] }
 0x2ca   : > { %4221 = vmatprep.mubr.bf16.mxu0 %v7518_v3  ;;  %v7531_v57 = vpack.c.bf16 %v2801_v48, %v2800_v18  ;;  %v6441_v18 = vld [vmem:[#allocation11 + $0x208] sm:$0xff]   ;;  %v3133_v48 = vpack.c.bf16 %v3102_v49, %v3101_v17 }
 0x2cb   : > { %v3125_v17 = vld [vmem:[#allocation3 + $0x151] sm:$0xff] }
 0x2cf   : > { %v5664_v43 = vpop.f32.mrb[128].mxu1 }
 0x2d0   : > { %4069 = vmatmul.mubr.bf16.gmra.mrb[168].mxu1 %v7518_v3  ;;  %v5665_v25 = vpop.f32.mrb[129].mxu1 }
 0x2d1   : > { %4222 = vmatmul.mubr.bf16.gmra.mrb[196].mxu0 %v7523_v2  ;;  %4076 = vmatprep.mubr.bf16.mxu1 %v7467_v58  ;;  %v7538_v22 = vadd.f32 %v5665_v25, %v5664_v43  ;;  %v5667_v58 = vpop.f32.mrb[130].mxu1  ;;  %v6443_v43 = vld [vmem:[#allocation11 + $0x218] sm:$0xff]   ;;  %v3134_v25 = vpack.c.bf16 %v3104_v37, %v3103_v34 }
 0x2d2   : > { %4229 = vmatprep.mubr.bf16.mxu0 %v7526_v52  ;;  %v5668_v53 = vpop.f32.mrb[131].mxu1 }
 0x2d3   : > { %v7541_v0 = vadd.f32 %v5668_v53, %v5667_v58  ;;  %v3106_v58 = vld [vmem:[#allocation3 + $0x69] sm:$0xff]  ;;  %v6445_v53 = vld [vmem:[#allocation11 + $0x228] sm:$0xff]  }
 0x2d8   : > { %4077 = vmatmul.mubr.bf16.gmra.mrb[172].mxu1 %v7526_v52 }
 0x2d9   : > { %4230 = vmatmul.mubr.bf16.gmra.mrb[200].mxu0 %v7531_v57  ;;  %4084 = vmatprep.mubr.bf16.mxu1 %v7465_v63  ;;  %v2804_v63 = vld [vmem:[#allocation3 + $0x122] sm:$0xff] }
 0x2da   : > { %4237 = vmatprep.mubr.bf16.mxu0 %v7534_v61  ;;  %v7551_v11 = vpack.c.bf16 %v2805_v41, %v2804_v63  ;;  %v3112_v41 = vld [vmem:[#allocation3 + $0xb1] sm:$0xff] }
 0x2db   : > { %v3138_v28 = vpack.c.bf16 %v3112_v41, %v3111_v30 }
 0x2e0   : > { %4085 = vmatmul.mubr.bf16.gmra.mrb[176].mxu1 %v7534_v61 }
 0x2e1   : > { %4238 = vmatmul.mubr.bf16.gmra.mrb[204].mxu0 %v7543_v40  ;;  %4092 = vmatprep.mubr.bf16.mxu1 %v7483_v6  ;;  %v2807_v6 = vld [vmem:[#allocation3 + $0x142] sm:$0xff] }
 0x2e2   : > { %4245 = vmatprep.mubr.bf16.mxu0 %v7546_v20  ;;  %v7559_v36 = vpack.c.bf16 %v2807_v6, %v2806_v14 }
 0x2e8   : > { %4093 = vmatmul.mubr.bf16.gmra.mrb[180].mxu1 %v7546_v20 }
 0x2e9   : > { %4246 = vmatmul.mubr.bf16.gmra.mrb[208].mxu0 %v7551_v11  ;;  %4100 = vmatprep.mubr.bf16.mxu1 %v7481_v50  ;;  %v2809_v50 = vld [vmem:[#allocation3 + $0x15a] sm:$0xff] }
 0x2ea   : > { %4253 = vmatprep.mubr.bf16.mxu0 %v7554_v12  ;;  %v7567_v27 = vpack.c.bf16 %v2809_v50, %v2808_v47 }
 0x2f0   : > { %4101 = vmatmul.mubr.bf16.gmra.mrb[184].mxu1 %v7554_v12 }
 0x2f1   : > { %4254 = vmatmul.mubr.bf16.gmra.mrb[212].mxu0 %v7559_v36  ;;  %4108 = vmatprep.mubr.bf16.mxu1 %v7497_v4  ;;  %v2810_v4 = vld [vmem:[#allocation3 + $0x16a] sm:$0xff] }
 0x2f2   : > { %4261 = vmatprep.mubr.bf16.mxu0 %v7562_v31  ;;  %v7575_v46 = vpack.c.bf16 %v2811_v35, %v2810_v4  ;;  %v3126_v4 = vld [vmem:[#allocation3 + $0x159] sm:$0xff] }
 0x2f3   : > { %v3145_v37 = vpack.c.bf16 %v3126_v4, %v3125_v17 }
 0x2f8   : > { %4109 = vmatmul.mubr.bf16.gmra.mrb[188].mxu1 %v7562_v31 }
 0x2f9   : > { %4262 = vmatmul.mubr.bf16.gmra.mrb[216].mxu0 %v7567_v27  ;;  %4310 = vmatprep.mubr.bf16.mxu1 %v7423_v13  ;;  %v6442_v13 = vld [vmem:[#allocation11 + $0x210] sm:$0xff]  }
 0x2fa   : > { %4269 = vmatprep.mubr.bf16.mxu0 %v7570_v42 }
 0x300   : > { %4311 = vmatmul.mubr.bf16.vlgmr.msra.gmra.mrb[192].mxu1 %v2940_v8 }
 0x301   : > { %4270 = vmatmul.mubr.bf16.gmra.mrb[220].mxu0 %v7575_v46  ;;  %4318 = vmatprep.mubr.bf16.mxu1 %v7438_v29  ;;  %v6444_v29 = vld [vmem:[#allocation11 + $0x220] sm:$0xff]  }
 0x302   : > { %4471 = vmatprep.mubr.bf16.mxu0 %v3133_v48  ;;  %6169 = vmatpush3.bf16.msra.mxu1 %v7405_v59  ;;  %v3105_v59 = vld [vmem:[#allocation3 + $0x61] sm:$0xff] }
 0x303   : > { %6170 = vmatprep.subr.bf16.mxu1 %v6441_v18  ;;  %v3135_v32 = vpack.c.bf16 %v3106_v58, %v3105_v59 }
 0x306   : > { %6171 = vmatpush3.bf16.msra.mxu1 %v6441_v18 }
 0x307   : > { %6172 = vmatprep.subr.bf16.mxu1 %v6442_v13 }
 0x308   : > { %4319 = vmatmul.mubr.bf16.gmra.mrb[196].mxu1 %v3133_v48 }
 0x309   : > { %4472 = vmatmul.mubr.bf16.vlgmr.msra.gmra.mrb[224].mxu0 %v7413_v21  ;;  %4326 = vmatprep.mubr.bf16.mxu1 %v7454_v54  ;;  %v6446_v21 = vld [vmem:[#allocation11 + $0x230] sm:$0xff]  }
 0x30a   : > { %4479 = vmatprep.mubr.bf16.mxu0 %v3134_v25  ;;  %6173 = vmatpush3.bf16.msra.mxu1 %v6442_v13  ;;  %v3108_v54 = vld [vmem:[#allocation3 + $0x81] sm:$0xff] }
 0x30b   : > { %6174 = vmatprep.subr.bf16.mxu1 %v6443_v43  ;;  %v3136_v45 = vpack.c.bf16 %v3108_v54, %v3107_v55 }
 0x30e   : > { %6175 = vmatpush3.bf16.msra.mxu1 %v6443_v43 }
 0x30f   : > { %6176 = vmatprep.subr.bf16.mxu1 %v6444_v29 }
 0x310   : > { %4327 = vmatmul.mubr.bf16.gmra.mrb[200].mxu1 %v3134_v25 }
 0x311   : > { %4480 = vmatmul.mubr.bf16.gmra.mrb[228].mxu0 %v7427_v26  ;;  %4334 = vmatprep.mubr.bf16.mxu1 %v7470_v1  ;;  %v3110_v26 = vld [vmem:[#allocation3 + $0x99] sm:$0xff]  ;;  %v3109_v1 = vld [vmem:[#allocation3 + $0x91] sm:$0xff] }
 0x312   : > { %4487 = vmatprep.mubr.bf16.mxu0 %v3135_v32  ;;  %6177 = vmatpush3.bf16.msra.mxu1 %v6444_v29  ;;  %v3137_v63 = vpack.c.bf16 %v3110_v26, %v3109_v1 }
 0x313   : > { %6178 = vmatprep.subr.bf16.mxu1 %v6445_v53 }
 0x316   : > { %6179 = vmatpush3.bf16.msra.mxu1 %v6445_v53  ;;  %v3128_v53 = vld [vmem:[#allocation3 + $0x171] sm:$0xff] }
 0x317   : > { %6180 = vmatprep.subr.bf16.mxu1 %v6446_v21 }
 0x318   : > { %4335 = vmatmul.mubr.bf16.gmra.mrb[204].mxu1 %v3135_v32 }
 0x319   : > { %4488 = vmatmul.mubr.bf16.gmra.mrb[232].mxu0 %v7442_v56  ;;  %4342 = vmatprep.mubr.bf16.mxu1 %v7486_v7  ;;  %v3114_v56 = vld [vmem:[#allocation3 + $0xc9] sm:$0xff]  ;;  %v3113_v7 = vld [vmem:[#allocation3 + $0xc1] sm:$0xff] }
 0x31a   : > { %4495 = vmatprep.mubr.bf16.mxu0 %v3136_v45  ;;  %6181 = vmatpush3.bf16.msra.mxu1 %v6446_v21  ;;  %v3139_v14 = vpack.c.bf16 %v3114_v56, %v3113_v7  ;;  %v3002_v56 = vld [vmem:[#allocation3 + $0x182] sm:$0xff]  ;;  %v3003_v7 = vld [vmem:[#allocation3 + $0x18a] sm:$0xff] }
 0x31b   : > { %6182 = vmatprep.subr.bf16.mxu1 %v6447_v33 }
 0x31e   : > { %6183 = vmatpush3.bf16.msra.mxu1 %v6447_v33 }
 0x320   : > { %4343 = vmatmul.mubr.bf16.gmra.mrb[208].mxu1 %v3136_v45 }
 0x321   : > { %4496 = vmatmul.mubr.bf16.gmra.mrb[236].mxu0 %v7458_v38  ;;  %4350 = vmatprep.mubr.bf16.mxu1 %v7499_v44  ;;  %v3116_v38 = vld [vmem:[#allocation3 + $0xe1] sm:$0xff]  ;;  %v3115_v44 = vld [vmem:[#allocation3 + $0xd9] sm:$0xff] }
 0x322   : > { %4503 = vmatprep.mubr.bf16.mxu0 %v3137_v63  ;;  %v3140_v6 = vpack.c.bf16 %v3116_v38, %v3115_v44 }
 0x328   : > { %4351 = vmatmul.mubr.bf16.gmra.mrb[212].mxu1 %v3137_v63 }
 0x329   : > { %4504 = vmatmul.mubr.bf16.gmra.mrb[240].mxu0 %v7474_v19  ;;  %4358 = vmatprep.mubr.bf16.mxu1 %v7507_v51  ;;  %v3118_v19 = vld [vmem:[#allocation3 + $0xf9] sm:$0xff]  ;;  %v3117_v51 = vld [vmem:[#allocation3 + $0xf1] sm:$0xff] }
 0x32a   : > { %4511 = vmatprep.mubr.bf16.mxu0 %v3138_v28  ;;  %v3141_v15 = vpack.c.bf16 %v3118_v19, %v3117_v51 }
 0x330   : > { %4359 = vmatmul.mubr.bf16.gmra.mrb[216].mxu1 %v3138_v28 }
 0x331   : > { %4512 = vmatmul.mubr.bf16.gmra.mrb[244].mxu0 %v7490_v5  ;;  %4366 = vmatprep.mubr.bf16.mxu1 %v7515_v16  ;;  %v3120_v5 = vld [vmem:[#allocation3 + $0x111] sm:$0xff]  ;;  %v3119_v16 = vld [vmem:[#allocation3 + $0x109] sm:$0xff] }
 0x332   : > { %4519 = vmatprep.mubr.bf16.mxu0 %v3139_v14  ;;  %v3142_v23 = vpack.c.bf16 %v3120_v5, %v3119_v16 }
 0x338   : > { %4367 = vmatmul.mubr.bf16.gmra.mrb[220].mxu1 %v3139_v14 }
 0x339   : > { %4520 = vmatmul.mubr.bf16.gmra.mrb[248].mxu0 %v7502_v9  ;;  %4374 = vmatprep.mubr.bf16.mxu1 %v7523_v2  ;;  %v3122_v9 = vld [vmem:[#allocation3 + $0x129] sm:$0xff]  ;;  %v3121_v2 = vld [vmem:[#allocation3 + $0x121] sm:$0xff] }
 0x33a   : > { %4527 = vmatprep.mubr.bf16.mxu0 %v3140_v6  ;;  %v3143_v47 = vpack.c.bf16 %v3122_v9, %v3121_v2 }
 0x340   : > { %4375 = vmatmul.mubr.bf16.gmra.mrb[224].mxu1 %v3140_v6  ;;  %v3130_v6 = vld [vmem:[#allocation3 + $0x189] sm:$0xff] }
 0x341   : > { %4528 = vmatmul.mubr.bf16.gmra.mrb[252].mxu0 %v7510_v39  ;;  %4382 = vmatprep.mubr.bf16.mxu1 %v7531_v57  ;;  %v3124_v39 = vld [vmem:[#allocation3 + $0x141] sm:$0xff]  ;;  %v3123_v57 = vld [vmem:[#allocation3 + $0x139] sm:$0xff] }
 0x342   : > { %4535 = vmatprep.mubr.bf16.mxu0 %v3141_v15  ;;  %v3144_v50 = vpack.c.bf16 %v3124_v39, %v3123_v57 }
 0x348   : > { %4383 = vmatmul.mubr.bf16.gmra.mrb[228].mxu1 %v3141_v15 }
 0x349   : > { %4536 = vmatmul.mubr.bf16.gmra.mrb[0].mxu0 %v7518_v3  ;;  %4390 = vmatprep.mubr.bf16.mxu1 %v7543_v40  ;;  %v7605_v3 = vld [vmem:[%s7933_s4] ss:$0 sm:$0xff] }
 0x34a   : > { %4543 = vmatprep.mubr.bf16.mxu0 %v3142_v23  ;;  %v3991_v35 = vadd.f32 %v7538_v22, %v7605_v3  ;;  %v3994_v18 = vadd.f32 %v7541_v0, %v7605_v3 }
 0x350   : > { %4391 = vmatmul.mubr.bf16.gmra.mrb[232].mxu1 %v3142_v23  ;;  %v3129_v23 = vld [vmem:[#allocation3 + $0x181] sm:$0xff] }
 0x351   : > { %4544 = vmatmul.mubr.bf16.gmra.mrb[4].mxu0 %v7526_v52  ;;  %4398 = vmatprep.mubr.bf16.mxu1 %v7551_v11  ;;  %v3147_v39 = vpack.c.bf16 %v3130_v6, %v3129_v23  ;;  %v3174_v23 = vld [vmem:[#allocation3 + $0x9a] sm:$0xff] }
 0x352   : > { %4551 = vmatprep.mubr.bf16.mxu0 %v3143_v47 }
 0x358   : > { %4399 = vmatmul.mubr.bf16.gmra.mrb[236].mxu1 %v3143_v47 }
 0x359   : > { %4552 = vmatmul.mubr.bf16.gmra.mrb[8].mxu0 %v7534_v61  ;;  %4406 = vmatprep.mubr.bf16.mxu1 %v7559_v36 }
 0x35a   : > { %4559 = vmatprep.mubr.bf16.mxu0 %v3144_v50 }
 0x35b   : > { %v5670_v40 = vpop.f32.mrb[132].mxu1 }
 0x35c   : > { %v5776_v60 = vpop.f32.mrb[160].mxu0  ;;  %v5671_v52 = vpop.f32.mrb[133].mxu1 }
 0x35d   : > { %v5672_v10 = vadd.f32 %v5671_v52, %v5670_v40  ;;  %v5777_v11 = vpop.f32.mrb[161].mxu0  ;;  %v5673_v24 = vpop.f32.mrb[134].mxu1  ;;  %v3131_v40 = vld [vmem:[#allocation3 + $0x199] sm:$0xff] }
 0x35e   : > { %v5778_v62 = vadd.f32 %v5777_v11, %v5776_v60  ;;  %v5779_v61 = vpop.f32.mrb[162].mxu0  ;;  %v5674_v49 = vpop.f32.mrb[135].mxu1  ;;  %v3132_v60 = vld [vmem:[#allocation3 + $0x1a1] sm:$0xff]  ;;  %v3165_v11 = vld [vmem:[#allocation3 + $0x32] sm:$0xff] }
 0x35f   : > { %v5675_v36 = vadd.f32 %v5674_v49, %v5673_v24  ;;  %v5780_v8 = vpop.f32.mrb[163].mxu0  ;;  %v3999_v0 = vadd.f32 %v5672_v10, %v7605_v3  ;;  %v3166_v24 = vld [vmem:[#allocation3 + $0x3a] sm:$0xff] }
 0x360   : > { %v7611_v48 = vadd.f32 %v5778_v62, %v3991_v35  ;;  %v5781_v13 = vadd.f32 %v5780_v8, %v5779_v61  ;;  %4407 = vmatmul.mubr.bf16.gmra.mrb[240].mxu1 %v3144_v50  ;;  %v3148_v8 = vpack.c.bf16 %v3132_v60, %v3131_v40 }
 0x361   : > { %4560 = vmatmul.mubr.bf16.gmra.mrb[12].mxu0 %v7546_v20  ;;  %4414 = vmatprep.mubr.bf16.mxu1 %v7567_v27  ;;  %v3127_v20 = vld [vmem:[#allocation3 + $0x169] sm:$0xff]  ;;  %v4002_v27 = vadd.f32 %v5675_v36, %v7605_v3 }
 0x362   : > { %v7615_v34 = vadd.f32 %v5781_v13, %v3994_v18  ;;  %4567 = vmatprep.mubr.bf16.mxu0 %v3145_v37  ;;  %v3146_v1 = vpack.c.bf16 %v3128_v53, %v3127_v20  ;;  %v3197_v13 = vpack.c.bf16 %v3166_v24, %v3165_v11  ;;  %v6450_v20 = vld [vmem:[#allocation2] sm:$0xff] }
 0x363   : > { %v5676_v22 = vpop.f32.mrb[136].mxu1 }
 0x364   : > { %v5782_v43 = vpop.f32.mrb[164].mxu0  ;;  %v5677_v25 = vpop.f32.mrb[137].mxu1 }
 0x365   : > { %v5678_v29 = vadd.f32 %v5677_v25, %v5676_v22  ;;  %v5783_v58 = vpop.f32.mrb[165].mxu0  ;;  %v5679_v59 = vpop.f32.mrb[138].mxu1 }
 0x366   : > { %v5784_v32 = vadd.f32 %v5783_v58, %v5782_v43  ;;  %v5785_v21 = vpop.f32.mrb[166].mxu0  ;;  %v5680_v54 = vpop.f32.mrb[139].mxu1  ;;  %v3167_v58 = vld [vmem:[#allocation3 + $0x4a] sm:$0xff] }
 0x367   : > { %v5681_v55 = vadd.f32 %v5680_v54, %v5679_v59  ;;  %v5786_v33 = vpop.f32.mrb[167].mxu0  ;;  %v4007_v19 = vadd.f32 %v5678_v29, %v7605_v3  ;;  %v3168_v59 = vld [vmem:[#allocation3 + $0x52] sm:$0xff] }
 0x368   : > { %v7619_v45 = vadd.f32 %v5784_v32, %v3999_v0  ;;  %v5787_v26 = vadd.f32 %v5786_v33, %v5785_v21  ;;  %4415 = vmatmul.mubr.bf16.gmra.mrb[244].mxu1 %v3145_v37  ;;  %v3169_v32 = vld [vmem:[#allocation3 + $0x62] sm:$0xff]  ;;  %v3170_v21 = vld [vmem:[#allocation3 + $0x6a] sm:$0xff] }
 0x369   : > { %4568 = vmatmul.mubr.bf16.gmra.mrb[16].mxu0 %v7554_v12  ;;  %4422 = vmatprep.mubr.bf16.mxu1 %v7575_v46  ;;  %v7626_v46 = vpack.c.bf16 %v3003_v7, %v3002_v56  ;;  %v4010_v9 = vadd.f32 %v5681_v55, %v7605_v3  ;;  %v3199_v7 = vpack.c.bf16 %v3170_v21, %v3169_v32 }
 0x36a   : > { %v7623_v63 = vadd.f32 %v5787_v26, %v4002_v27  ;;  %4575 = vmatprep.mubr.bf16.mxu0 %v3146_v1  ;;  %v3084_v27 = vpack.c.bf16 %v6450_v20, %v6450_v20 }
 0x36b   : > { %v5682_v41 = vpop.f32.mrb[140].mxu1 }
 0x36c   : > { %v5788_v30 = vpop.f32.mrb[168].mxu0  ;;  %v5683_v28 = vpop.f32.mrb[141].mxu1 }
 0x36d   : > { %v5684_v14 = vadd.f32 %v5683_v28, %v5682_v41  ;;  %v5789_v38 = vpop.f32.mrb[169].mxu0  ;;  %v5685_v44 = vpop.f32.mrb[142].mxu1 }
 0x36e   : > { %v5790_v51 = vadd.f32 %v5789_v38, %v5788_v30  ;;  %v5791_v15 = vpop.f32.mrb[170].mxu0  ;;  %v5686_v5 = vpop.f32.mrb[143].mxu1  ;;  %v3198_v30 = vpack.c.bf16 %v3168_v59, %v3167_v58 }
 0x36f   : > { %v5687_v12 = vadd.f32 %v5686_v5, %v5685_v44  ;;  %v5792_v16 = vpop.f32.mrb[171].mxu0  ;;  %v4015_v61 = vadd.f32 %v5684_v14, %v7605_v3 }
 0x370   : > { %v7629_v2 = vadd.f32 %v5790_v51, %v4007_v19  ;;  %v5793_v47 = vadd.f32 %v5792_v16, %v5791_v15  ;;  %4423 = vmatmul.mubr.bf16.gmra.mrb[248].mxu1 %v3146_v1  ;;  %v3171_v51 = vld [vmem:[#allocation3 + $0x7a] sm:$0xff]  ;;  %v3172_v15 = vld [vmem:[#allocation3 + $0x82] sm:$0xff]  ;;  %v3173_v16 = vld [vmem:[#allocation3 + $0x92] sm:$0xff] }
 0x371   : > { %4576 = vmatmul.mubr.bf16.gmra.mrb[20].mxu0 %v7562_v31  ;;  %4430 = vmatprep.mubr.bf16.mxu1 %v7626_v46  ;;  %v4018_v37 = vadd.f32 %v5687_v12, %v7605_v3 }
 0x372   : > { %v7633_v57 = vadd.f32 %v5793_v47, %v4010_v9  ;;  %4583 = vmatprep.mubr.bf16.mxu0 %v3147_v39 }
 0x373   : > { %v5688_v50 = vpop.f32.mrb[144].mxu1 }
 0x374   : > { %v5794_v52 = vpop.f32.mrb[172].mxu0  ;;  %v5689_v10 = vpop.f32.mrb[145].mxu1 }
 0x375   : > { %v5690_v4 = vadd.f32 %v5689_v10, %v5688_v50  ;;  %v5795_v35 = vpop.f32.mrb[173].mxu0  ;;  %v5691_v62 = vpop.f32.mrb[146].mxu1  ;;  %v3200_v10 = vpack.c.bf16 %v3172_v15, %v3171_v51 }
 0x376   : > { %v5796_v49 = vadd.f32 %v5795_v35, %v5794_v52  ;;  %v5797_v36 = vpop.f32.mrb[174].mxu0  ;;  %v5692_v31 = vpop.f32.mrb[147].mxu1 }
 0x377   : > { %v5693_v17 = vadd.f32 %v5692_v31, %v5691_v62  ;;  %v5798_v18 = vpop.f32.mrb[175].mxu0  ;;  %v4023_v26 = vadd.f32 %v5690_v4, %v7605_v3  ;;  %v3201_v4 = vpack.c.bf16 %v3174_v23, %v3173_v16  ;;  %v3175_v31 = vld [vmem:[#allocation3 + $0xaa] sm:$0xff] }
 0x378   : > { %v7637_v22 = vadd.f32 %v5796_v49, %v4015_v61  ;;  %v5799_v43 = vadd.f32 %v5798_v18, %v5797_v36  ;;  %4431 = vmatmul.mubr.bf16.gmra.mrb[252].mxu1 %v3147_v39 }
 0x379   : > { %4584 = vmatmul.mubr.bf16.gmra.mrb[24].mxu0 %v7570_v42  ;;  %6184 = vmatprep.mubr.bf16.mxu1 %v3197_v13  ;;  %v4026_v14 = vadd.f32 %v5693_v17, %v7605_v3  ;;  %v3177_v13 = vld [vmem:[#allocation3 + $0xc2] sm:$0xff] }
 0x37a   : > { %v7640_v25 = vadd.f32 %v5799_v43, %v4018_v37  ;;  %4591 = vmatprep.mubr.bf16.mxu0 %v3148_v8  ;;  %v3176_v8 = vld [vmem:[#allocation3 + $0xb2] sm:$0xff]  ;;  %v3178_v37 = vld [vmem:[#allocation3 + $0xca] sm:$0xff] }
 0x37b   : > { %v5694_v29 = vpop.f32.mrb[148].mxu1  ;;  %v3202_v21 = vpack.c.bf16 %v3176_v8, %v3175_v31 }
 0x37c   : > { %v5800_v53 = vpop.f32.mrb[176].mxu0  ;;  %v5695_v0 = vpop.f32.mrb[149].mxu1 }
 0x37d   : > { %v5696_v54 = vadd.f32 %v5695_v0, %v5694_v29  ;;  %v5801_v55 = vpop.f32.mrb[177].mxu0  ;;  %v5697_v33 = vpop.f32.mrb[150].mxu1 }
 0x37e   : > { %v5802_v1 = vadd.f32 %v5801_v55, %v5800_v53  ;;  %v5803_v42 = vpop.f32.mrb[178].mxu0  ;;  %v5698_v41 = vpop.f32.mrb[151].mxu1 }
 0x37f   : > { %v5699_v28 = vadd.f32 %v5698_v41, %v5697_v33  ;;  %v5804_v56 = vpop.f32.mrb[179].mxu0  ;;  %v4031_v50 = vadd.f32 %v5696_v54, %v7605_v3  ;;  %v3203_v33 = vpack.c.bf16 %v3178_v37, %v3177_v13  ;;  %v3179_v41 = vld [vmem:[#allocation3 + $0xda] sm:$0xff] }
 0x380   : > { %v7644_v38 = vadd.f32 %v5802_v1, %v4023_v26  ;;  %v5805_v44 = vadd.f32 %v5804_v56, %v5803_v42  ;;  %6185 = vmatmul.mubr.bf16.vlgmr.msra.gmra.mrb[0].mxu1 %v3198_v30  ;;  %v3180_v30 = vld [vmem:[#allocation3 + $0xe2] sm:$0xff] }
 0x381   : > { %4592 = vmatmul.mubr.bf16.gmra.mrb[28].mxu0 %v3084_v27  ;;  %6188 = vmatprep.mubr.bf16.mxu1 %v3199_v7  ;;  %v4034_v35 = vadd.f32 %v5699_v28, %v7605_v3  ;;  %v3181_v7 = vld [vmem:[#allocation3 + $0xf2] sm:$0xff]  ;;  %v3204_v23 = vpack.c.bf16 %v3180_v30, %v3179_v41  ;;  %v3190_v30 = vld [vmem:[#allocation3 + $0x15a] sm:$0xff] }
 0x382   : > { %v7646_v6 = vadd.f32 %v5805_v44, %v4026_v14  ;;  %v3182_v14 = vld [vmem:[#allocation3 + $0xfa] sm:$0xff]  ;;  %v3189_v41 = vld [vmem:[#allocation3 + $0x152] sm:$0xff] }
 0x383   : > { %v5700_v19 = vpop.f32.mrb[152].mxu1 }
 0x384   : > { %v5806_v5 = vpop.f32.mrb[180].mxu0  ;;  %v5701_v12 = vpop.f32.mrb[153].mxu1 }
 0x385   : > { %v5702_v9 = vadd.f32 %v5701_v12, %v5700_v19  ;;  %v5807_v47 = vpop.f32.mrb[181].mxu0  ;;  %v5703_v39 = vpop.f32.mrb[154].mxu1 }
 0x386   : > { %v5808_v40 = vadd.f32 %v5807_v47, %v5806_v5  ;;  %v5809_v60 = vpop.f32.mrb[182].mxu0  ;;  %v5704_v52 = vpop.f32.mrb[155].mxu1 }
 0x387   : > { %v5705_v11 = vadd.f32 %v5704_v52, %v5703_v39  ;;  %v5810_v24 = vpop.f32.mrb[183].mxu0  ;;  %v4039_v59 = vadd.f32 %v5702_v9, %v7605_v3  ;;  %v3205_v39 = vpack.c.bf16 %v3182_v14, %v3181_v7 }
 0x388   : > { %v7650_v62 = vadd.f32 %v5808_v40, %v4031_v50  ;;  %v5811_v61 = vadd.f32 %v5810_v24, %v5809_v60  ;;  %6189 = vmatmul.mubr.bf16.gmra.mrb[4].mxu1 %v3200_v10  ;;  %v3184_v24 = vld [vmem:[#allocation3 + $0x112] sm:$0xff] }
 0x389   : > { %6192 = vmatprep.mubr.bf16.mxu1 %v3201_v4  ;;  %v4042_v20 = vadd.f32 %v5705_v11, %v7605_v3  ;;  %v3183_v11 = vld [vmem:[#allocation3 + $0x10a] sm:$0xff] }
 0x38a   : > { %v7652_v49 = vadd.f32 %v5811_v61, %v4034_v35  ;;  %v3185_v61 = vld [vmem:[#allocation3 + $0x122] sm:$0xff] }
 0x38b   : > { %v5706_v36 = vpop.f32.mrb[156].mxu1 }
 0x38c   : > { %v5812_v17 = vpop.f32.mrb[184].mxu0  ;;  %v5707_v18 = vpop.f32.mrb[157].mxu1 }
 0x38d   : > { %v5708_v43 = vadd.f32 %v5707_v18, %v5706_v36  ;;  %v5813_v29 = vpop.f32.mrb[185].mxu0  ;;  %v5709_v58 = vpop.f32.mrb[158].mxu1  ;;  %v3186_v36 = vld [vmem:[#allocation3 + $0x12a] sm:$0xff] }
 0x38e   : > { %v5814_v53 = vadd.f32 %v5813_v29, %v5812_v17  ;;  %v5815_v0 = vpop.f32.mrb[186].mxu0  ;;  %v5710_v32 = vpop.f32.mrb[159].mxu1  ;;  %v3206_v29 = vpack.c.bf16 %v3184_v24, %v3183_v11 }
 0x38f   : > { %v5711_v54 = vadd.f32 %v5710_v32, %v5709_v58  ;;  %v5816_v55 = vpop.f32.mrb[187].mxu0  ;;  %v4047_v15 = vadd.f32 %v5708_v43, %v7605_v3 }
 0x390   : > { %v7656_v27 = vadd.f32 %v5814_v53, %v4039_v59  ;;  %v5817_v26 = vadd.f32 %v5816_v55, %v5815_v0  ;;  %6193 = vmatmul.mubr.bf16.gmra.mrb[8].mxu1 %v3202_v21  ;;  %v3207_v53 = vpack.c.bf16 %v3186_v36, %v3185_v61 }
 0x391   : > { %6196 = vmatprep.mubr.bf16.mxu1 %v3203_v33  ;;  %v4050_v50 = vadd.f32 %v5711_v54, %v7605_v3  ;;  %v3187_v33 = vld [vmem:[#allocation3 + $0x13a] sm:$0xff] }
 0x392   : > { %v7658_v1 = vadd.f32 %v5817_v26, %v4042_v20  ;;  %v3188_v20 = vld [vmem:[#allocation3 + $0x142] sm:$0xff] }
 0x393   : > { %v5712_v42 = vpop.f32.mrb[160].mxu1 }
 0x394   : > { %v5818_v28 = vpop.f32.mrb[188].mxu0  ;;  %v5713_v56 = vpop.f32.mrb[161].mxu1 }
 0x395   : > { %v5714_v44 = vadd.f32 %v5713_v56, %v5712_v42  ;;  %v5819_v19 = vpop.f32.mrb[189].mxu0  ;;  %v5715_v51 = vpop.f32.mrb[162].mxu1 }
 0x396   : > { %v5820_v5 = vadd.f32 %v5819_v19, %v5818_v28  ;;  %v5821_v12 = vpop.f32.mrb[190].mxu0  ;;  %v5716_v16 = vpop.f32.mrb[163].mxu1 }
 0x397   : > { %v5717_v9 = vadd.f32 %v5716_v16, %v5715_v51  ;;  %v5822_v47 = vpop.f32.mrb[191].mxu0  ;;  %v4055_v18 = vadd.f32 %v5714_v44, %v7605_v3  ;;  %v3209_v16 = vpack.c.bf16 %v3190_v30, %v3189_v41 }
 0x398   : > { %v7662_v40 = vadd.f32 %v5820_v5, %v4047_v15  ;;  %v5823_v60 = vadd.f32 %v5822_v47, %v5821_v12  ;;  %6197 = vmatmul.mubr.bf16.gmra.mrb[12].mxu1 %v3204_v23  ;;  %v3208_v15 = vpack.c.bf16 %v3188_v20, %v3187_v33 }
 0x399   : > { %6200 = vmatprep.mubr.bf16.mxu1 %v3205_v39  ;;  %v4058_v0 = vadd.f32 %v5717_v9, %v7605_v3 }
 0x39a   : > { %v7664_v52 = vadd.f32 %v5823_v60, %v4050_v50  ;;  %v3191_v60 = vld [vmem:[#allocation3 + $0x16a] sm:$0xff] }
 0x39b   : > { %v5718_v10 = vpop.f32.mrb[164].mxu1 }
 0x39c   : > { %v5824_v4 = vpop.f32.mrb[192].mxu0  ;;  %v5719_v35 = vpop.f32.mrb[165].mxu1 }
 0x39d   : > { %v5720_v31 = vadd.f32 %v5719_v35, %v5718_v10  ;;  %v5825_v8 = vpop.f32.mrb[193].mxu0  ;;  %v5721_v17 = vpop.f32.mrb[166].mxu1  ;;  %v3192_v10 = vld [vmem:[#allocation3 + $0x172] sm:$0xff] }
 0x39e   : > { %v5826_v13 = vadd.f32 %v5825_v8, %v5824_v4  ;;  %v5827_v37 = vpop.f32.mrb[194].mxu0  ;;  %v5722_v43 = vpop.f32.mrb[167].mxu1 }
 0x39f   : > { %v5723_v58 = vadd.f32 %v5722_v43, %v5721_v17  ;;  %v5828_v59 = vpop.f32.mrb[195].mxu0  ;;  %v4063_v14 = vadd.f32 %v5720_v31, %v7605_v3 }
 0x3a0   : > { %v7668_v32 = vadd.f32 %v5826_v13, %v4055_v18  ;;  %v5829_v21 = vadd.f32 %v5828_v59, %v5827_v37  ;;  %6201 = vmatmul.mubr.bf16.gmra.mrb[16].mxu1 %v3206_v29  ;;  %v3210_v18 = vpack.c.bf16 %v3192_v10, %v3191_v60  ;;  %v3195_v59 = vld [vmem:[#allocation3 + $0x19a] sm:$0xff] }
 0x3a1   : > { %6204 = vmatprep.mubr.bf16.mxu1 %v3207_v53  ;;  %v4066_v23 = vadd.f32 %v5723_v58, %v7605_v3  ;;  %v3196_v53 = vld [vmem:[#allocation3 + $0x1a2] sm:$0xff] }
 0x3a2   : > { %v7670_v54 = vadd.f32 %v5829_v21, %v4058_v0  ;;  %v3212_v20 = vpack.c.bf16 %v3196_v53, %v3195_v59 }
 0x3a3   : > { %v5724_v55 = vpop.f32.mrb[168].mxu1 }
 0x3a4   : > { %v5830_v26 = vpop.f32.mrb[196].mxu0  ;;  %v5725_v42 = vpop.f32.mrb[169].mxu1 }
 0x3a5   : > { %v5726_v28 = vadd.f32 %v5725_v42, %v5724_v55  ;;  %v5831_v56 = vpop.f32.mrb[197].mxu0  ;;  %v5727_v7 = vpop.f32.mrb[170].mxu1 }
 0x3a6   : > { %v5832_v44 = vadd.f32 %v5831_v56, %v5830_v26  ;;  %v5833_v19 = vpop.f32.mrb[198].mxu0  ;;  %v5728_v51 = vpop.f32.mrb[171].mxu1 }
 0x3a7   : > { %v5729_v5 = vadd.f32 %v5728_v51, %v5727_v7  ;;  %v5834_v12 = vpop.f32.mrb[199].mxu0  ;;  %v4071_v36 = vadd.f32 %v5726_v28, %v7605_v3 }
 0x3a8   : > { %v7674_v9 = vadd.f32 %v5832_v44, %v4063_v14  ;;  %v5835_v47 = vadd.f32 %v5834_v12, %v5833_v19  ;;  %6205 = vmatmul.mubr.bf16.gmra.mrb[20].mxu1 %v3208_v15 }
 0x3a9   : > { %6208 = vmatprep.mubr.bf16.mxu1 %v3209_v16  ;;  %v4074_v43 = vadd.f32 %v5729_v5, %v7605_v3 }
 0x3aa   : > { %v7676_v39 = vadd.f32 %v5835_v47, %v4066_v23 }
 0x3ab   : > { %v5730_v50 = vpop.f32.mrb[172].mxu1 }
 0x3ac   : > { %v5836_v11 = vpop.f32.mrb[200].mxu0  ;;  %v5731_v24 = vpop.f32.mrb[173].mxu1 }
 0x3ad   : > { %v5732_v4 = vadd.f32 %v5731_v24, %v5730_v50  ;;  %v5837_v35 = vpop.f32.mrb[201].mxu0  ;;  %v5733_v61 = vpop.f32.mrb[174].mxu1 }
 0x3ae   : > { %v5838_v31 = vadd.f32 %v5837_v35, %v5836_v11  ;;  %v5839_v8 = vpop.f32.mrb[202].mxu0  ;;  %v5734_v17 = vpop.f32.mrb[175].mxu1 }
 0x3af   : > { %v5735_v13 = vadd.f32 %v5734_v17, %v5733_v61  ;;  %v5840_v37 = vpop.f32.mrb[203].mxu0  ;;  %v4079_v30 = vadd.f32 %v5732_v4, %v7605_v3 }
 0x3b0   : > { %v7680_v29 = vadd.f32 %v5838_v31, %v4071_v36  ;;  %v5841_v58 = vadd.f32 %v5840_v37, %v5839_v8  ;;  %6209 = vmatmul.mubr.bf16.gmra.mrb[24].mxu1 %v3210_v18 }
 0x3b1   : > { %6212 = vmatprep.mubr.bf16.mxu1 %v7626_v46  ;;  %v4082_v46 = vadd.f32 %v5735_v13, %v7605_v3 }
 0x3b2   : > { %v7683_v0 = vadd.f32 %v5841_v58, %v4074_v43 }
 0x3b3   : > { %v5736_v21 = vpop.f32.mrb[176].mxu1 }
 0x3b4   : > { %v5842_v55 = vpop.f32.mrb[204].mxu0  ;;  %v5737_v33 = vpop.f32.mrb[177].mxu1 }
 0x3b5   : > { %v5738_v26 = vadd.f32 %v5737_v33, %v5736_v21  ;;  %v5843_v42 = vpop.f32.mrb[205].mxu0  ;;  %v5739_v41 = vpop.f32.mrb[178].mxu1 }
 0x3b6   : > { %v5844_v28 = vadd.f32 %v5843_v42, %v5842_v55  ;;  %v5845_v56 = vpop.f32.mrb[206].mxu0  ;;  %v5740_v7 = vpop.f32.mrb[179].mxu1 }
 0x3b7   : > { %v5741_v14 = vadd.f32 %v5740_v7, %v5739_v41  ;;  %v5846_v44 = vpop.f32.mrb[207].mxu0  ;;  %v4087_v60 = vadd.f32 %v5738_v26, %v7605_v3 }
 0x3b8   : > { %v7687_v19 = vadd.f32 %v5844_v28, %v4079_v30  ;;  %v5847_v51 = vadd.f32 %v5846_v44, %v5845_v56  ;;  %6213 = vmatmul.mubr.bf16.gmra.mrb[28].mxu1 %v3212_v20 }
 0x3b9   : > { %v4090_v61 = vadd.f32 %v5741_v14, %v7605_v3 }
 0x3ba   : > { %v7689_v15 = vadd.f32 %v5847_v51, %v4082_v46 }
 0x3bb   : > { %v5742_v5 = vpop.f32.mrb[180].mxu1 }
 0x3bc   : > { %v5848_v12 = vpop.f32.mrb[208].mxu0  ;;  %v5743_v16 = vpop.f32.mrb[181].mxu1 }
 0x3bd   : > { %v5744_v23 = vadd.f32 %v5743_v16, %v5742_v5  ;;  %v5849_v47 = vpop.f32.mrb[209].mxu0  ;;  %v5745_v50 = vpop.f32.mrb[182].mxu1 }
 0x3be   : > { %v5850_v10 = vadd.f32 %v5849_v47, %v5848_v12  ;;  %v5851_v11 = vpop.f32.mrb[210].mxu0  ;;  %v5746_v24 = vpop.f32.mrb[183].mxu1 }
 0x3bf   : > { %v5747_v4 = vadd.f32 %v5746_v24, %v5745_v50  ;;  %v5852_v35 = vpop.f32.mrb[211].mxu0  ;;  %v4095_v59 = vadd.f32 %v5744_v23, %v7605_v3 }
 0x3c0   : > { %v7693_v36 = vadd.f32 %v5850_v10, %v4087_v60  ;;  %v5853_v31 = vadd.f32 %v5852_v35, %v5851_v11 }
 0x3c1   : > { %v4098_v26 = vadd.f32 %v5747_v4, %v7605_v3 }
 0x3c2   : > { %v7695_v8 = vadd.f32 %v5853_v31, %v4090_v61 }
 0x3c3   : > { %v5748_v17 = vpop.f32.mrb[184].mxu1 }
 0x3c4   : > { %v5854_v18 = vpop.f32.mrb[212].mxu0  ;;  %v5749_v13 = vpop.f32.mrb[185].mxu1 }
 0x3c5   : > { %v5750_v37 = vadd.f32 %v5749_v13, %v5748_v17  ;;  %v5855_v43 = vpop.f32.mrb[213].mxu0  ;;  %v5751_v58 = vpop.f32.mrb[186].mxu1 }
 0x3c6   : > { %v5856_v53 = vadd.f32 %v5855_v43, %v5854_v18  ;;  %v5857_v21 = vpop.f32.mrb[214].mxu0  ;;  %v5752_v55 = vpop.f32.mrb[187].mxu1 }
 0x3c7   : > { %v5753_v33 = vadd.f32 %v5752_v55, %v5751_v58  ;;  %v5858_v20 = vpop.f32.mrb[215].mxu0  ;;  %v4103_v51 = vadd.f32 %v5750_v37, %v7605_v3 }
 0x3c8   : > { %v7699_v42 = vadd.f32 %v5856_v53, %v4095_v59  ;;  %v5859_v41 = vadd.f32 %v5858_v20, %v5857_v21 }
 0x3c9   : > { %v4106_v50 = vadd.f32 %v5753_v33, %v7605_v3 }
 0x3ca   : > { %v7701_v30 = vadd.f32 %v5859_v41, %v4098_v26 }
 0x3cb   : > { %v5754_v28 = vpop.f32.mrb[188].mxu1 }
 0x3cc   : > { %v5860_v56 = vpop.f32.mrb[216].mxu0  ;;  %v5755_v7 = vpop.f32.mrb[189].mxu1 }
 0x3cd   : > { %v5756_v14 = vadd.f32 %v5755_v7, %v5754_v28  ;;  %v5861_v44 = vpop.f32.mrb[217].mxu0  ;;  %v5757_v46 = vpop.f32.mrb[190].mxu1 }
 0x3ce   : > { %v5862_v5 = vadd.f32 %v5861_v44, %v5860_v56  ;;  %v5863_v12 = vpop.f32.mrb[218].mxu0  ;;  %v5758_v16 = vpop.f32.mrb[191].mxu1 }
 0x3cf   : > { %v5759_v23 = vadd.f32 %v5758_v16, %v5757_v46  ;;  %v5864_v47 = vpop.f32.mrb[219].mxu0  ;;  %v4111_v18 = vadd.f32 %v5756_v14, %v7605_v3 }
 0x3d0   : > { %v7705_v60 = vadd.f32 %v5862_v5, %v4103_v51  ;;  %v5865_v10 = vadd.f32 %v5864_v47, %v5863_v12 }
 0x3d1   : > { %v4114_v21 = vadd.f32 %v5759_v23, %v7605_v3 }
 0x3d2   : > { %v7707_v11 = vadd.f32 %v5865_v10, %v4106_v50 }
 0x3d3   : > { %v5888_v24 = vpop.f32.mrb[192].mxu1 }
 0x3d4   : > { %v5866_v4 = vpop.f32.mrb[220].mxu0  ;;  %v5889_v35 = vpop.f32.mrb[193].mxu1 }
 0x3d5   : > { %v5867_v61 = vpop.f32.mrb[221].mxu0  ;;  %v5890_v31 = vadd.f32 %v5889_v35, %v5888_v24  ;;  %v5891_v17 = vpop.f32.mrb[194].mxu1 }
 0x3d6   : > { %v5868_v13 = vadd.f32 %v5867_v61, %v5866_v4  ;;  %v5869_v37 = vpop.f32.mrb[222].mxu0  ;;  %v5892_v43 = vpop.f32.mrb[195].mxu1 }
 0x3d7   : > { %v4313_v58 = vadd.f32 %v5890_v31, %v7611_v48  ;;  %v5870_v59 = vpop.f32.mrb[223].mxu0  ;;  %v5893_v53 = vadd.f32 %v5892_v43, %v5891_v17 }
 0x3d8   : > { %v7712_v55 = vadd.f32 %v5868_v13, %v4111_v18  ;;  %v5871_v33 = vadd.f32 %v5870_v59, %v5869_v37 }
 0x3d9   : > { %v4316_v20 = vadd.f32 %v5893_v53, %v7615_v34 }
 0x3da   : > { %v7715_v26 = vadd.f32 %v5871_v33, %v4114_v21 }
 0x3db   : > { %v5894_v41 = vpop.f32.mrb[196].mxu1 }
 0x3dc   : > { %v6000_v28 = vpop.f32.mrb[224].mxu0  ;;  %v5895_v56 = vpop.f32.mrb[197].mxu1 }
 0x3dd   : > { %v5896_v7 = vadd.f32 %v5895_v56, %v5894_v41  ;;  %v6001_v14 = vpop.f32.mrb[225].mxu0  ;;  %v5897_v44 = vpop.f32.mrb[198].mxu1 }
 0x3de   : > { %v6002_v46 = vadd.f32 %v6001_v14, %v6000_v28  ;;  %v6003_v51 = vpop.f32.mrb[226].mxu0  ;;  %v5898_v48 = vpop.f32.mrb[199].mxu1 }
 0x3df   : > { %v4321_v5 = vadd.f32 %v5896_v7, %v7619_v45  ;;  %v5899_v12 = vadd.f32 %v5898_v48, %v5897_v44  ;;  %v6004_v3 = vpop.f32.mrb[227].mxu0 }
 0x3e0   : > { %v6005_v16 = vadd.f32 %v6004_v3, %v6003_v51  ;;  %v7718_v23 = vadd.f32 %v6002_v46, %v4313_v58 }
 0x3e1   : > { %v4324_v34 = vadd.f32 %v5899_v12, %v7623_v63 }
 0x3e2   : > { %v7721_v47 = vadd.f32 %v6005_v16, %v4316_v20 }
 0x3e3   : > { %v5900_v50 = vpop.f32.mrb[200].mxu1 }
 0x3e4   : > { %v6006_v10 = vpop.f32.mrb[228].mxu0  ;;  %v5901_v24 = vpop.f32.mrb[201].mxu1 }
 0x3e5   : > { %v5902_v4 = vadd.f32 %v5901_v24, %v5900_v50  ;;  %v6007_v35 = vpop.f32.mrb[229].mxu0  ;;  %v5903_v61 = vpop.f32.mrb[202].mxu1 }
 0x3e6   : > { %v6008_v31 = vadd.f32 %v6007_v35, %v6006_v10  ;;  %v6009_v17 = vpop.f32.mrb[230].mxu0  ;;  %v5904_v18 = vpop.f32.mrb[203].mxu1 }
 0x3e7   : > { %v4329_v45 = vadd.f32 %v5902_v4, %v7629_v2  ;;  %v5905_v13 = vadd.f32 %v5904_v18, %v5903_v61  ;;  %v6010_v37 = vpop.f32.mrb[231].mxu0 }
 0x3e8   : > { %v6011_v43 = vadd.f32 %v6010_v37, %v6009_v17  ;;  %v7724_v58 = vadd.f32 %v6008_v31, %v4321_v5 }
 0x3e9   : > { %v4332_v63 = vadd.f32 %v5905_v13, %v7633_v57 }
 0x3ea   : > { %v7727_v59 = vadd.f32 %v6011_v43, %v4324_v34 }
 0x3eb   : > { %v5906_v53 = vpop.f32.mrb[204].mxu1 }
 0x3ec   : > { %v6012_v21 = vpop.f32.mrb[232].mxu0  ;;  %v5907_v33 = vpop.f32.mrb[205].mxu1 }
 0x3ed   : > { %v5908_v20 = vadd.f32 %v5907_v33, %v5906_v53  ;;  %v6013_v41 = vpop.f32.mrb[233].mxu0  ;;  %v5909_v28 = vpop.f32.mrb[206].mxu1 }
 0x3ee   : > { %v6014_v56 = vadd.f32 %v6013_v41, %v6012_v21  ;;  %v6015_v7 = vpop.f32.mrb[234].mxu0  ;;  %v5910_v14 = vpop.f32.mrb[207].mxu1 }
 0x3ef   : > { %v4337_v2 = vadd.f32 %v5908_v20, %v7637_v22  ;;  %v5911_v44 = vadd.f32 %v5910_v14, %v5909_v28  ;;  %v6016_v46 = vpop.f32.mrb[235].mxu0 }
 0x3f0   : > { %v6017_v51 = vadd.f32 %v6016_v46, %v6015_v7  ;;  %v7730_v48 = vadd.f32 %v6014_v56, %v4329_v45 }
 0x3f1   : > { %v4340_v57 = vadd.f32 %v5911_v44, %v7640_v25 }
 0x3f2   : > { %v7733_v5 = vadd.f32 %v6017_v51, %v4332_v63 }
 0x3f3   : > { %v5912_v12 = vpop.f32.mrb[208].mxu1 }
 0x3f4   : > { %v6018_v3 = vpop.f32.mrb[236].mxu0  ;;  %v5913_v16 = vpop.f32.mrb[209].mxu1 }
 0x3f5   : > { %v5914_v34 = vadd.f32 %v5913_v16, %v5912_v12  ;;  %v6019_v50 = vpop.f32.mrb[237].mxu0  ;;  %v5915_v10 = vpop.f32.mrb[210].mxu1 }
 0x3f6   : > { %v6020_v24 = vadd.f32 %v6019_v50, %v6018_v3  ;;  %v6021_v4 = vpop.f32.mrb[238].mxu0  ;;  %v5916_v35 = vpop.f32.mrb[211].mxu1 }
 0x3f7   : > { %v4345_v22 = vadd.f32 %v5914_v34, %v7644_v38  ;;  %v5917_v61 = vadd.f32 %v5916_v35, %v5915_v10  ;;  %v6022_v31 = vpop.f32.mrb[239].mxu0 }
 0x3f8   : > { %v6023_v17 = vadd.f32 %v6022_v31, %v6021_v4  ;;  %v7736_v18 = vadd.f32 %v6020_v24, %v4337_v2 }
 0x3f9   : > { %v4348_v25 = vadd.f32 %v5917_v61, %v7646_v6 }
 0x3fa   : > { %v7739_v45 = vadd.f32 %v6023_v17, %v4340_v57 }
 0x3fb   : > { %v5918_v13 = vpop.f32.mrb[212].mxu1 }
 0x3fc   : > { %v6024_v37 = vpop.f32.mrb[240].mxu0  ;;  %v5919_v43 = vpop.f32.mrb[213].mxu1 }
 0x3fd   : > { %v5920_v63 = vadd.f32 %v5919_v43, %v5918_v13  ;;  %v6025_v53 = vpop.f32.mrb[241].mxu0  ;;  %v5921_v21 = vpop.f32.mrb[214].mxu1 }
 0x3fe   : > { %v6026_v33 = vadd.f32 %v6025_v53, %v6024_v37  ;;  %v6027_v20 = vpop.f32.mrb[242].mxu0  ;;  %v5922_v41 = vpop.f32.mrb[215].mxu1 }
 0x3ff   : > { %v4353_v38 = vadd.f32 %v5920_v63, %v7650_v62  ;;  %v5923_v28 = vadd.f32 %v5922_v41, %v5921_v21  ;;  %v6028_v56 = vpop.f32.mrb[243].mxu0 }
 0x400   : > { %v6029_v7 = vadd.f32 %v6028_v56, %v6027_v20  ;;  %v7742_v14 = vadd.f32 %v6026_v33, %v4345_v22 }
 0x401   : > { %v4356_v6 = vadd.f32 %v5923_v28, %v7652_v49 }
 0x402   : > { %v7745_v2 = vadd.f32 %v6029_v7, %v4348_v25 }
 0x403   : > { %v5924_v44 = vpop.f32.mrb[216].mxu1 }
 0x404   : > { %v6030_v46 = vpop.f32.mrb[244].mxu0  ;;  %v5925_v51 = vpop.f32.mrb[217].mxu1 }
 0x405   : > { %v5926_v57 = vadd.f32 %v5925_v51, %v5924_v44  ;;  %v6031_v12 = vpop.f32.mrb[245].mxu0  ;;  %v5927_v3 = vpop.f32.mrb[218].mxu1 }
 0x406   : > { %v6032_v16 = vadd.f32 %v6031_v12, %v6030_v46  ;;  %v6033_v34 = vpop.f32.mrb[246].mxu0  ;;  %v5928_v50 = vpop.f32.mrb[219].mxu1 }
 0x407   : > { %v4361_v62 = vadd.f32 %v5926_v57, %v7656_v27  ;;  %v5929_v10 = vadd.f32 %v5928_v50, %v5927_v3  ;;  %v6034_v24 = vpop.f32.mrb[247].mxu0 }
 0x408   : > { %v6035_v4 = vadd.f32 %v6034_v24, %v6033_v34  ;;  %v7748_v35 = vadd.f32 %v6032_v16, %v4353_v38 }
 0x409   : > { %v4364_v49 = vadd.f32 %v5929_v10, %v7658_v1 }
 0x40a   : > { %v7751_v22 = vadd.f32 %v6035_v4, %v4356_v6 }
 0x40b   : > { %v5930_v61 = vpop.f32.mrb[220].mxu1 }
 0x40c   : > { %v6036_v31 = vpop.f32.mrb[248].mxu0  ;;  %v5931_v17 = vpop.f32.mrb[221].mxu1 }
 0x40d   : > { %v5932_v25 = vadd.f32 %v5931_v17, %v5930_v61  ;;  %v6037_v13 = vpop.f32.mrb[249].mxu0  ;;  %v5933_v37 = vpop.f32.mrb[222].mxu1 }
 0x40e   : > { %v6038_v43 = vadd.f32 %v6037_v13, %v6036_v31  ;;  %v6039_v63 = vpop.f32.mrb[250].mxu0  ;;  %v5934_v53 = vpop.f32.mrb[223].mxu1 }
 0x40f   : > { %v4369_v27 = vadd.f32 %v5932_v25, %v7662_v40  ;;  %v5935_v21 = vadd.f32 %v5934_v53, %v5933_v37  ;;  %v6040_v33 = vpop.f32.mrb[251].mxu0 }
 0x410   : > { %v6041_v20 = vadd.f32 %v6040_v33, %v6039_v63  ;;  %v7754_v41 = vadd.f32 %v6038_v43, %v4361_v62 }
 0x411   : > { %v4372_v1 = vadd.f32 %v5935_v21, %v7664_v52 }
 0x412   : > { %v7757_v38 = vadd.f32 %v6041_v20, %v4364_v49 }
 0x413   : > { %v5936_v28 = vpop.f32.mrb[224].mxu1 }
 0x414   : > { %v6042_v56 = vpop.f32.mrb[252].mxu0  ;;  %v5937_v7 = vpop.f32.mrb[225].mxu1 }
 0x415   : > { %v5938_v6 = vadd.f32 %v5937_v7, %v5936_v28  ;;  %v6043_v44 = vpop.f32.mrb[253].mxu0  ;;  %v5939_v46 = vpop.f32.mrb[226].mxu1 }
 0x416   : > { %v6044_v51 = vadd.f32 %v6043_v44, %v6042_v56  ;;  %v6045_v57 = vpop.f32.mrb[254].mxu0  ;;  %v5940_v12 = vpop.f32.mrb[227].mxu1 }
 0x417   : > { %v4377_v40 = vadd.f32 %v5938_v6, %v7668_v32  ;;  %v5941_v3 = vadd.f32 %v5940_v12, %v5939_v46  ;;  %v6046_v16 = vpop.f32.mrb[255].mxu0 }
 0x418   : > { %v6047_v34 = vadd.f32 %v6046_v16, %v6045_v57  ;;  %v7760_v50 = vadd.f32 %v6044_v51, %v4369_v27 }
 0x419   : > { %v4380_v52 = vadd.f32 %v5941_v3, %v7670_v54 }
 0x41a   : > { %v7763_v62 = vadd.f32 %v6047_v34, %v4372_v1 }
 0x41b   : > { %v5942_v10 = vpop.f32.mrb[228].mxu1 }
 0x41c   : > { %v6048_v24 = vpop.f32.mrb[0].mxu0  ;;  %v5943_v4 = vpop.f32.mrb[229].mxu1 }
 0x41d   : > { %v5944_v49 = vadd.f32 %v5943_v4, %v5942_v10  ;;  %v6049_v61 = vpop.f32.mrb[1].mxu0  ;;  %v5945_v31 = vpop.f32.mrb[230].mxu1 }
 0x41e   : > { %v6050_v17 = vadd.f32 %v6049_v61, %v6048_v24  ;;  %v6051_v25 = vpop.f32.mrb[2].mxu0  ;;  %v5946_v13 = vpop.f32.mrb[231].mxu1 }
 0x41f   : > { %v4385_v32 = vadd.f32 %v5944_v49, %v7674_v9  ;;  %v5947_v37 = vadd.f32 %v5946_v13, %v5945_v31  ;;  %v6052_v43 = vpop.f32.mrb[3].mxu0 }
 0x420   : > { %v6053_v63 = vadd.f32 %v6052_v43, %v6051_v25  ;;  %v7766_v53 = vadd.f32 %v6050_v17, %v4377_v40 }
 0x421   : > { %v4388_v54 = vadd.f32 %v5947_v37, %v7676_v39 }
 0x422   : > { %v7769_v27 = vadd.f32 %v6053_v63, %v4380_v52 }
 0x423   : > { %v5948_v21 = vpop.f32.mrb[232].mxu1 }
 0x424   : > { %v6054_v33 = vpop.f32.mrb[4].mxu0  ;;  %v5949_v20 = vpop.f32.mrb[233].mxu1 }
 0x425   : > { %v5950_v1 = vadd.f32 %v5949_v20, %v5948_v21  ;;  %v6055_v28 = vpop.f32.mrb[5].mxu0  ;;  %v5951_v56 = vpop.f32.mrb[234].mxu1 }
 0x426   : > { %v6056_v7 = vadd.f32 %v6055_v28, %v6054_v33  ;;  %v6057_v6 = vpop.f32.mrb[6].mxu0  ;;  %v5952_v44 = vpop.f32.mrb[235].mxu1 }
 0x427   : > { %v4393_v9 = vadd.f32 %v5950_v1, %v7680_v29  ;;  %v5953_v46 = vadd.f32 %v5952_v44, %v5951_v56  ;;  %v6058_v51 = vpop.f32.mrb[7].mxu0 }
 0x428   : > { %v6059_v57 = vadd.f32 %v6058_v51, %v6057_v6  ;;  %v7772_v12 = vadd.f32 %v6056_v7, %v4385_v32 }
 0x429   : > { %v4396_v39 = vadd.f32 %v5953_v46, %v7683_v0 }
 0x42a   : > { %v7775_v40 = vadd.f32 %v6059_v57, %v4388_v54 }
 0x42b   : > { %v5954_v3 = vpop.f32.mrb[236].mxu1 }
 0x42c   : > { %v6060_v16 = vpop.f32.mrb[8].mxu0  ;;  %v5955_v34 = vpop.f32.mrb[237].mxu1 }
 0x42d   : > { %v5956_v52 = vadd.f32 %v5955_v34, %v5954_v3  ;;  %v6061_v10 = vpop.f32.mrb[9].mxu0  ;;  %v5957_v24 = vpop.f32.mrb[238].mxu1 }
 0x42e   : > { %v6062_v4 = vadd.f32 %v6061_v10, %v6060_v16  ;;  %v6063_v49 = vpop.f32.mrb[10].mxu0  ;;  %v5958_v61 = vpop.f32.mrb[239].mxu1 }
 0x42f   : > { %v4401_v29 = vadd.f32 %v5956_v52, %v7687_v19  ;;  %v5959_v31 = vadd.f32 %v5958_v61, %v5957_v24  ;;  %v6064_v17 = vpop.f32.mrb[11].mxu0 }
 0x430   : > { %v6065_v25 = vadd.f32 %v6064_v17, %v6063_v49  ;;  %v7778_v13 = vadd.f32 %v6062_v4, %v4393_v9 }
 0x431   : > { %v4404_v0 = vadd.f32 %v5959_v31, %v7689_v15 }
 0x432   : > { %v7781_v32 = vadd.f32 %v6065_v25, %v4396_v39 }
 0x433   : > { %v5960_v37 = vpop.f32.mrb[240].mxu1 }
 0x434   : > { %v6066_v43 = vpop.f32.mrb[12].mxu0  ;;  %v5961_v63 = vpop.f32.mrb[241].mxu1 }
 0x435   : > { %v5962_v54 = vadd.f32 %v5961_v63, %v5960_v37  ;;  %v6067_v21 = vpop.f32.mrb[13].mxu0  ;;  %v5963_v33 = vpop.f32.mrb[242].mxu1 }
 0x436   : > { %v6068_v20 = vadd.f32 %v6067_v21, %v6066_v43  ;;  %v6069_v1 = vpop.f32.mrb[14].mxu0  ;;  %v5964_v28 = vpop.f32.mrb[243].mxu1 }
 0x437   : > { %v4409_v19 = vadd.f32 %v5962_v54, %v7693_v36  ;;  %v5965_v56 = vadd.f32 %v5964_v28, %v5963_v33  ;;  %v6070_v7 = vpop.f32.mrb[15].mxu0 }
 0x438   : > { %v6071_v6 = vadd.f32 %v6070_v7, %v6069_v1  ;;  %v7784_v44 = vadd.f32 %v6068_v20, %v4401_v29 }
 0x439   : > { %v4412_v15 = vadd.f32 %v5965_v56, %v7695_v8 }
 0x43a   : > { %v7787_v9 = vadd.f32 %v6071_v6, %v4404_v0 }
 0x43b   : > { %v5966_v46 = vpop.f32.mrb[244].mxu1 }
 0x43c   : > { %v6072_v51 = vpop.f32.mrb[16].mxu0  ;;  %v5967_v57 = vpop.f32.mrb[245].mxu1 }
 0x43d   : > { %v5968_v39 = vadd.f32 %v5967_v57, %v5966_v46  ;;  %v6073_v3 = vpop.f32.mrb[17].mxu0  ;;  %v5969_v16 = vpop.f32.mrb[246].mxu1 }
 0x43e   : > { %v6074_v34 = vadd.f32 %v6073_v3, %v6072_v51  ;;  %v6075_v52 = vpop.f32.mrb[18].mxu0  ;;  %v5970_v10 = vpop.f32.mrb[247].mxu1 }
 0x43f   : > { %v4417_v36 = vadd.f32 %v5968_v39, %v7699_v42  ;;  %v5971_v24 = vadd.f32 %v5970_v10, %v5969_v16  ;;  %v6076_v4 = vpop.f32.mrb[19].mxu0 }
 0x440   : > { %v6077_v49 = vadd.f32 %v6076_v4, %v6075_v52  ;;  %v7790_v61 = vadd.f32 %v6074_v34, %v4409_v19 }
 0x441   : > { %v4420_v8 = vadd.f32 %v5971_v24, %v7701_v30 }
 0x442   : > { %v7793_v29 = vadd.f32 %v6077_v49, %v4412_v15 }
 0x443   : > { %v5972_v31 = vpop.f32.mrb[248].mxu1 }
 0x444   : > { %v6078_v17 = vpop.f32.mrb[20].mxu0  ;;  %v5973_v25 = vpop.f32.mrb[249].mxu1 }
 0x445   : > { %v5974_v0 = vadd.f32 %v5973_v25, %v5972_v31  ;;  %v6079_v37 = vpop.f32.mrb[21].mxu0  ;;  %v5975_v43 = vpop.f32.mrb[250].mxu1 }
 0x446   : > { %v6080_v63 = vadd.f32 %v6079_v37, %v6078_v17  ;;  %v6081_v54 = vpop.f32.mrb[22].mxu0  ;;  %v5976_v21 = vpop.f32.mrb[251].mxu1 }
 0x447   : > { %v4425_v42 = vadd.f32 %v5974_v0, %v7705_v60  ;;  %v5977_v33 = vadd.f32 %v5976_v21, %v5975_v43  ;;  %v6082_v20 = vpop.f32.mrb[23].mxu0 }
 0x448   : > { %v6083_v1 = vadd.f32 %v6082_v20, %v6081_v54  ;;  %v7796_v28 = vadd.f32 %v6080_v63, %v4417_v36 }
 0x449   : > { %v4428_v30 = vadd.f32 %v5977_v33, %v7707_v11 }
 0x44a   : > { %v7799_v19 = vadd.f32 %v6083_v1, %v4420_v8 }
 0x44b   : > { %v5978_v56 = vpop.f32.mrb[252].mxu1 }
 0x44c   : > { %v6084_v7 = vpop.f32.mrb[24].mxu0  ;;  %v5979_v6 = vpop.f32.mrb[253].mxu1 }
 0x44d   : > { %v5980_v15 = vadd.f32 %v5979_v6, %v5978_v56  ;;  %v6085_v46 = vpop.f32.mrb[25].mxu0  ;;  %v5981_v51 = vpop.f32.mrb[254].mxu1 }
 0x44e   : > { %v6086_v57 = vadd.f32 %v6085_v46, %v6084_v7  ;;  %v6087_v39 = vpop.f32.mrb[26].mxu0  ;;  %v5982_v3 = vpop.f32.mrb[255].mxu1 }
 0x44f   : > { %v4433_v60 = vadd.f32 %v5980_v15, %v7712_v55  ;;  %v5983_v16 = vadd.f32 %v5982_v3, %v5981_v51  ;;  %v6088_v34 = vpop.f32.mrb[27].mxu0 }
 0x450   : > { %v6089_v52 = vadd.f32 %v6088_v34, %v6087_v39  ;;  %v7802_v10 = vadd.f32 %v6086_v57, %v4425_v42 }
 0x451   : > { %v4436_v11 = vadd.f32 %v5983_v16, %v7715_v26 }
 0x452   : > { %v7806_v36 = vadd.f32 %v6089_v52, %v4428_v30 }
 0x453   : > { %v6186_v24 = vpop.f32.mrb[0].mxu1 }
 0x454   : > { %v6090_v4 = vpop.f32.mrb[28].mxu0  ;;  %v4643_v49 = vadd.f32 %v6186_v24, %v7724_v58  ;;  %v4634_v8 = vpop.f32.mrb[1].mxu1 }
 0x455   : > { %v6091_v31 = vpop.f32.mrb[29].mxu0  ;;  %v4635_v17 = vadd.f32 %v4634_v8, %v7718_v23  ;;  %v6187_v25 = vpop.f32.mrb[2].mxu1 }
 0x456   : > { %v4763_v55 = vmax.f32 %v4643_v49, 0.0  ;;  %v6092_v0 = vadd.f32 %v6091_v31, %v6090_v4  ;;  %v6093_v37 = vpop.f32.mrb[30].mxu0  ;;  %v4646_v43 = vadd.f32 %v6187_v25, %v7727_v59  ;;  %v4637_v63 = vpop.f32.mrb[3].mxu1 }
 0x457   : > { %v4761_v54 = vmax.f32 %v4635_v17, 0.0  ;;  %v6094_v26 = vpop.f32.mrb[31].mxu0  ;;  %v4638_v21 = vadd.f32 %v4637_v63, %v7721_v47 }
 0x458   : > { %4795 = vst [vmem:[%s7812_s28 + $0x10] sm:$0xff] %v4763_v55  ;;  %v4764_v58 = vmax.f32 %v4646_v43, 0.0  ;;  %v6095_v23 = vadd.f32 %v6094_v26, %v6093_v37  ;;  %v7815_v42 = vadd.f32 %v6092_v0, %v4433_v60 }
 0x459   : > { %4793 = vst [vmem:[%s7812_s28] sm:$0xff] %v4761_v54  ;;  %v4762_v33 = vmax.f32 %v4638_v21, 0.0 }
 0x45a   : > { %4796 = vst [vmem:[%s7812_s28 + $0x18] sm:$0xff] %v4764_v58  ;;  %v7819_v59 = vadd.f32 %v6095_v23, %v4436_v11 }
 0x45b   : > { %4794 = vst [vmem:[%s7812_s28 + $0x8] sm:$0xff] %v4762_v33  ;;  %v6190_v47 = vpop.f32.mrb[4].mxu1 }
 0x45c   : > { %v4659_v20 = vadd.f32 %v6190_v47, %v7736_v18  ;;  %v4650_v1 = vpop.f32.mrb[5].mxu1 }
 0x45d   : > { %v4651_v30 = vadd.f32 %v4650_v1, %v7730_v48  ;;  %v6191_v56 = vpop.f32.mrb[6].mxu1 }
 0x45e   : > { %v4767_v7 = vmax.f32 %v4659_v20, 0.0  ;;  %v4662_v6 = vadd.f32 %v6191_v56, %v7739_v45  ;;  %v4653_v15 = vpop.f32.mrb[7].mxu1 }
 0x45f   : > { %v4765_v46 = vmax.f32 %v4651_v30, 0.0  ;;  %v4654_v51 = vadd.f32 %v4653_v15, %v7733_v5 }
 0x460   : > { %4799 = vst [vmem:[%s7812_s28 + $0x30] sm:$0xff] %v4767_v7  ;;  %v4768_v57 = vmax.f32 %v4662_v6, 0.0 }
 0x461   : > { %4797 = vst [vmem:[%s7812_s28 + $0x20] sm:$0xff] %v4765_v46  ;;  %v4766_v39 = vmax.f32 %v4654_v51, 0.0 }
 0x462   : > { %4800 = vst [vmem:[%s7812_s28 + $0x38] sm:$0xff] %v4768_v57 }
 0x463   : > { %4798 = vst [vmem:[%s7812_s28 + $0x28] sm:$0xff] %v4766_v39  ;;  %v6194_v18 = vpop.f32.mrb[8].mxu1 }
 0x464   : > { %v4675_v48 = vadd.f32 %v6194_v18, %v7748_v35  ;;  %v4666_v3 = vpop.f32.mrb[9].mxu1 }
 0x465   : > { %v4667_v45 = vadd.f32 %v4666_v3, %v7742_v14  ;;  %v6195_v60 = vpop.f32.mrb[10].mxu1 }
 0x466   : > { %v4771_v16 = vmax.f32 %v4675_v48, 0.0  ;;  %v4678_v5 = vadd.f32 %v6195_v60, %v7751_v22  ;;  %v4669_v34 = vpop.f32.mrb[11].mxu1 }
 0x467   : > { %v4769_v52 = vmax.f32 %v4667_v45, 0.0  ;;  %v4670_v11 = vadd.f32 %v4669_v34, %v7745_v2 }
 0x468   : > { %4803 = vst [vmem:[%s7812_s28 + $0x50] sm:$0xff] %v4771_v16  ;;  %v4772_v24 = vmax.f32 %v4678_v5, 0.0 }
 0x469   : > { %4801 = vst [vmem:[%s7812_s28 + $0x40] sm:$0xff] %v4769_v52  ;;  %v4770_v4 = vmax.f32 %v4670_v11, 0.0 }
 0x46a   : > { %4804 = vst [vmem:[%s7812_s28 + $0x58] sm:$0xff] %v4772_v24 }
 0x46b   : > { %4802 = vst [vmem:[%s7812_s28 + $0x48] sm:$0xff] %v4770_v4  ;;  %v6198_v35 = vpop.f32.mrb[12].mxu1 }
 0x46c   : > { %v4691_v14 = vadd.f32 %v6198_v35, %v7760_v50  ;;  %v4682_v49 = vpop.f32.mrb[13].mxu1 }
 0x46d   : > { %v4683_v22 = vadd.f32 %v4682_v49, %v7754_v41  ;;  %v6199_v8 = vpop.f32.mrb[14].mxu1 }
 0x46e   : > { %v4775_v31 = vmax.f32 %v4691_v14, 0.0  ;;  %v4694_v2 = vadd.f32 %v6199_v8, %v7763_v62  ;;  %v4685_v17 = vpop.f32.mrb[15].mxu1 }
 0x46f   : > { %v4773_v25 = vmax.f32 %v4683_v22, 0.0  ;;  %v4686_v55 = vadd.f32 %v4685_v17, %v7757_v38 }
 0x470   : > { %4807 = vst [vmem:[%s7812_s28 + $0x70] sm:$0xff] %v4775_v31  ;;  %v4776_v0 = vmax.f32 %v4694_v2, 0.0 }
 0x471   : > { %4805 = vst [vmem:[%s7812_s28 + $0x60] sm:$0xff] %v4773_v25  ;;  %v4774_v37 = vmax.f32 %v4686_v55, 0.0 }
 0x472   : > { %4808 = vst [vmem:[%s7812_s28 + $0x78] sm:$0xff] %v4776_v0 }
 0x473   : > { %4806 = vst [vmem:[%s7812_s28 + $0x68] sm:$0xff] %v4774_v37  ;;  %v6202_v50 = vpop.f32.mrb[16].mxu1 }
 0x474   : > { %v4707_v41 = vadd.f32 %v6202_v50, %v7772_v12  ;;  %v4698_v43 = vpop.f32.mrb[17].mxu1 }
 0x475   : > { %v4699_v62 = vadd.f32 %v4698_v43, %v7766_v53  ;;  %v6203_v63 = vpop.f32.mrb[18].mxu1 }
 0x476   : > { %v4779_v54 = vmax.f32 %v4707_v41, 0.0  ;;  %v4710_v38 = vadd.f32 %v6203_v63, %v7775_v40  ;;  %v4701_v26 = vpop.f32.mrb[19].mxu1 }
 0x477   : > { %v4777_v21 = vmax.f32 %v4699_v62, 0.0  ;;  %v4702_v58 = vadd.f32 %v4701_v26, %v7769_v27 }
 0x478   : > { %4811 = vst [vmem:[%s7812_s28 + $0x90] sm:$0xff] %v4779_v54  ;;  %v4780_v23 = vmax.f32 %v4710_v38, 0.0 }
 0x479   : > { %4809 = vst [vmem:[%s7812_s28 + $0x80] sm:$0xff] %v4777_v21  ;;  %v4778_v33 = vmax.f32 %v4702_v58, 0.0 }
 0x47a   : > { %4812 = vst [vmem:[%s7812_s28 + $0x98] sm:$0xff] %v4780_v23 }
 0x47b   : > { %4810 = vst [vmem:[%s7812_s28 + $0x88] sm:$0xff] %v4778_v33  ;;  %v6206_v12 = vpop.f32.mrb[20].mxu1 }
 0x47c   : > { %v4723_v53 = vadd.f32 %v6206_v12, %v7784_v44  ;;  %v4714_v47 = vpop.f32.mrb[21].mxu1 }
 0x47d   : > { %v4715_v40 = vadd.f32 %v4714_v47, %v7778_v13  ;;  %v6207_v20 = vpop.f32.mrb[22].mxu1 }
 0x47e   : > { %v4783_v1 = vmax.f32 %v4723_v53, 0.0  ;;  %v4726_v27 = vadd.f32 %v6207_v20, %v7787_v9  ;;  %v4717_v30 = vpop.f32.mrb[23].mxu1 }
 0x47f   : > { %v4781_v56 = vmax.f32 %v4715_v40, 0.0  ;;  %v4718_v7 = vadd.f32 %v4717_v30, %v7781_v32 }
 0x480   : > { %4815 = vst [vmem:[%s7812_s28 + $0xb0] sm:$0xff] %v4783_v1  ;;  %v4784_v6 = vmax.f32 %v4726_v27, 0.0 }
 0x481   : > { %4813 = vst [vmem:[%s7812_s28 + $0xa0] sm:$0xff] %v4781_v56  ;;  %v4782_v15 = vmax.f32 %v4718_v7, 0.0 }
 0x482   : > { %4816 = vst [vmem:[%s7812_s28 + $0xb8] sm:$0xff] %v4784_v6 }
 0x483   : > { %4814 = vst [vmem:[%s7812_s28 + $0xa8] sm:$0xff] %v4782_v15  ;;  %v6210_v44 = vpop.f32.mrb[24].mxu1 }
 0x484   : > { %v4739_v13 = vadd.f32 %v6210_v44, %v7796_v28  ;;  %v4730_v46 = vpop.f32.mrb[25].mxu1 }
 0x485   : > { %v4731_v9 = vadd.f32 %v4730_v46, %v7790_v61  ;;  %v6211_v51 = vpop.f32.mrb[26].mxu1 }
 0x486   : > { %v4787_v57 = vmax.f32 %v4739_v13, 0.0  ;;  %v4742_v32 = vadd.f32 %v6211_v51, %v7799_v19  ;;  %v4733_v39 = vpop.f32.mrb[27].mxu1 }
 0x487   : > { %v4785_v18 = vmax.f32 %v4731_v9, 0.0  ;;  %v4734_v48 = vadd.f32 %v4733_v39, %v7793_v29 }
 0x488   : > { %4819 = vst [vmem:[%s7812_s28 + $0xd0] sm:$0xff] %v4787_v57  ;;  %v4788_v3 = vmax.f32 %v4742_v32, 0.0 }
 0x489   : > { %4817 = vst [vmem:[%s7812_s28 + $0xc0] sm:$0xff] %v4785_v18  ;;  %v4786_v45 = vmax.f32 %v4734_v48, 0.0 }
 0x48a   : > { %4820 = vst [vmem:[%s7812_s28 + $0xd8] sm:$0xff] %v4788_v3 }
 0x48b   : > { %4818 = vst [vmem:[%s7812_s28 + $0xc8] sm:$0xff] %v4786_v45  ;;  %v6214_v28 = vpop.f32.mrb[28].mxu1 }
 0x48c   : > { %v4755_v61 = vadd.f32 %v6214_v28, %v7815_v42  ;;  %v4746_v60 = vpop.f32.mrb[29].mxu1 }
 0x48d   : > { %v4747_v19 = vadd.f32 %v4746_v60, %v7802_v10  ;;  %v6215_v16 = vpop.f32.mrb[30].mxu1 }
 0x48e   : > { %v4791_v29 = vmax.f32 %v4755_v61, 0.0  ;;  %v4758_v5 = vadd.f32 %v6215_v16, %v7819_v59  ;;  %v4749_v34 = vpop.f32.mrb[31].mxu1 }
 0x48f   : > { %v4789_v52 = vmax.f32 %v4747_v19, 0.0  ;;  %v4750_v11 = vadd.f32 %v4749_v34, %v7806_v36 }
 0x490   : > { %4823 = vst [vmem:[%s7812_s28 + $0xf0] sm:$0xff] %v4791_v29  ;;  %v4792_v24 = vmax.f32 %v4758_v5, 0.0 }
 0x491   : > { %4821 = vst [vmem:[%s7812_s28 + $0xe0] sm:$0xff] %v4789_v52  ;;  %v4790_v10 = vmax.f32 %v4750_v11, 0.0 }
 0x492   : > { %4824 = vst [vmem:[%s7812_s28 + $0xf8] sm:$0xff] %v4792_v24 }
 0x493   : > { %4822 = vst [vmem:[%s7812_s28 + $0xe8] sm:$0xff] %v4790_v10 }
 0x494   : > { %6550 = shalt.err (!%p6547_p1)
}
 0x495   : > { %s6551_s24 = scalar_lea.hbm %s7880_s17, 4096  ;;  %s6555_s16 = scalar_lea.hbm %s7934_s5, 8192 }
 0x496   : > { %p6552_p13 = scmp.ne.s32.totalorder %s7880_s17, %s6551_s24  ;;  %p6556_p4 = scmp.lt.u32.totalorder %s7880_s17, %s7934_s5 }
 0x497   : > { %p6557_p5 = scmp.lt.u32.totalorder %s6555_s16, %s6551_s24  ;;  %p6559_p11 = scmp.lt.u32.totalorder %s6551_s24, %s7880_s17 }
 0x498   : > { %p6553_p6 = pnand %p6552_p13, %p7948_p0 }
 0x499   : > { %p6558_p8 = por %p6557_p5, %p6556_p4 }
 0x49a   : > { %p6554_p10 = pneg %p6553_p6 }
 0x49b   : > { %p6560_p2 = por %p6559_p11, %p6558_p8 }
 0x49d   : > { %p6561_p3 = pnand %p6560_p2, %p6554_p10 }
 0x49f   : > { %6564 = shalt.err (!%p6561_p3)
}
 0x4a0   : > { %s6617_s12 = smov 128   ;;  %s6618_s30 = smov 8  }
 0x4a1   : > { %6226 = dma.vmem_to_hbm [thread:$0]  (%p7948_p0), %s7882_s13, 4096, %s7880_s17, %s4826_s22, %s6617_s12, %s6617_s12, %s6618_s30  }
 0x4a2 PF: > { %s4854_s11 = sand.u32 1, %s6595_s18   ;;  %p7949_p7 = scmp.ne.s32.totalorder %s7939_s25, 0 }
 0x4a3   : > { %p7950_p9 = scmp.ge.s32.totalorder %s6607_s21, 2  ;;  %s4855_s7 = scalar_lea.sflag [#allocation8], %s4854_s11 }
 0x4a5   : > { %p6240_p12 = pnand %p7950_p9, %p7949_p7 }
 0x4a7   : > { %6590 = dma.done.wait (!%p6240_p12), %s4855_s7, 4096  }
 0x4a8   : > { %6592 = vsyncadd (!%p6240_p12), %s4855_s7, 4294963200  ;;  %p19_p1 = scmp.ge.s32.totalorder %s6765_s29, 4   ;;  %s7951_s18 = smov %s6599_s19 }
 0x4a9   : > { %s7952_s19 = smov %s6603_s20  ;;  %s7953_s20 = smov %s6781_s27 }
 0x4aa   : > { %s7954_s21 = smov %s6765_s29  ;;  %21 = sbr.rel (!%p19_p1) target bundleno = 6 (0x6), region = 97 }
 0x4b1   :  { %4860 = vsyncpa [#allocation7], 1 }
 0x4b2   :  { %4862 = vsyncpa [#allocation7 + $0x1], 1 }
 0x4b3   :  { %4863 = vsyncpa [#allocation10], 1 }
 0x4b4   :  { %4864 = vsyncpa [#allocation8], 1 }
 0x4b5   :  { %4866 = vsyncpa [#allocation8 + $0x1], 1 }

</bundles_post_ra>
